<compile_context>
chip_gen: v5e
topology: v5e:2x2
jax: 0.10.0
libtpu: 0.0.40
codegen_flags: <defaults>
</compile_context>

<pallas_src>
import functools

import jax
import jax.numpy as jnp
from jax import lax
from jax.experimental import pallas as pl
from jax.experimental.pallas import tpu as pltpu

EPS = 1e-5  # nn.InstanceNorm2d default


def _masked_in_stats(y, maskb, inv_hw):
    """One-pass per-channel mean / inv-std over the real pixels only.

    y:     (C, R) f32 conv output over the padded compute range.
    maskb: (C, R) 0/1 mask (0 on W-padding columns).
    """
    ym = y * maskb
    s1 = jnp.sum(ym, axis=-1, keepdims=True)       # (C, 1)
    s2 = jnp.sum(ym * y, axis=-1, keepdims=True)   # (C, 1)  masked E[y^2]*HW
    mean = s1 * inv_hw
    var = s2 * inv_hw - mean * mean                # biased variance
    return mean, lax.rsqrt(var + EPS)


def residual_block_kernel(x_ref, w1_ref, w2_ref, mask_ref, o_ref,
                          ypad_ref, slab_ref, *, H, W, q0):
    Wp = W + 2
    R = H * Wp                      # contiguous compute range (incl. W-pad cols)
    C = w1_ref.shape[0]
    dt = x_ref.dtype

    inv_hw = jnp.float32(1.0 / (H * W))
    # hoist the broadcast once; reused by both convs
    maskb = jnp.broadcast_to(mask_ref[...], (C, R)).astype(jnp.float32)

    def build_slab(read):
        # im2col: stack the 9 tap windows along sublanes -> (9*C, R) slab so
        # each conv is a single MXU matmul with K = 9*C.
        for k in range(9):
            kh, kw = divmod(k, 3)
            s = q0 + (kh - 1) * Wp + (kw - 1)       # static window start
            slab_ref[k * C:(k + 1) * C, :] = read(s)

    # ---- conv1 -> instance norm -> ReLU ----------------------------------
    build_slab(lambda s: x_ref[0, :, s:s + R])
    y = jnp.dot(w1_ref[...], slab_ref[...], preferred_element_type=jnp.float32)
    mean1, inv_std1 = _masked_in_stats(y, maskb, inv_hw)
    # ReLU, then re-zero the W-pad columns so conv2 sees true zero padding
    y = jnp.maximum((y - mean1) * inv_std1, 0.0) * maskb

    # Stage the intermediate in a padded scratch so conv2 taps are again plain
    # windows.  Only the small halos outside [q0, q0+R) need explicit zeros;
    # the centre is fully rewritten every iteration and its pad columns are
    # already zero thanks to the mask (cheap + megacore-safe).
    ypad_ref[:, q0 - Wp - 1:q0] = jnp.zeros((C, Wp + 1), dt)
    ypad_ref[:, q0 + R:q0 + R + Wp + 1] = jnp.zeros((C, Wp + 1), dt)
    ypad_ref[:, q0:q0 + R] = y.astype(dt)

    # ---- conv2 -> instance norm ------------------------------------------
    build_slab(lambda s: ypad_ref[:, s:s + R])
    z = jnp.dot(w2_ref[...], slab_ref[...], preferred_element_type=jnp.float32)
    mean2, inv_std2 = _masked_in_stats(z, maskb, inv_hw)
    z = (z - mean2) * inv_std2

    # ---- residual add (values at W-pad columns are sliced away outside) ---
    o_ref[0] = (x_ref[0, :, q0:q0 + R] + z).astype(o_ref.dtype)


def residual_block(x_nchw, w1_oihw, w2_oihw):
    """Pallas implementation of ResidualBlock.forward for NCHW input."""
    N, C, H, W = x_nchw.shape
    Wp, Hp = W + 2, H + 2
    P = Hp * Wp                      # fully padded image, flattened
    R = H * Wp                       # compute range covering all real pixels
    pad0 = (-(Wp + 1)) % 128         # lane-tile-align the centre window
    q0 = pad0 + Wp + 1               # flat index of real pixel (0, 0)
    P2 = q0 + R + Wp + 1             # exact extent touched by the 9 taps

    dt = x_nchw.dtype

    # Stage: zero-pad H and W by 1 ('same' conv), flatten space, add halo.
    # No NCHW<->NHWC transposes anywhere.
    x_pad = jnp.pad(x_nchw, ((0, 0), (0, 0), (1, 1), (1, 1)))
    x_flat = jnp.pad(x_pad.reshape(N, C, P),
                     ((0, 0), (0, 0), (pad0, P2 - P - pad0)))

    # Conv weights (O, I, 3, 3) -> (O, 9*I), column = (3*kh + kw)*C + i,
    # matching the slab's sublane order.
    def flat_w(w):
        return jnp.transpose(w, (0, 2, 3, 1)).reshape(C, 9 * C).astype(dt)

    w1 = flat_w(w1_oihw)
    w2 = flat_w(w2_oihw)

    # 1 = real pixel, 0 = W-padding column, over the contiguous compute range.
    rr = jnp.arange(R, dtype=jnp.int32)
    mask = ((rr % Wp) < W).astype(jnp.float32).reshape(1, R)

    kern = functools.partial(residual_block_kernel, H=H, W=W, q0=q0)
    out_flat = pl.pallas_call(
        kern,
        out_shape=jax.ShapeDtypeStruct((N, C, R), dt),
        grid_spec=pltpu.PrefetchScalarGridSpec(
            num_scalar_prefetch=0,
            grid=(N,),
            in_specs=[
                pl.BlockSpec((1, C, P2), lambda n: (n, 0, 0)),  # padded x
                pl.BlockSpec((C, 9 * C), lambda n: (0, 0)),      # w1 (constant)
                pl.BlockSpec((C, 9 * C), lambda n: (0, 0)),      # w2 (constant)
                pl.BlockSpec((1, R), lambda n: (0, 0)),           # pixel mask
            ],
            out_specs=pl.BlockSpec((1, C, R), lambda n: (n, 0, 0)),
            scratch_shapes=[
                pltpu.VMEM((C, P2), dt),      # padded intermediate (conv1 out)
                pltpu.VMEM((9 * C, R), dt),   # im2col slab shared by both convs
            ],
        ),
        compiler_params=pltpu.CompilerParams(
            dimension_semantics=("parallel",),
            vmem_limit_bytes=32 * 1024 * 1024),
    )(x_flat, w1, w2, mask)

    # Drop the W-padding columns: (N, C, H*(W+2)) -> (N, C, H, W).  Already NCHW.
    return out_flat.reshape(N, C, H, Wp)[:, :, :, :W]


def ref_residual_block(x, w1, w2):
    """Pure-JAX reference matching the PyTorch module semantics."""
    dn = lax.conv_dimension_numbers(x.shape, w1.shape, ("NCHW", "OIHW", "NCHW"))

    def conv(a, w):
        return lax.conv_general_dilated(a, w, (1, 1), ((1, 1), (1, 1)),
                                        dimension_numbers=dn)

    def inorm(a):
        m = jnp.mean(a, axis=(2, 3), keepdims=True)
        v = jnp.mean(jnp.square(a - m), axis=(2, 3), keepdims=True)
        return (a - m) * lax.rsqrt(v + EPS)

    y = jnp.maximum(inorm(conv(x, w1)), 0.0)
    return x + inorm(conv(y, w2))


if __name__ == "__main__":
    key = jax.random.PRNGKey(0)
    kx, k1, k2 = jax.random.split(key, 3)

    N, C, H, W = 2, 32, 16, 16
    x = jax.random.normal(kx, (N, C, H, W), dtype=jnp.float32)
    scale = (1.0 / (C * 3 * 3)) ** 0.5   # fan-in scaling
    w1 = jax.random.normal(k1, (C, C, 3, 3), dtype=jnp.float32) * scale
    w2 = jax.random.normal(k2, (C, C, 3, 3), dtype=jnp.float32) * scale

    out = jax.block_until_ready(residual_block(x, w1, w2))

    ref = ref_residual_block(x, w1, w2)
    assert out.shape == ref.shape == (N, C, H, W)
    max_err = float(jnp.max(jnp.abs(out - ref)))
    if max_err > 5e-2:
        raise AssertionError(f"kernel/reference mismatch: max abs err {max_err}")
    print("KERNEL_OK")
</pallas_src>

<mosaic_0001>
module attributes {stable_mosaic.version = 11 : i64} {
  func.func @residual_block_kernel(%arg0: i32, %arg1: memref<1x32x435xf32, #tpu.memory_space<vmem>>, %arg2: memref<32x288xf32, #tpu.memory_space<vmem>>, %arg3: memref<32x288xf32, #tpu.memory_space<vmem>>, %arg4: memref<1x288xf32, #tpu.memory_space<vmem>>, %arg5: memref<1x32x288xf32, #tpu.memory_space<vmem>>, %arg6: memref<32x435xf32, #tpu.memory_space<vmem>>, %arg7: memref<288x288xf32, #tpu.memory_space<vmem>>) attributes {dimension_semantics = [#tpu.dimension_semantics<parallel>], iteration_bounds = array<i64: 2>, scalar_prefetch = 0 : i64, scratch_operands = 2 : i64, tpu.core_type = #tpu.core_type<tc>, window_params = [{transform_indices = @transform_0, window_bounds = array<i64: 1, 32, 435>}, {pipeline_mode = #tpu.pipeline_mode<synchronous>, transform_indices = @transform_1, window_bounds = array<i64: 32, 288>}, {pipeline_mode = #tpu.pipeline_mode<synchronous>, transform_indices = @transform_2, window_bounds = array<i64: 32, 288>}, {pipeline_mode = #tpu.pipeline_mode<synchronous>, transform_indices = @transform_3, window_bounds = array<i64: 1, 288>}, {transform_indices = @transform_4, window_bounds = array<i64: 1, 32, 288>}]} {
    %c0 = arith.constant 0 : index
    %c0_0 = arith.constant 0 : index
    %0 = vector.load %arg4[%c0, %c0_0] : memref<1x288xf32, #tpu.memory_space<vmem>>, vector<1x288xf32>
    %1 = vector.shape_cast %0 : vector<1x288xf32> to vector<1x288xf32>
    %2 = vector.broadcast %1 : vector<1x288xf32> to vector<32x288xf32>
    %c0_1 = arith.constant 0 : index
    %c0_2 = arith.constant 0 : index
    %c109 = arith.constant 109 : index
    %3 = vector.load %arg1[%c0_1, %c0_2, %c109] : memref<1x32x435xf32, #tpu.memory_space<vmem>>, vector<1x32x288xf32>
    %4 = vector.shape_cast %3 : vector<1x32x288xf32> to vector<32x288xf32>
    %c0_3 = arith.constant 0 : index
    %c0_4 = arith.constant 0 : index
    %5 = vector.load %arg7[%c0_3, %c0_4] : memref<288x288xf32, #tpu.memory_space<vmem>>, vector<32x288xf32>
    tpu.vector_store %arg7[%c0_3, %c0_4], %4 {strides = array<i32>} : memref<288x288xf32, #tpu.memory_space<vmem>>, vector<32x288xf32>,
    %c0_5 = arith.constant 0 : index
    %c0_6 = arith.constant 0 : index
    %c110 = arith.constant 110 : index
    %6 = vector.load %arg1[%c0_5, %c0_6, %c110] : memref<1x32x435xf32, #tpu.memory_space<vmem>>, vector<1x32x288xf32>
    %7 = vector.shape_cast %6 : vector<1x32x288xf32> to vector<32x288xf32>
    %c32 = arith.constant 32 : index
    %c0_7 = arith.constant 0 : index
    %8 = vector.load %arg7[%c32, %c0_7] : memref<288x288xf32, #tpu.memory_space<vmem>>, vector<32x288xf32>
    tpu.vector_store %arg7[%c32, %c0_7], %7 {strides = array<i32>} : memref<288x288xf32, #tpu.memory_space<vmem>>, vector<32x288xf32>,
    %c0_8 = arith.constant 0 : index
    %c0_9 = arith.constant 0 : index
    %c111 = arith.constant 111 : index
    %9 = vector.load %arg1[%c0_8, %c0_9, %c111] : memref<1x32x435xf32, #tpu.memory_space<vmem>>, vector<1x32x288xf32>
    %10 = vector.shape_cast %9 : vector<1x32x288xf32> to vector<32x288xf32>
    %c64 = arith.constant 64 : index
    %c0_10 = arith.constant 0 : index
    %11 = vector.load %arg7[%c64, %c0_10] : memref<288x288xf32, #tpu.memory_space<vmem>>, vector<32x288xf32>
    tpu.vector_store %arg7[%c64, %c0_10], %10 {strides = array<i32>} : memref<288x288xf32, #tpu.memory_space<vmem>>, vector<32x288xf32>,
    %c0_11 = arith.constant 0 : index
    %c0_12 = arith.constant 0 : index
    %c127 = arith.constant 127 : index
    %12 = vector.load %arg1[%c0_11, %c0_12, %c127] : memref<1x32x435xf32, #tpu.memory_space<vmem>>, vector<1x32x288xf32>
    %13 = vector.shape_cast %12 : vector<1x32x288xf32> to vector<32x288xf32>
    %c96 = arith.constant 96 : index
    %c0_13 = arith.constant 0 : index
    %14 = vector.load %arg7[%c96, %c0_13] : memref<288x288xf32, #tpu.memory_space<vmem>>, vector<32x288xf32>
    tpu.vector_store %arg7[%c96, %c0_13], %13 {strides = array<i32>} : memref<288x288xf32, #tpu.memory_space<vmem>>, vector<32x288xf32>,
    %c0_14 = arith.constant 0 : index
    %c0_15 = arith.constant 0 : index
    %c128 = arith.constant 128 : index
    %15 = vector.load %arg1[%c0_14, %c0_15, %c128] : memref<1x32x435xf32, #tpu.memory_space<vmem>>, vector<1x32x288xf32>
    %16 = vector.shape_cast %15 : vector<1x32x288xf32> to vector<32x288xf32>
    %c128_16 = arith.constant 128 : index
    %c0_17 = arith.constant 0 : index
    %17 = vector.load %arg7[%c128_16, %c0_17] : memref<288x288xf32, #tpu.memory_space<vmem>>, vector<32x288xf32>
    tpu.vector_store %arg7[%c128_16, %c0_17], %16 {strides = array<i32>} : memref<288x288xf32, #tpu.memory_space<vmem>>, vector<32x288xf32>,
    %c0_18 = arith.constant 0 : index
    %c0_19 = arith.constant 0 : index
    %c129 = arith.constant 129 : index
    %18 = vector.load %arg1[%c0_18, %c0_19, %c129] : memref<1x32x435xf32, #tpu.memory_space<vmem>>, vector<1x32x288xf32>
    %19 = vector.shape_cast %18 : vector<1x32x288xf32> to vector<32x288xf32>
    %c160 = arith.constant 160 : index
    %c0_20 = arith.constant 0 : index
    %20 = vector.load %arg7[%c160, %c0_20] : memref<288x288xf32, #tpu.memory_space<vmem>>, vector<32x288xf32>
    tpu.vector_store %arg7[%c160, %c0_20], %19 {strides = array<i32>} : memref<288x288xf32, #tpu.memory_space<vmem>>, vector<32x288xf32>,
    %c0_21 = arith.constant 0 : index
    %c0_22 = arith.constant 0 : index
    %c145 = arith.constant 145 : index
    %21 = vector.load %arg1[%c0_21, %c0_22, %c145] : memref<1x32x435xf32, #tpu.memory_space<vmem>>, vector<1x32x288xf32>
    %22 = vector.shape_cast %21 : vector<1x32x288xf32> to vector<32x288xf32>
    %c192 = arith.constant 192 : index
    %c0_23 = arith.constant 0 : index
    %23 = vector.load %arg7[%c192, %c0_23] : memref<288x288xf32, #tpu.memory_space<vmem>>, vector<32x288xf32>
    tpu.vector_store %arg7[%c192, %c0_23], %22 {strides = array<i32>} : memref<288x288xf32, #tpu.memory_space<vmem>>, vector<32x288xf32>,
    %c0_24 = arith.constant 0 : index
    %c0_25 = arith.constant 0 : index
    %c146 = arith.constant 146 : index
    %24 = vector.load %arg1[%c0_24, %c0_25, %c146] : memref<1x32x435xf32, #tpu.memory_space<vmem>>, vector<1x32x288xf32>
    %25 = vector.shape_cast %24 : vector<1x32x288xf32> to vector<32x288xf32>
    %c224 = arith.constant 224 : index
    %c0_26 = arith.constant 0 : index
    %26 = vector.load %arg7[%c224, %c0_26] : memref<288x288xf32, #tpu.memory_space<vmem>>, vector<32x288xf32>
    tpu.vector_store %arg7[%c224, %c0_26], %25 {strides = array<i32>} : memref<288x288xf32, #tpu.memory_space<vmem>>, vector<32x288xf32>,
    %c0_27 = arith.constant 0 : index
    %c0_28 = arith.constant 0 : index
    %c147 = arith.constant 147 : index
    %27 = vector.load %arg1[%c0_27, %c0_28, %c147] : memref<1x32x435xf32, #tpu.memory_space<vmem>>, vector<1x32x288xf32>
    %28 = vector.shape_cast %27 : vector<1x32x288xf32> to vector<32x288xf32>
    %c256 = arith.constant 256 : index
    %c0_29 = arith.constant 0 : index
    %29 = vector.load %arg7[%c256, %c0_29] : memref<288x288xf32, #tpu.memory_space<vmem>>, vector<32x288xf32>
    tpu.vector_store %arg7[%c256, %c0_29], %28 {strides = array<i32>} : memref<288x288xf32, #tpu.memory_space<vmem>>, vector<32x288xf32>,
    %c0_30 = arith.constant 0 : index
    %c0_31 = arith.constant 0 : index
    %30 = vector.load %arg2[%c0_30, %c0_31] : memref<32x288xf32, #tpu.memory_space<vmem>>, vector<32x288xf32>
    %c0_32 = arith.constant 0 : index
    %c0_33 = arith.constant 0 : index
    %31 = vector.load %arg7[%c0_32, %c0_33] : memref<288x288xf32, #tpu.memory_space<vmem>>, vector<288x288xf32>
    %cst = arith.constant dense<0.000000e+00> : vector<32x288xf32>
    %32 = tpu.matmul %30, %31, %cst {dimension_numbers = #tpu.dot_dimension_numbers<[1], [0], [0], [1], [0, 0, 1, 1], [], []>} : vector<32x288xf32>, vector<288x288xf32>, vector<32x288xf32> -> vector<32x288xf32>
    %33 = arith.mulf %32, %2 : vector<32x288xf32>
    %cst_34 = arith.constant dense<0.000000e+00> : vector<32xf32>
    %34 = vector.multi_reduction <add>, %33, %cst_34 [1] : vector<32x288xf32> to vector<32xf32>
    %35 = vector.shape_cast %34 : vector<32xf32> to vector<32x1xf32>
    %36 = arith.mulf %33, %32 : vector<32x288xf32>
    %cst_35 = arith.constant dense<0.000000e+00> : vector<32xf32>
    %37 = vector.multi_reduction <add>, %36, %cst_35 [1] : vector<32x288xf32> to vector<32xf32>
    %38 = vector.shape_cast %37 : vector<32xf32> to vector<32x1xf32>
    %cst_36 = arith.constant 3.906250e-03 : f32
    %39 = vector.broadcast %cst_36 : f32 to vector<32x1xf32>
    %40 = arith.mulf %35, %39 : vector<32x1xf32>
    %cst_37 = arith.constant 3.906250e-03 : f32
    %41 = vector.broadcast %cst_37 : f32 to vector<32x1xf32>
    %42 = arith.mulf %38, %41 : vector<32x1xf32>
    %43 = arith.mulf %40, %40 : vector<32x1xf32>
    %44 = arith.subf %42, %43 : vector<32x1xf32>
    %cst_38 = arith.constant 9.99999974E-6 : f32
    %45 = vector.broadcast %cst_38 : f32 to vector<32x1xf32>
    %46 = arith.addf %44, %45 : vector<32x1xf32>
    %47 = math.rsqrt %46 : vector<32x1xf32>
    %48 = vector.broadcast %40 : vector<32x1xf32> to vector<32x288xf32>
    %49 = arith.subf %32, %48 : vector<32x288xf32>
    %50 = vector.broadcast %47 : vector<32x1xf32> to vector<32x288xf32>
    %51 = arith.mulf %49, %50 : vector<32x288xf32>
    %cst_39 = arith.constant 0.000000e+00 : f32
    %52 = vector.broadcast %cst_39 : f32 to vector<32x288xf32>
    %53 = arith.maximumf %51, %52 : vector<32x288xf32>
    %54 = arith.mulf %53, %2 : vector<32x288xf32>
    %cst_40 = arith.constant 0.000000e+00 : f32
    %55 = vector.broadcast %cst_40 : f32 to vector<32x19xf32>
    %c0_41 = arith.constant 0 : index
    %c109_42 = arith.constant 109 : index
    %56 = vector.load %arg6[%c0_41, %c109_42] : memref<32x435xf32, #tpu.memory_space<vmem>>, vector<32x19xf32>
    tpu.vector_store %arg6[%c0_41, %c109_42], %55 {strides = array<i32>} : memref<32x435xf32, #tpu.memory_space<vmem>>, vector<32x19xf32>,
    %cst_43 = arith.constant 0.000000e+00 : f32
    %57 = vector.broadcast %cst_43 : f32 to vector<32x19xf32>
    %c0_44 = arith.constant 0 : index
    %c416 = arith.constant 416 : index
    %58 = vector.load %arg6[%c0_44, %c416] : memref<32x435xf32, #tpu.memory_space<vmem>>, vector<32x19xf32>
    tpu.vector_store %arg6[%c0_44, %c416], %57 {strides = array<i32>} : memref<32x435xf32, #tpu.memory_space<vmem>>, vector<32x19xf32>,
    %c0_45 = arith.constant 0 : index
    %c128_46 = arith.constant 128 : index
    %59 = vector.load %arg6[%c0_45, %c128_46] : memref<32x435xf32, #tpu.memory_space<vmem>>, vector<32x288xf32>
    tpu.vector_store %arg6[%c0_45, %c128_46], %54 {strides = array<i32>} : memref<32x435xf32, #tpu.memory_space<vmem>>, vector<32x288xf32>,
    %c0_47 = arith.constant 0 : index
    %c109_48 = arith.constant 109 : index
    %60 = vector.load %arg6[%c0_47, %c109_48] : memref<32x435xf32, #tpu.memory_space<vmem>>, vector<32x288xf32>
    %c0_49 = arith.constant 0 : index
    %c0_50 = arith.constant 0 : index
    %61 = vector.load %arg7[%c0_49, %c0_50] : memref<288x288xf32, #tpu.memory_space<vmem>>, vector<32x288xf32>
    tpu.vector_store %arg7[%c0_49, %c0_50], %60 {strides = array<i32>} : memref<288x288xf32, #tpu.memory_space<vmem>>, vector<32x288xf32>,
    %c0_51 = arith.constant 0 : index
    %c110_52 = arith.constant 110 : index
    %62 = vector.load %arg6[%c0_51, %c110_52] : memref<32x435xf32, #tpu.memory_space<vmem>>, vector<32x288xf32>
    %c32_53 = arith.constant 32 : index
    %c0_54 = arith.constant 0 : index
    %63 = vector.load %arg7[%c32_53, %c0_54] : memref<288x288xf32, #tpu.memory_space<vmem>>, vector<32x288xf32>
    tpu.vector_store %arg7[%c32_53, %c0_54], %62 {strides = array<i32>} : memref<288x288xf32, #tpu.memory_space<vmem>>, vector<32x288xf32>,
    %c0_55 = arith.constant 0 : index
    %c111_56 = arith.constant 111 : index
    %64 = vector.load %arg6[%c0_55, %c111_56] : memref<32x435xf32, #tpu.memory_space<vmem>>, vector<32x288xf32>
    %c64_57 = arith.constant 64 : index
    %c0_58 = arith.constant 0 : index
    %65 = vector.load %arg7[%c64_57, %c0_58] : memref<288x288xf32, #tpu.memory_space<vmem>>, vector<32x288xf32>
    tpu.vector_store %arg7[%c64_57, %c0_58], %64 {strides = array<i32>} : memref<288x288xf32, #tpu.memory_space<vmem>>, vector<32x288xf32>,
    %c0_59 = arith.constant 0 : index
    %c127_60 = arith.constant 127 : index
    %66 = vector.load %arg6[%c0_59, %c127_60] : memref<32x435xf32, #tpu.memory_space<vmem>>, vector<32x288xf32>
    %c96_61 = arith.constant 96 : index
    %c0_62 = arith.constant 0 : index
    %67 = vector.load %arg7[%c96_61, %c0_62] : memref<288x288xf32, #tpu.memory_space<vmem>>, vector<32x288xf32>
    tpu.vector_store %arg7[%c96_61, %c0_62], %66 {strides = array<i32>} : memref<288x288xf32, #tpu.memory_space<vmem>>, vector<32x288xf32>,
    %c0_63 = arith.constant 0 : index
    %c128_64 = arith.constant 128 : index
    %68 = vector.load %arg6[%c0_63, %c128_64] : memref<32x435xf32, #tpu.memory_space<vmem>>, vector<32x288xf32>
    %c128_65 = arith.constant 128 : index
    %c0_66 = arith.constant 0 : index
    %69 = vector.load %arg7[%c128_65, %c0_66] : memref<288x288xf32, #tpu.memory_space<vmem>>, vector<32x288xf32>
    tpu.vector_store %arg7[%c128_65, %c0_66], %68 {strides = array<i32>} : memref<288x288xf32, #tpu.memory_space<vmem>>, vector<32x288xf32>,
    %c0_67 = arith.constant 0 : index
    %c129_68 = arith.constant 129 : index
    %70 = vector.load %arg6[%c0_67, %c129_68] : memref<32x435xf32, #tpu.memory_space<vmem>>, vector<32x288xf32>
    %c160_69 = arith.constant 160 : index
    %c0_70 = arith.constant 0 : index
    %71 = vector.load %arg7[%c160_69, %c0_70] : memref<288x288xf32, #tpu.memory_space<vmem>>, vector<32x288xf32>
    tpu.vector_store %arg7[%c160_69, %c0_70], %70 {strides = array<i32>} : memref<288x288xf32, #tpu.memory_space<vmem>>, vector<32x288xf32>,
    %c0_71 = arith.constant 0 : index
    %c145_72 = arith.constant 145 : index
    %72 = vector.load %arg6[%c0_71, %c145_72] : memref<32x435xf32, #tpu.memory_space<vmem>>, vector<32x288xf32>
    %c192_73 = arith.constant 192 : index
    %c0_74 = arith.constant 0 : index
    %73 = vector.load %arg7[%c192_73, %c0_74] : memref<288x288xf32, #tpu.memory_space<vmem>>, vector<32x288xf32>
    tpu.vector_store %arg7[%c192_73, %c0_74], %72 {strides = array<i32>} : memref<288x288xf32, #tpu.memory_space<vmem>>, vector<32x288xf32>,
    %c0_75 = arith.constant 0 : index
    %c146_76 = arith.constant 146 : index
    %74 = vector.load %arg6[%c0_75, %c146_76] : memref<32x435xf32, #tpu.memory_space<vmem>>, vector<32x288xf32>
    %c224_77 = arith.constant 224 : index
    %c0_78 = arith.constant 0 : index
    %75 = vector.load %arg7[%c224_77, %c0_78] : memref<288x288xf32, #tpu.memory_space<vmem>>, vector<32x288xf32>
    tpu.vector_store %arg7[%c224_77, %c0_78], %74 {strides = array<i32>} : memref<288x288xf32, #tpu.memory_space<vmem>>, vector<32x288xf32>,
    %c0_79 = arith.constant 0 : index
    %c147_80 = arith.constant 147 : index
    %76 = vector.load %arg6[%c0_79, %c147_80] : memref<32x435xf32, #tpu.memory_space<vmem>>, vector<32x288xf32>
    %c256_81 = arith.constant 256 : index
    %c0_82 = arith.constant 0 : index
    %77 = vector.load %arg7[%c256_81, %c0_82] : memref<288x288xf32, #tpu.memory_space<vmem>>, vector<32x288xf32>
    tpu.vector_store %arg7[%c256_81, %c0_82], %76 {strides = array<i32>} : memref<288x288xf32, #tpu.memory_space<vmem>>, vector<32x288xf32>,
    %c0_83 = arith.constant 0 : index
    %c0_84 = arith.constant 0 : index
    %78 = vector.load %arg3[%c0_83, %c0_84] : memref<32x288xf32, #tpu.memory_space<vmem>>, vector<32x288xf32>
    %c0_85 = arith.constant 0 : index
    %c0_86 = arith.constant 0 : index
    %79 = vector.load %arg7[%c0_85, %c0_86] : memref<288x288xf32, #tpu.memory_space<vmem>>, vector<288x288xf32>
    %cst_87 = arith.constant dense<0.000000e+00> : vector<32x288xf32>
    %80 = tpu.matmul %78, %79, %cst_87 {dimension_numbers = #tpu.dot_dimension_numbers<[1], [0], [0], [1], [0, 0, 1, 1], [], []>} : vector<32x288xf32>, vector<288x288xf32>, vector<32x288xf32> -> vector<32x288xf32>
    %81 = arith.mulf %80, %2 : vector<32x288xf32>
    %cst_88 = arith.constant dense<0.000000e+00> : vector<32xf32>
    %82 = vector.multi_reduction <add>, %81, %cst_88 [1] : vector<32x288xf32> to vector<32xf32>
    %83 = vector.shape_cast %82 : vector<32xf32> to vector<32x1xf32>
    %84 = arith.mulf %81, %80 : vector<32x288xf32>
    %cst_89 = arith.constant dense<0.000000e+00> : vector<32xf32>
    %85 = vector.multi_reduction <add>, %84, %cst_89 [1] : vector<32x288xf32> to vector<32xf32>
    %86 = vector.shape_cast %85 : vector<32xf32> to vector<32x1xf32>
    %cst_90 = arith.constant 3.906250e-03 : f32
    %87 = vector.broadcast %cst_90 : f32 to vector<32x1xf32>
    %88 = arith.mulf %83, %87 : vector<32x1xf32>
    %cst_91 = arith.constant 3.906250e-03 : f32
    %89 = vector.broadcast %cst_91 : f32 to vector<32x1xf32>
    %90 = arith.mulf %86, %89 : vector<32x1xf32>
    %91 = arith.mulf %88, %88 : vector<32x1xf32>
    %92 = arith.subf %90, %91 : vector<32x1xf32>
    %cst_92 = arith.constant 9.99999974E-6 : f32
    %93 = vector.broadcast %cst_92 : f32 to vector<32x1xf32>
    %94 = arith.addf %92, %93 : vector<32x1xf32>
    %95 = math.rsqrt %94 : vector<32x1xf32>
    %96 = vector.broadcast %88 : vector<32x1xf32> to vector<32x288xf32>
    %97 = arith.subf %80, %96 : vector<32x288xf32>
    %98 = vector.broadcast %95 : vector<32x1xf32> to vector<32x288xf32>
    %99 = arith.mulf %97, %98 : vector<32x288xf32>
    %c0_93 = arith.constant 0 : index
    %c0_94 = arith.constant 0 : index
    %c128_95 = arith.constant 128 : index
    %100 = vector.load %arg1[%c0_93, %c0_94, %c128_95] : memref<1x32x435xf32, #tpu.memory_space<vmem>>, vector<1x32x288xf32>
    %101 = vector.shape_cast %100 : vector<1x32x288xf32> to vector<32x288xf32>
    %102 = arith.addf %101, %99 : vector<32x288xf32>
    %c0_96 = arith.constant 0 : index
    %c0_97 = arith.constant 0 : index
    %c0_98 = arith.constant 0 : index
    %103 = vector.load %arg5[%c0_96, %c0_97, %c0_98] : memref<1x32x288xf32, #tpu.memory_space<vmem>>, vector<1x32x288xf32>
    %104 = vector.shape_cast %103 : vector<1x32x288xf32> to vector<32x288xf32>
    %105 = vector.shape_cast %102 : vector<32x288xf32> to vector<1x32x288xf32>
    tpu.vector_store %arg5[%c0_96, %c0_97, %c0_98], %105 {strides = array<i32>} : memref<1x32x288xf32, #tpu.memory_space<vmem>>, vector<1x32x288xf32>,
    return
  }
  func.func @transform_0(%arg0: i32) -> (i32, i32, i32) {
    %c0_i32 = arith.constant 0 : i32
    %c0_i32_0 = arith.constant 0 : i32
    %c0_i32_1 = arith.constant 0 : i32
    return %arg0, %c0_i32, %c0_i32_0 : i32, i32, i32
  }
  func.func @transform_1(%arg0: i32) -> (i32, i32) {
    %c0_i32 = arith.constant 0 : i32
    %c0_i32_0 = arith.constant 0 : i32
    %c0_i32_1 = arith.constant 0 : i32
    return %c0_i32, %c0_i32_0 : i32, i32
  }
  func.func @transform_2(%arg0: i32) -> (i32, i32) {
    %c0_i32 = arith.constant 0 : i32
    %c0_i32_0 = arith.constant 0 : i32
    %c0_i32_1 = arith.constant 0 : i32
    return %c0_i32, %c0_i32_0 : i32, i32
  }
  func.func @transform_3(%arg0: i32) -> (i32, i32) {
    %c0_i32 = arith.constant 0 : i32
    %c0_i32_0 = arith.constant 0 : i32
    %c0_i32_1 = arith.constant 0 : i32
    return %c0_i32, %c0_i32_0 : i32, i32
  }
  func.func @transform_4(%arg0: i32) -> (i32, i32, i32) {
    %c0_i32 = arith.constant 0 : i32
    %c0_i32_0 = arith.constant 0 : i32
    %c0_i32_1 = arith.constant 0 : i32
    return %arg0, %c0_i32, %c0_i32_0 : i32, i32, i32
  }
}

</mosaic_0001>

<bundles_post_ra>
// kernel: tpu_custom_call.1
= control target key start
LH: loop header
LB: loop body
LE: loop exit
PB: predicated region body
PF: predicated region fallthrough
CT: control target
= control target key end

     0   :  { %9 = vsyncpa [#allocation5], 0  ;;  %s5224_s0 = inlined_call_operand.hbm [shape: f32[2,32,435], index: 0, kind: input, shape index: {}]   ;;  %s5225_s1 = inlined_call_operand.hbm [shape: f32[32,288], index: 1, kind: input, shape index: {}]   ;;  %s5226_s2 = inlined_call_operand.hbm [shape: f32[32,288], index: 2, kind: input, shape index: {}]   ;;  %s5227_s3 = inlined_call_operand.hbm [shape: f32[1,288], index: 3, kind: input, shape index: {}]   ;;  %s5228_s4 = inlined_call_operand.hbm [shape: f32[2,32,288], index: 4, kind: output, shape index: {}]  }
   0x1   :  { %11 = vsyncpa [#allocation5 + $0x1], 0 }
   0x2   :  { %12 = vsyncpa [#allocation8], 0 }
   0x3   :  { %13 = vsyncpa [#allocation11], 0 }
   0x4   :  { %14 = vsyncpa [#allocation6], 0 }
   0x5   :  { %16 = vsyncpa [#allocation6 + $0x1], 0  ;;  %s3462_s15 = smov 0   ;;  %s3464_s16 = smov 0  }
   0x6   :  { %s3466_s17 = smov 0   ;;  %s3468_s18 = smov 0  }
   0x7 LB: > { %s3483_s19 = sadd.s32 4294967295, %s3417_s18   ;;  %s3053_s20 = sadd.s32 4294967294, %s3417_s18   ;;  %s3417_s18 = sphi %s3468_s18, %s5263_s18   ;;  %s3413_s17 = sphi %s3466_s17, %s5262_s17   ;;  %s3409_s16 = sphi %s3464_s16, %s5261_s16   ;;  %s3405_s15 = sphi %s3462_s15, %s5260_s15  }
   0x8   : > { %p42_p0 = scmp.ne.s32.totalorder %s3409_s16, %s3405_s15  ;;  %p43_p1 = scmp.eq.s32.totalorder %s3483_s19, 0 }
   0x9   : > { %p129_p2 = scmp.eq.s32.totalorder %s3483_s19, 1  ;;  %p135_p3 = scmp.eq.s32.totalorder %s3053_s20, 1 }
   0xa   : > { %p3492_p4 = por %p43_p1, %p42_p0  ;;  %p3054_p5 = scmp.ge.s32.totalorder %s3417_s18, 1 }
   0xb   : > { %p3497_p6 = por %p135_p3, %p42_p0  ;;  %p142_p7 = scmp.lt.s32.totalorder %s3417_s18, 3 }
   0xc   : > { %s153_s25 = sshll.u32 %s5225_s1, 4  ;;  %s3419_s27 = smov [#allocation7]   ;;  %s154_s25 = int_to_ptr.hbm [resolvable:$true] %s153_s25 }
   0xd   : > { %p3505_p8 = pnand %p3054_p5, %p142_p7  ;;  %s155_s28 = sshll.u32 %s3419_s27, 4  ;;  %s156_s28 = int_to_ptr.vmem [resolvable:$true] %s155_s28 }
   0xe   : > { %s167_s6 = sshll.u32 %s5226_s2, 4  ;;  %s3420_s7 = smov 384   ;;  %s168_s6 = int_to_ptr.hbm [resolvable:$true] %s167_s6 }
   0xf   : > { %p3129_p9 = pneg %p3505_p8  ;;  %s3421_s8 = smov 24  }
  0x10   : > { %s3422_s9 = smov [#allocation9]   ;;  %s182_s13 = sshll.u32 %s5227_s3, 4  ;;  %s183_s13 = int_to_ptr.hbm [resolvable:$true] %s182_s13 }
  0x11   : > { %p3513_p10 = pnand %p3129_p9, %p43_p1  ;;  %s169_s10 = sshll.u32 %s3422_s9, 4  ;;  %s170_s10 = int_to_ptr.vmem [resolvable:$true] %s169_s10 }
  0x12   : > { %s3423_s14 = smov [#allocation10]   ;;  %s3529_s23 = sadd.s32 1, %s3417_s18  }
  0x13   : > { %3132 = dma.hbm_to_vmem [thread:$0]  (!%p3513_p10), %s154_s25, 1536, %s156_s28, [#allocation8], %s3420_s7, %s3420_s7, %s3421_s8  }
  0x14   : > { %3135 = dma.hbm_to_vmem [thread:$0]  (!%p3513_p10), %s168_s6, 1536, %s170_s10, [#allocation8], %s3420_s7, %s3420_s7, %s3421_s8  }
  0x15   : > { %s184_s20 = sshll.u32 %s3423_s14, 4  ;;  %s26_s24 = ssub.s32 %s3417_s18, %s3529_s23  ;;  %s185_s20 = int_to_ptr.vmem [resolvable:$true] %s184_s20 }
  0x16   : > { %3138 = dma.hbm_to_vmem [thread:$0]  (!%p3513_p10), %s183_s13, 48, %s185_s20, [#allocation11]  }
  0x17   : > { %s29_s25 = sadd.s32 1, %s3413_s17  ;;  %p27_p12 = scmp.eq.s32.totalorder %s26_s24, 0 }
  0x18   : > { %p36_p13 = scmp.ne.s32.totalorder %s3413_s17, %s3409_s16  ;;  %p37_p0 = scmp.eq.s32.totalorder %s3417_s18, 0 }
  0x19   : > { %p3150_p3 = scmp.lt.s32.totalorder %s3417_s18, 2  ;;  %s195_s30 = sand.u32 1, %s3413_s17  }
  0x1a   : > { %s3541_s27 = scalar_select %p27_p12, %s3413_s17, %s29_s25  }
  0x1b   : > { %p38_p5 = por %p37_p0, %p36_p13  ;;  %p3545_p7 = por %p129_p2, %p36_p13 }
  0x1c   : > { %s3094_s5 = sshll.u32 %s3417_s18, 7  ;;  %s3059_s29 = sshll.u32 %s195_s30, 7 }
  0x1d   : > { %s204_s8 = scalar_lea.hbm %s5224_s0, %s3094_s5  ;;  %s199_s10 = scalar_lea.vmem [#allocation4], %s3059_s29 }
  0x1e   : > { %s205_s9 = sshll.u32 %s204_s8, 4  ;;  %s207_s11 = sshll.u32 %s199_s10, 4  ;;  %s206_s9 = int_to_ptr.hbm [resolvable:$true] %s205_s9  ;;  %s208_s11 = int_to_ptr.vmem [resolvable:$true] %s207_s11 }
  0x1f   : > { %p3556_p9 = pnand %p3150_p3, %p38_p5  ;;  %s196_s13 = scalar_lea.sflag [#allocation5], %s195_s30 }
  0x20   : > { %s3313_s14 = sshra.s32 %s206_s9, 4  ;;  %s3320_s5 = scalar_lea.hbm %s5224_s0, 256  ;;  %s3314_s14 = int_to_ptr.hbm [resolvable:$true] %s3313_s14 }
  0x21   : > { %s3315_s20 = scalar_lea.hbm %s3314_s14, 128  ;;  %p3317_p10 = pneg %p3556_p9 }
  0x22   : > { %p3316_p2 = scmp.ne.s32.totalorder %s3314_s14, %s3315_s20  ;;  %p3321_p0 = scmp.lt.s32.totalorder %s3314_s14, %s5224_s0 }
  0x23   : > { %p3322_p3 = scmp.lt.s32.totalorder %s3320_s5, %s3315_s20 }
  0x24   : > { %p3318_p12 = pnand %p3317_p10, %p3316_p2 }
  0x25   : > { %p3323_p5 = por %p3322_p3, %p3321_p0 }
  0x26   : > { %p3319_p13 = pneg %p3318_p12 }
  0x28   : > { %p3324_p11 = pnand %p3323_p5, %p3319_p13 }
  0x2a   : > { %3327 = shalt.err (!%p3324_p11)
}
  0x2b   : > { %s3424_s30 = smov 512   ;;  %s3425_s7 = smov 32  }
  0x2c   : > { %3142 = dma.hbm_to_vmem [thread:$0]  (!%p3556_p9), %s206_s9, 2048, %s208_s11, %s196_s13, %s3424_s30, %s3424_s30, %s3425_s7  }
  0x2d   : > { %219 = sbr.rel (%p3505_p8) target bundleno = 1489 (0x5d1), region = 36 }
  0x32   : > { %s3573_s8 = sand.u32 1, %s3409_s16  }
  0x33   : > { %s3063_s10 = sshll.u32 %s3573_s8, 7  ;;  %s222_s14 = scalar_lea.sflag [#allocation5], %s3573_s8 }
  0x34   : > { %s3577_s20 = scalar_lea.vmem [#allocation4], %s3063_s10 }
  0x35   : > { %3388 = dma.done.wait (%p3492_p4), %s222_s14, 2048  }
  0x36   : > { %3390 = vsyncadd (%p3492_p4), %s222_s14, 4294965248 }
  0x37   : > { %3392 = dma.done.wait (%p43_p1), [#allocation8], 3072  }
  0x38   : > { %3394 = vsyncadd (%p43_p1), [#allocation8], 4294964224 }
  0x39   : > { %3396 = dma.done.wait (%p43_p1), [#allocation11], 48  }
  0x3a   : > { %3398 = vsyncadd (%p43_p1), [#allocation11], 4294967248  ;;  %v3592_v0 = vld [vmem:[%s3577_s20 + $0x20] sm:$0xff]  ;;  %v3595_v1 = vld [vmem:[%s3577_s20 + $0x10] sm:$0xff]  ;;  %s3426_s21 = smov 19   ;;  %s3427_s26 = smov 109  }
  0x3b   : > { %v3598_v2 = vld [vmem:[%s3577_s20] sm:$0xff]  ;;  %314 = vrot.lane.b32.xlu2 %v3592_v0, %s3426_s21  ;;  %310 = vrot.lane.b32.xlu1 %v3595_v1, %s3426_s21  ;;  %v3607_v3 = vld [vmem:[%s3577_s20 + $0x28] sm:$0xff]  ;;  %s3428_s9 = smov 1   ;;  %s3429_s11 = smov 110   ;;  %vm338_vm0 = vcmask 154624   ;;  %vm365_vm1 = vcmask 261120  }
  0x3c   : > { %306 = vrot.lane.b32.xlu0 %v3598_v2, %s3426_s21  ;;  %v3610_v4 = vld [vmem:[%s3577_s20 + $0x18] sm:$0xff]  ;;  %v3613_v5 = vld [vmem:[%s3577_s20 + $0x8] sm:$0xff]  ;;  %v3622_v6 = vld [vmem:[%s3577_s20 + $0x40] sm:$0xff]  ;;  %s3430_s12 = smov 17   ;;  %s3431_s13 = smov 111   ;;  %vm994_vm2 = vcmask 891904  }
  0x3d   : > { %v3625_v7 = vld [vmem:[%s3577_s20 + $0x38] sm:$0xff]  ;;  %v3628_v8 = vld [vmem:[%s3577_s20 + $0x30] sm:$0xff]  ;;  %v3640_v10 = vld [vmem:[%s3577_s20 + $0x68] sm:$0xff]  ;;  %s3432_s24 = smov 18   ;;  %vm642_vm3 = vcmask 7168   ;;  %vm913_vm4 = vcmask 900096  }
  0x3e   : > { %v3637_v9 = vld [vmem:[%s3577_s20 + $0x70] sm:$0xff]  ;;  %v3643_v11 = vld [vmem:[%s3577_s20 + $0x48] sm:$0xff]  ;;  %v3673_v13 = vld [vmem:[%s3577_s20 + $0x78] sm:$0xff]  ;;  %s3433_s25 = smov 127   ;;  %vm541_vm5 = vcmask 138240   ;;  %vm832_vm6 = vcmask 908288  }
  0x3f   : > { %v3652_v12 = vld [vmem:[%s3577_s20 + $0x50] sm:$0xff]  ;;  %v3688_v14 = vld [vmem:[%s3577_s20 + $0x58] sm:$0xff]  ;;  %v3703_v15 = vld [vmem:[%s3577_s20 + $0x60] sm:$0xff]  ;;  %vm440_vm7 = vcmask 146432   ;;  %vm751_vm8 = vcmask 1039360   ;;  %vm1592_vm9 = vcmask 1048424  }
  0x40   : > { %vm1597_vm10 = vcmask 417024   ;;  %s3111_s5 = smul.u32 96, %s3573_s8 }
  0x41   : > { %s3112_s6 = smul.u32 96, %s3483_s19 }
  0x42   : > { %s5142_s29 = scalar_lea.vmem [#allocation12], %s3111_s5 }
  0x43   : > { %316 = vrot.lane.b32.xlu2 %v3607_v3, %s3426_s21  ;;  %312 = vrot.lane.b32.xlu1 %v3610_v4, %s3426_s21  ;;  %s2947_s7 = scalar_lea.hbm %s5228_s4, %s3112_s6  ;;  %s2948_s10 = sshll.u32 %s5142_s29, 4  ;;  %s2949_s10 = int_to_ptr.vmem [resolvable:$true] %s2948_s10 }
  0x44   : > { %308 = vrot.lane.b32.xlu0 %v3613_v5, %s3426_s21  ;;  %s2950_s14 = sshll.u32 %s2947_s7, 4  ;;  %s2951_s14 = int_to_ptr.hbm [resolvable:$true] %s2950_s14 }
  0x4b   : > { %322 = vrot.lane.b32.xlu2 %v3622_v6, %s3426_s21  ;;  %320 = vrot.lane.b32.xlu1 %v3625_v7, %s3426_s21 }
  0x4c   : > { %318 = vrot.lane.b32.xlu0 %v3628_v8, %s3426_s21 }
  0x53   : > { %990 = vrot.lane.b32.xlu2 %v3637_v9, %s3427_s26  ;;  %988 = vrot.lane.b32.xlu1 %v3640_v10, %s3427_s26 }
  0x54   : > { %324 = vrot.lane.b32.xlu0 %v3643_v11, %s3426_s21 }
  0x5b   : > { %976 = vrot.lane.b32.xlu2 %v3607_v3, %s3427_s26  ;;  %984 = vrot.lane.b32.xlu1 %v3652_v12, %s3427_s26 }
  0x5c   : > { %982 = vrot.lane.b32.xlu0 %v3643_v11, %s3427_s26 }
  0x63   : > { %638 = vrot.lane.b32.xlu2 %v3637_v9, %s3428_s9  ;;  %636 = vrot.lane.b32.xlu1 %v3640_v10, %s3428_s9 }
  0x64   : > { %978 = vrot.lane.b32.xlu0 %v3628_v8, %s3427_s26 }
  0x6b   : > { %628 = vrot.lane.b32.xlu2 %v3643_v11, %s3428_s9  ;;  %972 = vrot.lane.b32.xlu1 %v3595_v1, %s3427_s26 }
  0x6c   : > { %970 = vrot.lane.b32.xlu0 %v3613_v5, %s3427_s26 }
  0x73   : > { %911 = vrot.lane.b32.xlu2 %v3673_v13, %s3429_s11  ;;  %909 = vrot.lane.b32.xlu1 %v3637_v9, %s3429_s11 }
  0x74   : > { %630 = vrot.lane.b32.xlu0 %v3652_v12, %s3428_s9 }
  0x7b   : > { %903 = vrot.lane.b32.xlu2 %v3652_v12, %s3429_s11  ;;  %622 = vrot.lane.b32.xlu1 %v3628_v8, %s3428_s9 }
  0x7c   : > { %620 = vrot.lane.b32.xlu0 %v3607_v3, %s3428_s9 }
  0x83   : > { %614 = vrot.lane.b32.xlu2 %v3595_v1, %s3428_s9  ;;  %612 = vrot.lane.b32.xlu1 %v3613_v5, %s3428_s9 }
  0x84   : > { %905 = vrot.lane.b32.xlu0 %v3688_v14, %s3429_s11 }
  0x8b   : > { %907 = vrot.lane.b32.xlu2 %v3640_v10, %s3429_s11  ;;  %899 = vrot.lane.b32.xlu1 %v3625_v7, %s3429_s11 }
  0x8c   : > { %897 = vrot.lane.b32.xlu0 %v3628_v8, %s3429_s11 }
  0x93   : > { %537 = vrot.lane.b32.xlu2 %v3637_v9, %s3430_s12  ;;  %535 = vrot.lane.b32.xlu1 %v3640_v10, %s3430_s12 }
  0x94   : > { %634 = vrot.lane.b32.xlu0 %v3703_v15, %s3428_s9 }
  0x95   : > { %v315_v16 = vpop.permute.xlu2 %314 }
  0x9b   : > { %901 = vrot.lane.b32.xlu2 %v3643_v11, %s3429_s11  ;;  %893 = vrot.lane.b32.xlu1 %v3610_v4, %s3429_s11 }
  0x9c   : > { %891 = vrot.lane.b32.xlu0 %v3595_v1, %s3429_s11 }
  0x9d   : > { %v3717_v17 = vpop.permute.xlu2 %316 }
  0x9e   : > { %v342_v18 = vsel %vm338_vm0, %v315_v16, %v3717_v17 }
  0x9f   : > { %367 = vst [vmem:[#allocation3 + $0x18] sm:$0xff] %v342_v18 }
  0xa3   : > { %529 = vrot.lane.b32.xlu2 %v3652_v12, %s3430_s12  ;;  %527 = vrot.lane.b32.xlu1 %v3643_v11, %s3430_s12 }
  0xa4   : > { %626 = vrot.lane.b32.xlu0 %v3622_v6, %s3428_s9 }
  0xa5   : > { %v3727_v19 = vpop.permute.xlu2 %322 }
  0xab   : > { %895 = vrot.lane.b32.xlu2 %v3607_v3, %s3429_s11  ;;  %830 = vrot.lane.b32.xlu1 %v3673_v13, %s3431_s13 }
  0xac   : > { %828 = vrot.lane.b32.xlu0 %v3637_v9, %s3431_s13 }
  0xad   : > { %v3735_v20 = vpop.permute.xlu2 %990  ;;  %v3737_v21 = vpop.permute.xlu1 %310 }
  0xae   : > { %v307_v22 = vpop.permute.xlu0 %306 }
  0xb3   : > { %521 = vrot.lane.b32.xlu2 %v3628_v8, %s3430_s12  ;;  %519 = vrot.lane.b32.xlu1 %v3607_v3, %s3430_s12 }
  0xb4   : > { %618 = vrot.lane.b32.xlu0 %v3592_v0, %s3428_s9 }
  0xb5   : > { %v977_v23 = vpop.permute.xlu2 %976  ;;  %v313_v24 = vpop.permute.xlu1 %312 }
  0xb6   : > { %v341_v25 = vsel %vm338_vm0, %v3737_v21, %v313_v24  ;;  %v3747_v26 = vpop.permute.xlu0 %308 }
  0xb7   : > { %366 = vst.msk [vmem:[#allocation3 + $0x10] sm:$0xff] %vm365_vm1, %v341_v25  ;;  %v339_v27 = vsel %vm338_vm0, %v307_v22, %v3747_v26 }
  0xb8   : > { %363 = vst [vmem:[#allocation3] sm:$0xff] %v339_v27 }
  0xbb   : > { %889 = vrot.lane.b32.xlu2 %v3613_v5, %s3429_s11  ;;  %824 = vrot.lane.b32.xlu1 %v3688_v14, %s3431_s13 }
  0xbc   : > { %822 = vrot.lane.b32.xlu0 %v3652_v12, %s3431_s13 }
  0xbd   : > { %v3758_v28 = vpop.permute.xlu2 %638  ;;  %v321_v29 = vpop.permute.xlu1 %320 }
  0xbe   : > { %v3760_v30 = vpop.permute.xlu0 %318 }
  0xbf   : > { %v344_v31 = vsel %vm338_vm0, %v3760_v30, %v321_v29 }
  0xc0   : > { %369 = vst.msk [vmem:[#allocation3 + $0x28] sm:$0xff] %vm365_vm1, %v344_v31 }
  0xc3   : > { %513 = vrot.lane.b32.xlu2 %v3595_v1, %s3430_s12  ;;  %511 = vrot.lane.b32.xlu1 %v3613_v5, %s3430_s12 }
  0xc4   : > { %610 = vrot.lane.b32.xlu0 %v3598_v2, %s3428_s9 }
  0xc5   : > { %v3771_v32 = vpop.permute.xlu2 %628  ;;  %v989_v33 = vpop.permute.xlu1 %988 }
  0xc6   : > { %v1001_v34 = vsel %vm994_vm2, %v989_v33, %v3735_v20  ;;  %v3775_v35 = vpop.permute.xlu0 %324 }
  0xc7   : > { %1229 = vmatpush.msra.mxu2 %v1001_v34 }
  0xcb   : > { %826 = vrot.lane.b32.xlu2 %v3640_v10, %s3431_s13  ;;  %818 = vrot.lane.b32.xlu1 %v3625_v7, %s3431_s13 }
  0xcc   : > { %816 = vrot.lane.b32.xlu0 %v3628_v8, %s3431_s13 }
  0xcd   : > { %v912_v36 = vpop.permute.xlu2 %911  ;;  %v3783_v37 = vpop.permute.xlu1 %984 }
  0xce   : > { %945 = vst.msk [vmem:[#allocation3 + $0x2f8] sm:$0xff] %vm365_vm1, %v912_v36  ;;  %v983_v38 = vpop.permute.xlu0 %982 }
  0xcf   : > { %v999_v39 = vsel %vm994_vm2, %v983_v38, %v3783_v37 }
  0xd0   : > { %1230 = vmatpush.msra.mxu2 %v999_v39 }
  0xd3   : > { %436 = vrot.lane.b32.xlu2 %v3637_v9, %s3432_s24  ;;  %434 = vrot.lane.b32.xlu1 %v3640_v10, %s3432_s24 }
  0xd4   : > { %533 = vrot.lane.b32.xlu0 %v3703_v15, %s3430_s12 }
  0xd5   : > { %v904_v40 = vpop.permute.xlu2 %903  ;;  %v3794_v41 = vpop.permute.xlu1 %636 }
  0xd6   : > { %v653_v42 = vsel %vm642_vm3, %v3794_v41, %v3758_v28  ;;  %v3799_v43 = vpop.permute.xlu0 %978 }
  0xd7   : > { %v997_v44 = vsel %vm994_vm2, %v977_v23, %v3799_v43  ;;  %1246 = vmatpush.msra.mxu3 %v653_v42 }
  0xd8   : > { %1231 = vmatpush.msra.mxu2 %v997_v44 }
  0xdb   : > { %820 = vrot.lane.b32.xlu2 %v3643_v11, %s3431_s13  ;;  %812 = vrot.lane.b32.xlu1 %v3610_v4, %s3431_s13 }
  0xdc   : > { %810 = vrot.lane.b32.xlu0 %v3595_v1, %s3431_s13 }
  0xdd   : > { %v3809_v45 = vpop.permute.xlu2 %614  ;;  %v3811_v46 = vpop.permute.xlu1 %972 }
  0xde   : > { %v971_v47 = vpop.permute.xlu0 %970 }
  0xdf   : > { %v995_v48 = vsel %vm994_vm2, %v971_v47, %v3811_v46 }
  0xe0   : > { %1232 = vmatpush.msra.mxu2 %v995_v48 }
  0xe3   : > { %428 = vrot.lane.b32.xlu2 %v3652_v12, %s3432_s24  ;;  %426 = vrot.lane.b32.xlu1 %v3643_v11, %s3432_s24 }
  0xe4   : > { %525 = vrot.lane.b32.xlu0 %v3622_v6, %s3430_s12 }
  0xe5   : > { %v908_v49 = vpop.permute.xlu2 %907  ;;  %v910_v50 = vpop.permute.xlu1 %909 }
  0xe6   : > { %v920_v51 = vsel %vm913_vm4, %v908_v49, %v910_v50  ;;  %v921_v52 = vsel %vm913_vm4, %v910_v50, %v912_v36  ;;  %v3823_v53 = vpop.permute.xlu0 %630 }
  0xe7   : > { %v650_v54 = vsel %vm642_vm3, %v3771_v32, %v3823_v53  ;;  %1188 = vmatpush.msra.mxu1 %v920_v51  ;;  %1275 = vmatpush.msrb.mxu2 %v921_v52 }
  0xe8   : > { %1247 = vmatpush.msra.mxu3 %v650_v54 }
  0xeb   : > { %814 = vrot.lane.b32.xlu2 %v3607_v3, %s3431_s13  ;;  %749 = vrot.lane.b32.xlu1 %v3673_v13, %s3433_s25 }
  0xec   : > { %747 = vrot.lane.b32.xlu0 %v3637_v9, %s3433_s25 }
  0xed   : > { %v3834_v55 = vpop.permute.xlu2 %537  ;;  %v3836_v56 = vpop.permute.xlu1 %622 }
  0xee   : > { %v3838_v57 = vpop.permute.xlu0 %620 }
  0xef   : > { %v647_v58 = vsel %vm642_vm3, %v3838_v57, %v3836_v56 }
  0xf0   : > { %1248 = vmatpush.msra.mxu3 %v647_v58 }
  0xf3   : > { %420 = vrot.lane.b32.xlu2 %v3628_v8, %s3432_s24  ;;  %418 = vrot.lane.b32.xlu1 %v3607_v3, %s3432_s24 }
  0xf4   : > { %517 = vrot.lane.b32.xlu0 %v3592_v0, %s3430_s12 }
  0xf5   : > { %v902_v59 = vpop.permute.xlu2 %901  ;;  %v3849_v60 = vpop.permute.xlu1 %612 }
  0xf6   : > { %v918_v61 = vsel %vm913_vm4, %v902_v59, %v904_v40  ;;  %v644_v62 = vsel %vm642_vm3, %v3849_v60, %v3809_v45  ;;  %v906_v63 = vpop.permute.xlu0 %905 }
  0xf7   : > { %v919_v16 = vsel %vm913_vm4, %v904_v40, %v906_v63  ;;  %942 = vst.msk [vmem:[#allocation3 + $0x2e0] sm:$0xff] %vm365_vm1, %v906_v63  ;;  %1189 = vmatpush.msra.mxu1 %v918_v61  ;;  %1249 = vmatpush.msra.mxu3 %v644_v62 }
  0xf8   : > { %1276 = vmatpush.msrb.mxu2 %v919_v16 }
  0xfb   : > { %808 = vrot.lane.b32.xlu2 %v3613_v5, %s3431_s13  ;;  %743 = vrot.lane.b32.xlu1 %v3688_v14, %s3433_s25 }
  0xfc   : > { %741 = vrot.lane.b32.xlu0 %v3652_v12, %s3433_s25 }
  0xfd   : > { %v3863_v18 = vpop.permute.xlu2 %529  ;;  %v900_v22 = vpop.permute.xlu1 %899 }
  0xfe   : > { %939 = vst.msk [vmem:[#allocation3 + $0x2c8] sm:$0xff] %vm365_vm1, %v900_v22  ;;  %v898_v23 = vpop.permute.xlu0 %897 }
  0xff   : > { %v917_v24 = vsel %vm913_vm4, %v898_v23, %v900_v22 }
 0x100   : > { %1277 = vmatpush.msrb.mxu2 %v917_v24 }
 0x103   : > { %412 = vrot.lane.b32.xlu2 %v3595_v1, %s3432_s24  ;;  %410 = vrot.lane.b32.xlu1 %v3613_v5, %s3432_s24 }
 0x104   : > { %509 = vrot.lane.b32.xlu0 %v3598_v2, %s3430_s12 }
 0x105   : > { %v896_v25 = vpop.permute.xlu2 %895  ;;  %v3873_v27 = vpop.permute.xlu1 %535 }
 0x106   : > { %v916_v29 = vsel %vm913_vm4, %v896_v25, %v898_v23  ;;  %v552_v31 = vsel %vm541_vm5, %v3873_v27, %v3834_v55  ;;  %v635_v33 = vpop.permute.xlu0 %634 }
 0x107   : > { %v652_v34 = vsel %vm642_vm3, %v635_v33, %v3794_v41  ;;  %1190 = vmatpush.msra.mxu1 %v916_v29  ;;  %1250 = vmatpush.msra.mxu3 %v552_v31 }
 0x108   : > { %1159 = vmatpush.msra.mxu0 %v652_v34 }
 0x10b   : > { %745 = vrot.lane.b32.xlu2 %v3640_v10, %s3433_s25  ;;  %737 = vrot.lane.b32.xlu1 %v3625_v7, %s3433_s25 }
 0x10c   : > { %735 = vrot.lane.b32.xlu0 %v3628_v8, %s3433_s25 }
 0x10d   : > { %v3887_v36 = vpop.permute.xlu2 %521  ;;  %v894_v38 = vpop.permute.xlu1 %893 }
 0x10e   : > { %936 = vst.msk [vmem:[#allocation3 + $0x2b0] sm:$0xff] %vm365_vm1, %v894_v38  ;;  %v892_v39 = vpop.permute.xlu0 %891 }
 0x10f   : > { %v915_v40 = vsel %vm913_vm4, %v892_v39, %v894_v38 }
 0x110   : > { %1278 = vmatpush.msrb.mxu2 %v915_v40 }
 0x113   : > { %334 = vrot.lane.b32.xlu2 %v3637_v9, %s3426_s21  ;;  %332 = vrot.lane.b32.xlu1 %v3640_v10, %s3426_s21 }
 0x114   : > { %432 = vrot.lane.b32.xlu0 %v3703_v15, %s3432_s24 }
 0x115   : > { %v890_v41 = vpop.permute.xlu2 %889  ;;  %v3897_v8 = vpop.permute.xlu1 %527 }
 0x116   : > { %v914_v42 = vsel %vm913_vm4, %v890_v41, %v892_v39  ;;  %v549_v44 = vsel %vm541_vm5, %v3897_v8, %v3863_v18  ;;  %v627_v47 = vpop.permute.xlu0 %626 }
 0x117   : > { %v649_v48 = vsel %vm642_vm3, %v627_v47, %v3771_v32  ;;  %1191 = vmatpush.msra.mxu1 %v914_v42  ;;  %1251 = vmatpush.msra.mxu3 %v549_v44 }
 0x118   : > { %1160 = vmatpush.msra.mxu0 %v649_v48 }
 0x11b   : > { %739 = vrot.lane.b32.xlu2 %v3643_v11, %s3433_s25  ;;  %731 = vrot.lane.b32.xlu1 %v3610_v4, %s3433_s25 }
 0x11c   : > { %729 = vrot.lane.b32.xlu0 %v3595_v1, %s3433_s25 }
 0x11d   : > { %v3911_v9 = vpop.permute.xlu2 %513  ;;  %v831_v10 = vpop.permute.xlu1 %830 }
 0x11e   : > { %864 = vst.msk [vmem:[#allocation3 + $0x298] sm:$0xff] %vm365_vm1, %v831_v10  ;;  %v829_v49 = vpop.permute.xlu0 %828 }
 0x11f   : > { %v840_v32 = vsel %vm832_vm6, %v829_v49, %v831_v10 }
 0x120   : > { %1279 = vmatpush.msrb.mxu2 %v840_v32 }
 0x123   : > { %733 = vrot.lane.b32.xlu2 %v3607_v3, %s3433_s25  ;;  %326 = vrot.lane.b32.xlu1 %v3652_v12, %s3426_s21 }
 0x124   : > { %424 = vrot.lane.b32.xlu0 %v3622_v6, %s3432_s24 }
 0x125   : > { %v827_v1 = vpop.permute.xlu2 %826  ;;  %v3921_v11 = vpop.permute.xlu1 %519 }
 0x126   : > { %v839_v50 = vsel %vm832_vm6, %v827_v1, %v829_v49  ;;  %v546_v51 = vsel %vm541_vm5, %v3921_v11, %v3887_v36  ;;  %v619_v52 = vpop.permute.xlu0 %618 }
 0x127   : > { %v646_v54 = vsel %vm642_vm3, %v619_v52, %v3838_v57  ;;  %1192 = vmatpush.msra.mxu1 %v839_v50  ;;  %1252 = vmatpush.msra.mxu3 %v546_v51 }
 0x128   : > { %1161 = vmatpush.msra.mxu0 %v646_v54 }
 0x12b   : > { %408 = vrot.lane.b32.xlu2 %v3598_v2, %s3432_s24  ;;  %727 = vrot.lane.b32.xlu1 %v3613_v5, %s3433_s25 }
 0x12c   : > { %416 = vrot.lane.b32.xlu0 %v3592_v0, %s3432_s24 }
 0x12d   : > { %v3935_v3 = vpop.permute.xlu2 %436  ;;  %v825_v6 = vpop.permute.xlu1 %824 }
 0x12e   : > { %861 = vst.msk [vmem:[#allocation3 + $0x280] sm:$0xff] %vm365_vm1, %v825_v6  ;;  %v823_v12 = vpop.permute.xlu0 %822 }
 0x12f   : > { %v838_v57 = vsel %vm832_vm6, %v823_v12, %v825_v6 }
 0x130   : > { %1280 = vmatpush.msrb.mxu2 %v838_v57 }
 0x133   : > { %632 = vrot.lane.b32.xlu2 %v3688_v14, %s3428_s9  ;;  %640 = vrot.lane.b32.xlu1 %v3673_v13, %s3428_s9 }
 0x134   : > { %330 = vrot.lane.b32.xlu0 %v3703_v15, %s3426_s21 }
 0x135   : > { %v821_v2 = vpop.permute.xlu2 %820  ;;  %v3945_v0 = vpop.permute.xlu1 %511 }
 0x136   : > { %v837_v5 = vsel %vm832_vm6, %v821_v2, %v823_v12  ;;  %v543_v58 = vsel %vm541_vm5, %v3945_v0, %v3911_v9  ;;  %v611_v59 = vpop.permute.xlu0 %610 }
 0x137   : > { %v643_v61 = vsel %vm642_vm3, %v611_v59, %v3849_v60  ;;  %1193 = vmatpush.msra.mxu1 %v837_v5  ;;  %1253 = vmatpush.msra.mxu3 %v543_v58  ;;  %v4033_v59 = vld [vmem:[#allocation7 + $0x10] sm:$0xff] }
 0x138   : > { %1162 = vmatpush.msra.mxu0 %v643_v61  ;;  %3067 = vmatmul.msk.f32.vlgmr.msra.gmra.mxu2 %vm365_vm1, %v4033_v59 }
 0x13b   : > { %539 = vrot.lane.b32.xlu2 %v3673_v13, %s3430_s12  ;;  %616 = vrot.lane.b32.xlu1 %v3610_v4, %s3428_s9 }
 0x13c   : > { %624 = vrot.lane.b32.xlu0 %v3625_v7, %s3428_s9 }
 0x13d   : > { %v3959_v15 = vpop.permute.xlu2 %428  ;;  %v819_v62 = vpop.permute.xlu1 %818 }
 0x13e   : > { %858 = vst.msk [vmem:[#allocation3 + $0x268] sm:$0xff] %vm365_vm1, %v819_v62  ;;  %v817_v63 = vpop.permute.xlu0 %816 }
 0x13f   : > { %v836_v60 = vsel %vm832_vm6, %v817_v63, %v819_v62 }
 0x140   : > { %1281 = vmatpush.msrb.mxu2 %v836_v60 }
 0x143   : > { %515 = vrot.lane.b32.xlu2 %v3610_v4, %s3430_s12  ;;  %523 = vrot.lane.b32.xlu1 %v3625_v7, %s3430_s12 }
 0x144   : > { %531 = vrot.lane.b32.xlu0 %v3688_v14, %s3430_s12 }
 0x145   : > { %v815_v16 = vpop.permute.xlu2 %814  ;;  %v3969_v22 = vpop.permute.xlu1 %434 }
 0x146   : > { %v835_v23 = vsel %vm832_vm6, %v815_v16, %v817_v63  ;;  %v451_v24 = vsel %vm440_vm7, %v3969_v22, %v3935_v3  ;;  %v534_v25 = vpop.permute.xlu0 %533  ;;  %v4044_v16 = vld [vmem:[#allocation7 + $0x28] sm:$0xff] }
 0x147   : > { %v551_v29 = vsel %vm541_vm5, %v534_v25, %v3873_v27  ;;  %1194 = vmatpush.msra.mxu1 %v835_v23  ;;  %1254 = vmatpush.msra.mxu3 %v451_v24 }
 0x148   : > { %1163 = vmatpush.msra.mxu0 %v551_v29  ;;  %3068 = vmatmul.msk.f32.gmra.mxu2 %vm365_vm1, %v4044_v16 }
 0x14b   : > { %422 = vrot.lane.b32.xlu2 %v3625_v7, %s3432_s24  ;;  %430 = vrot.lane.b32.xlu1 %v3688_v14, %s3432_s24 }
 0x14c   : > { %438 = vrot.lane.b32.xlu0 %v3673_v13, %s3432_s24 }
 0x14d   : > { %v3983_v31 = vpop.permute.xlu2 %420  ;;  %v813_v33 = vpop.permute.xlu1 %812 }
 0x14e   : > { %855 = vst.msk [vmem:[#allocation3 + $0x250] sm:$0xff] %vm365_vm1, %v813_v33  ;;  %v811_v34 = vpop.permute.xlu0 %810 }
 0x14f   : > { %v834_v27 = vsel %vm832_vm6, %v811_v34, %v813_v33 }
 0x150   : > { %1282 = vmatpush.msrb.mxu2 %v834_v27 }
 0x153   : > { %986 = vrot.lane.b32.xlu2 %v3688_v14, %s3427_s26  ;;  %414 = vrot.lane.b32.xlu1 %v3610_v4, %s3432_s24 }
 0x154   : > { %992 = vrot.lane.b32.xlu0 %v3673_v13, %s3427_s26 }
 0x155   : > { %v809_v38 = vpop.permute.xlu2 %808  ;;  %v3993_v39 = vpop.permute.xlu1 %426 }
 0x156   : > { %v833_v40 = vsel %vm832_vm6, %v809_v38, %v811_v34  ;;  %v448_v41 = vsel %vm440_vm7, %v3993_v39, %v3959_v15  ;;  %v526_v42 = vpop.permute.xlu0 %525  ;;  %v4053_v34 = vld [vmem:[#allocation7 + $0x40] sm:$0xff] }
 0x157   : > { %v548_v44 = vsel %vm541_vm5, %v526_v42, %v3897_v8  ;;  %1195 = vmatpush.msra.mxu1 %v833_v40  ;;  %1255 = vmatpush.msra.mxu3 %v448_v41 }
 0x158   : > { %1164 = vmatpush.msra.mxu0 %v548_v44  ;;  %3069 = vmatmul.msk.f32.gmra.mxu2 %vm365_vm1, %v4053_v34 }
 0x15b   : > { %328 = vrot.lane.b32.xlu2 %v3688_v14, %s3426_s21  ;;  %980 = vrot.lane.b32.xlu1 %v3625_v7, %s3427_s26 }
 0x15c   : > { %336 = vrot.lane.b32.xlu0 %v3673_v13, %s3426_s21 }
 0x15d   : > { %v4007_v47 = vpop.permute.xlu2 %412  ;;  %v750_v48 = vpop.permute.xlu1 %749 }
 0x15e   : > { %783 = vst.msk [vmem:[#allocation3 + $0x238] sm:$0xff] %vm365_vm1, %v750_v48  ;;  %v748_v10 = vpop.permute.xlu0 %747 }
 0x15f   : > { %v759_v8 = vsel %vm751_vm8, %v748_v10, %v750_v48  ;;  %v4069_v48 = vld [vmem:[#allocation7 + $0x58] sm:$0xff] }
 0x160   : > { %1283 = vmatpush.msrb.mxu2 %v759_v8  ;;  %v689_v8 = vld [vmem:[%s3577_s20 + $0x70] sm:$0xff] }
 0x161   : > { %3070 = vmatmul.msk.f32.gmra.mxu2 %vm365_vm1, %v4069_v48 }
 0x164   : > { %974 = vrot.lane.b32.xlu0 %v3610_v4, %s3427_s26 }
 0x165   : > { %v746_v14 = vpop.permute.xlu2 %745  ;;  %v4013_v49 = vpop.permute.xlu1 %418 }
 0x166   : > { %v758_v7 = vsel %vm751_vm8, %v746_v14, %v748_v10  ;;  %v445_v13 = vsel %vm440_vm7, %v4013_v49, %v3983_v31  ;;  %v518_v32 = vpop.permute.xlu0 %517  ;;  %v686_v14 = vld [vmem:[%s3577_s20 + $0x50] sm:$0xff] }
 0x167   : > { %v545_v1 = vsel %vm541_vm5, %v518_v32, %v3921_v11  ;;  %1196 = vmatpush.msra.mxu1 %v758_v7  ;;  %1256 = vmatpush.msra.mxu3 %v445_v13  ;;  %v340_v7 = vsel %vm338_vm0, %v3747_v26, %v3737_v21  ;;  %v683_v13 = vld [vmem:[%s3577_s20 + $0x30] sm:$0xff]  ;;  %v4085_v32 = vld [vmem:[#allocation7] sm:$0xff] }
 0x168   : > { %1165 = vmatpush.msra.mxu0 %v545_v1 }
 0x16d   : > { %v4021_v50 = vpop.permute.xlu2 %334  ;;  %v744_v51 = vpop.permute.xlu1 %743 }
 0x16e   : > { %780 = vst.msk [vmem:[#allocation3 + $0x220] sm:$0xff] %vm365_vm1, %v744_v51  ;;  %v742_v4 = vpop.permute.xlu0 %741 }
 0x16f   : > { %v757_v52 = vsel %vm751_vm8, %v742_v4, %v744_v51  ;;  %v680_v51 = vld [vmem:[%s3577_s20 + $0x10] sm:$0xff] }
 0x170   : > { %1284 = vmatpush.msrb.mxu2 %v757_v52  ;;  %v688_v52 = vld [vmem:[%s3577_s20 + $0x68] sm:$0xff] }
 0x175   : > { %v740_v54 = vpop.permute.xlu2 %739  ;;  %v4025_v6 = vpop.permute.xlu1 %410 }
 0x176   : > { %v756_v12 = vsel %vm751_vm8, %v740_v54, %v742_v4  ;;  %v442_v11 = vsel %vm440_vm7, %v4025_v6, %v4007_v47  ;;  %v510_v57 = vpop.permute.xlu0 %509  ;;  %v4093_v54 = vld [vmem:[#allocation7 + $0x8] sm:$0xff] }
 0x177   : > { %v542_v2 = vsel %vm541_vm5, %v510_v57, %v3945_v0  ;;  %1197 = vmatpush.msra.mxu1 %v756_v12  ;;  %1257 = vmatpush.msra.mxu3 %v442_v11  ;;  %v1128_v11 = vld [vmem:[#allocation3 + $0x2c8] sm:$0xff] }
 0x178   : > { %1166 = vmatpush.msra.mxu0 %v542_v2  ;;  %v1125_v2 = vld [vmem:[#allocation3 + $0x2b0] sm:$0xff] }
 0x17d   : > { %v734_v5 = vpop.permute.xlu2 %733  ;;  %v738_v58 = vpop.permute.xlu1 %737 }
 0x17e   : > { %777 = vst.msk [vmem:[#allocation3 + $0x208] sm:$0xff] %vm365_vm1, %v738_v58  ;;  %v736_v61 = vpop.permute.xlu0 %735 }
 0x17f   : > { %v754_v62 = vsel %vm751_vm8, %v734_v5, %v736_v61  ;;  %v755_v63 = vsel %vm751_vm8, %v736_v61, %v738_v58  ;;  %v682_v5 = vld [vmem:[%s3577_s20 + $0x28] sm:$0xff]  ;;  %v1122_v58 = vld [vmem:[#allocation3 + $0x298] sm:$0xff] }
 0x180   : > { %1198 = vmatpush.msra.mxu1 %v754_v62  ;;  %1285 = vmatpush.msrb.mxu2 %v755_v63  ;;  %v4105_v61 = vld [vmem:[#allocation7 + $0x18] sm:$0xff] }
 0x185   : > { %v4040_v0 = vpop.permute.xlu2 %408  ;;  %v4042_v60 = vpop.permute.xlu1 %332 }
 0x186   : > { %v349_v23 = vsel %vm338_vm0, %v4042_v60, %v4021_v50  ;;  %v433_v24 = vpop.permute.xlu0 %432  ;;  %v441_v57 = vsel %vm440_vm7, %v4040_v0, %v4025_v6 }
 0x187   : > { %v450_v25 = vsel %vm440_vm7, %v433_v24, %v3969_v22  ;;  %1258 = vmatpush.msra.mxu3 %v349_v23  ;;  %v1119_v23 = vld [vmem:[#allocation3 + $0x280] sm:$0xff] }
 0x188   : > { %1167 = vmatpush.msra.mxu0 %v450_v25  ;;  %v4112_v25 = vld [vmem:[#allocation7 + $0x20] sm:$0xff] }
 0x18d   : > { %v633_v29 = vpop.permute.xlu2 %632  ;;  %v732_v33 = vpop.permute.xlu1 %731 }
 0x18e   : > { %v651_v27 = vsel %vm642_vm3, %v3823_v53, %v633_v29  ;;  %774 = vst.msk [vmem:[#allocation3 + $0x1f0] sm:$0xff] %vm365_vm1, %v732_v33  ;;  %v730_v38 = vpop.permute.xlu0 %729 }
 0x18f   : > { %675 = vst.msk [vmem:[#allocation3 + $0x160] sm:$0xff] %vm365_vm1, %v651_v27  ;;  %v753_v22 = vsel %vm751_vm8, %v730_v38, %v732_v33  ;;  %v1116_v33 = vld [vmem:[#allocation3 + $0x268] sm:$0xff]  ;;  %v1042_v27 = vld [vmem:[#allocation3 + $0x18] sm:$0xff] }
 0x190   : > { %1286 = vmatpush.msrb.mxu2 %v753_v22 }
 0x192   : > { %1287 = vmatpush.msrb.mxu2 %v689_v8 }
 0x194   : > { %1288 = vmatpush.msrb.mxu2 %v686_v14  ;;  %v690_v14 = vld [vmem:[%s3577_s20 + $0x78] sm:$0xff] }
 0x195   : > { %v540_v40 = vpop.permute.xlu2 %539  ;;  %v4062_v41 = vpop.permute.xlu1 %326  ;;  %702 = vst.msk [vmem:[#allocation3 + $0x1d8] sm:$0xff] %vm365_vm1, %v690_v14 }
 0x196   : > { %v553_v42 = vsel %vm541_vm5, %v3834_v55, %v540_v40  ;;  %v346_v53 = vsel %vm338_vm0, %v3775_v35, %v4062_v41  ;;  %v425_v44 = vpop.permute.xlu0 %424  ;;  %v343_v55 = vsel %vm338_vm0, %v3717_v17, %v3760_v30  ;;  %1289 = vmatpush.msrb.mxu2 %v683_v13  ;;  %v1131_v30 = vld [vmem:[#allocation3 + $0x2e0] sm:$0xff]  ;;  %v4146_v13 = vld [vmem:[#allocation7 + $0x48] sm:$0xff] }
 0x197   : > { %577 = vst.msk [vmem:[#allocation3 + $0x118] sm:$0xff] %vm365_vm1, %v553_v42  ;;  %v447_v10 = vsel %vm440_vm7, %v425_v44, %v3993_v39  ;;  %1259 = vmatpush.msra.mxu3 %v346_v53  ;;  %v1134_v39 = vld [vmem:[#allocation3 + $0x2f8] sm:$0xff]  ;;  %v1039_v42 = vld [vmem:[#allocation3] sm:$0xff] }
 0x198   : > { %1168 = vmatpush.msra.mxu0 %v447_v10  ;;  %1290 = vmatpush.msrb.mxu2 %v680_v51  ;;  %v1107_v53 = vld [vmem:[#allocation3 + $0x220] sm:$0xff]  ;;  %v4132_v44 = vld [vmem:[#allocation7 + $0x38] sm:$0xff] }
 0x199   : > { %1260 = vmatpush.msra.mxu3 %v343_v55  ;;  %1291 = vmatmul.f32.vlgmr.msrb.gmra.mxu2 %v4093_v54  ;;  %v1104_v55 = vld [vmem:[#allocation3 + $0x208] sm:$0xff] }
 0x19b   : > { %1261 = vmatpush.msra.mxu3 %v340_v7  ;;  %v1101_v7 = vld [vmem:[#allocation3 + $0x1f0] sm:$0xff] }
 0x19c   : > { %1262 = vmatmul.f32.vlgmr.msra.gmra.mxu3 %v4085_v32 }
 0x19d   : > { %1362 = vmatpush.msrb.mxu3 %v1134_v39  ;;  %v516_v1 = vpop.permute.xlu2 %515  ;;  %v728_v17 = vpop.permute.xlu1 %727  ;;  %v684_v39 = vld [vmem:[%s3577_s20 + $0x38] sm:$0xff] }
 0x19e   : > { %v544_v4 = vsel %vm541_vm5, %v3911_v9, %v516_v1  ;;  %v752_v21 = vsel %vm751_vm8, %v728_v17, %v730_v38  ;;  %v417_v26 = vpop.permute.xlu0 %416  ;;  %v685_v9 = vld [vmem:[%s3577_s20 + $0x48] sm:$0xff]  ;;  %v1110_v38 = vld [vmem:[#allocation3 + $0x238] sm:$0xff]  ;;  %696 = vst.msk [vmem:[#allocation3 + $0x1a8] sm:$0xff] %vm365_vm1, %v684_v39 }
 0x19f   : > { %1363 = vmatpush.msrb.mxu3 %v1131_v30  ;;  %568 = vst.msk [vmem:[#allocation3 + $0xd0] sm:$0xff] %vm365_vm1, %v544_v4  ;;  %v444_v12 = vsel %vm440_vm7, %v417_v26, %v4013_v49  ;;  %1199 = vmatpush.msra.mxu1 %v752_v21  ;;  %v679_v49 = vld [vmem:[%s3577_s20 + $0x8] sm:$0xff]  ;;  %v681_v30 = vld [vmem:[%s3577_s20 + $0x18] sm:$0xff]  ;;  %v4155_v26 = vld [vmem:[#allocation7 + $0x50] sm:$0xff] }
 0x1a0   : > { %1169 = vmatpush.msra.mxu0 %v444_v12  ;;  %693 = vst.msk [vmem:[#allocation3 + $0x190] sm:$0xff] %vm365_vm1, %v681_v30 }
 0x1a1   : > { %1364 = vmatpush.msrb.mxu3 %v1128_v11  ;;  %1200 = vmatpush.msra.mxu1 %v688_v52 }
 0x1a2   : > { %1170 = vmatpush.msra.mxu0 %v441_v57  ;;  %1294 = vmatmul.f32.gmra.mxu2 %v4112_v25 }
 0x1a3   : > { %1365 = vmatpush.msrb.mxu3 %v1125_v2  ;;  %1201 = vmatpush.msra.mxu1 %v685_v9  ;;  %v1074_v9 = vld [vmem:[#allocation3 + $0x118] sm:$0xff] }
 0x1a4   : > { %1265 = vmatmul.f32.gmra.mxu3 %v4105_v61 }
 0x1a5   : > { %1366 = vmatpush.msrb.mxu3 %v1122_v58  ;;  %v423_v62 = vpop.permute.xlu2 %422  ;;  %v641_v63 = vpop.permute.xlu1 %640  ;;  %1202 = vmatpush.msra.mxu1 %v682_v5 }
 0x1a6   : > { %v446_v6 = vsel %vm440_vm7, %v3983_v31, %v423_v62  ;;  %v654_v0 = vsel %vm642_vm3, %v3758_v28, %v641_v63  ;;  %v331_v24 = vpop.permute.xlu0 %330  ;;  %v345_v28 = vsel %vm338_vm0, %v3727_v19, %v3775_v35  ;;  %v1113_v31 = vld [vmem:[#allocation3 + $0x250] sm:$0xff] }
 0x1a7   : > { %1367 = vmatpush.msrb.mxu3 %v1119_v23  ;;  %470 = vst.msk [vmem:[#allocation3 + $0x88] sm:$0xff] %vm365_vm1, %v446_v6  ;;  %v348_v29 = vsel %vm338_vm0, %v331_v24, %v4042_v60  ;;  %1203 = vmatpush.msra.mxu1 %v679_v49  ;;  %v4123_v60 = vld [vmem:[#allocation7 + $0x30] sm:$0xff] }
 0x1a8   : > { %678 = vst.msk [vmem:[#allocation3 + $0x178] sm:$0xff] %vm365_vm1, %v654_v0  ;;  %1171 = vmatpush.msra.mxu0 %v348_v29  ;;  %1204 = vmatmul.f32.vlgmr.msra.gmra.mxu1 %v4093_v54  ;;  %v1089_v2 = vld [vmem:[#allocation3 + $0x190] sm:$0xff] }
 0x1a9   : > { %1368 = vmatpush.msrb.mxu3 %v1116_v33 }
 0x1aa   : > { %1172 = vmatpush.msra.mxu0 %v345_v28  ;;  %1297 = vmatmul.f32.gmra.mxu2 %v4132_v44 }
 0x1ab   : > { %1369 = vmatpush.msrb.mxu3 %v1113_v31 }
 0x1ac   : > { %1173 = vmatpush.msra.mxu0 %v1042_v27  ;;  %1268 = vmatmul.f32.gmra.mxu3 %v4123_v60 }
 0x1ad   : > { %1370 = vmatpush.msrb.mxu3 %v1110_v38  ;;  %v4125_v22 = vpop.permute.xlu2 %986  ;;  %v617_v40 = vpop.permute.xlu1 %616 }
 0x1ae   : > { %1023 = vst.msk [vmem:[#allocation3 + $0x340] sm:$0xff] %vm365_vm1, %v4125_v22  ;;  %v645_v19 = vsel %vm642_vm3, %v3809_v45, %v617_v40  ;;  %v625_v35 = vpop.permute.xlu0 %624  ;;  %1174 = vmatpush.msra.mxu0 %v1039_v42  ;;  %v1083_v45 = vld [vmem:[#allocation3 + $0x160] sm:$0xff]  ;;  %v1044_v42 = vld [vmem:[#allocation3 + $0x28] sm:$0xff] }
 0x1af   : > { %1371 = vmatpush.msrb.mxu3 %v1107_v53  ;;  %669 = vst.msk [vmem:[#allocation3 + $0x130] sm:$0xff] %vm365_vm1, %v645_v19  ;;  %v648_v10 = vsel %vm642_vm3, %v3836_v56, %v625_v35  ;;  %v1086_v8 = vld [vmem:[#allocation3 + $0x178] sm:$0xff]  ;;  %1175 = vmatmul.f32.vlgmr.msra.gmra.mxu0 %v4085_v32  ;;  %v1041_v53 = vld [vmem:[#allocation3 + $0x10] sm:$0xff] }
 0x1b0   : > { %672 = vst.msk [vmem:[#allocation3 + $0x148] sm:$0xff] %vm365_vm1, %v648_v10  ;;  %1333 = vmatpush.msrb.mxu1 %v1086_v8  ;;  %v687_v56 = vld [vmem:[%s3577_s20 + $0x58] sm:$0xff] }
 0x1b1   : > { %1372 = vmatpush.msrb.mxu3 %v1104_v55  ;;  %1207 = vmatmul.f32.gmra.mxu1 %v4112_v25  ;;  %699 = vst.msk [vmem:[#allocation3 + $0x1c0] sm:$0xff] %vm365_vm1, %v687_v56 }
 0x1b2   : > { %1334 = vmatpush.msrb.mxu1 %v1083_v45  ;;  %1300 = vmatmul.f32.gmra.mxu2 %v4155_v26 }
 0x1b3   : > { %1373 = vmatpush.msrb.mxu3 %v1101_v7 }
 0x1b4   : > { %1271 = vmatmul.f32.gmra.mxu3 %v4146_v13 }
 0x1b5   : > { %v329_v1 = vpop.permute.xlu2 %328  ;;  %v524_v17 = vpop.permute.xlu1 %523 }
 0x1b6   : > { %v347_v51 = vsel %vm338_vm0, %v4062_v41, %v329_v1  ;;  %v547_v4 = vsel %vm541_vm5, %v3887_v36, %v524_v17  ;;  %v532_v21 = vpop.permute.xlu0 %531  ;;  %v1098_v41 = vld [vmem:[#allocation3 + $0x1d8] sm:$0xff]  ;;  %v1077_v36 = vld [vmem:[#allocation3 + $0x130] sm:$0xff] }
 0x1b7   : > { %372 = vst.msk [vmem:[#allocation3 + $0x40] sm:$0xff] %vm365_vm1, %v347_v51  ;;  %v550_v52 = vsel %vm541_vm5, %v3863_v18, %v532_v21  ;;  %v1080_v12 = vld [vmem:[#allocation3 + $0x148] sm:$0xff]  ;;  %1178 = vmatmul.f32.gmra.mxu0 %v4105_v61  ;;  %1374 = vmatpush.msrb.mxu3 %v1098_v41 }
 0x1b8   : > { %571 = vst.msk [vmem:[#allocation3 + $0xe8] sm:$0xff] %vm365_vm1, %v547_v4  ;;  %1335 = vmatpush.msrb.mxu1 %v1080_v12  ;;  %v1095_v11 = vld [vmem:[#allocation3 + $0x1c0] sm:$0xff]  ;;  %v1092_v18 = vld [vmem:[#allocation3 + $0x1a8] sm:$0xff] }
 0x1b9   : > { %574 = vst.msk [vmem:[#allocation3 + $0x100] sm:$0xff] %vm365_vm1, %v550_v52  ;;  %1210 = vmatmul.f32.gmra.mxu1 %v4132_v44  ;;  %1375 = vmatpush.msrb.mxu3 %v1095_v11  ;;  %v266_v12 = vld [vmem:[#allocation10] sm:$0x7] }
 0x1ba   : > { %1336 = vmatpush.msrb.mxu1 %v1077_v36  ;;  %v4223_v36 = vperm.slane %v266_v12, 1 }
 0x1bb   : > { %1376 = vmatpush.msrb.mxu3 %v1092_v18  ;;  %v4229_v18 = vperm.slane %v266_v12, 0 }
 0x1bc   : > { %1337 = vmatpush.msrb.mxu1 %v1074_v9  ;;  %5245 = vst [vmem:[#allocation17_spill] sm:$0xff] %v4223_v36 }
 0x1bd   : > { %v431_v57 = vpop.permute.xlu1 %430  ;;  %1377 = vmatpush.msrb.mxu3 %v1089_v2  ;;  %5246 = vst [vmem:[#allocation18_spill] sm:$0xff] %v4229_v18 }
 0x1be   : > { %v449_v5 = vsel %vm440_vm7, %v3959_v15, %v431_v57  ;;  %v439_v58 = vpop.permute.xlu0 %438  ;;  %1378 = vmatmul.f32.vlgmr.msrb.gmra.mxu3 %v4093_v54  ;;  %v1065_v15 = vld [vmem:[#allocation3 + $0xd0] sm:$0xff]  ;;  %v1000_v54 = vsel %vm994_vm2, %v3783_v37, %v4125_v22  ;;  %v1143_v37 = vld [vmem:[#allocation3 + $0x340] sm:$0xff]  ;;  %v3434_v57 = vmov 0.0  }
 0x1bf   : > { %473 = vst.msk [vmem:[#allocation3 + $0xa0] sm:$0xff] %vm365_vm1, %v449_v5  ;;  %v452_v49 = vsel %vm440_vm7, %v3935_v3, %v439_v58  ;;  %1181 = vmatmul.f32.gmra.mxu0 %v4123_v60  ;;  %v1068_v63 = vld [vmem:[#allocation3 + $0xe8] sm:$0xff] }
 0x1c0   : > { %476 = vst.msk [vmem:[#allocation3 + $0xb8] sm:$0xff] %vm365_vm1, %v452_v49  ;;  %v1071_v62 = vld [vmem:[#allocation3 + $0x100] sm:$0xff]  ;;  %v4236_v49 = vperm.slane %v266_v12, 2 }
 0x1c1   : > { %1338 = vmatpush.msrb.mxu1 %v1071_v62  ;;  %1595 = vst.msk [vmem:[#allocation2 + $0x40] sm:$0xff] %vm1592_vm9, %v3434_v57 }
 0x1c2   : > { %1213 = vmatmul.f32.gmra.mxu1 %v4155_v26  ;;  %1593 = vst.msk [vmem:[#allocation2] sm:$0xff] %vm1592_vm9, %v3434_v57 }
 0x1c3   : > { %1339 = vmatpush.msrb.mxu1 %v1068_v63  ;;  %1594 = vst.msk [vmem:[#allocation2 + $0x20] sm:$0xff] %vm1592_vm9, %v3434_v57 }
 0x1c4   : > { %5247 = vst [vmem:[#allocation19_spill] sm:$0xff] %v4236_v49 }
 0x1c5   : > { %1340 = vmatpush.msrb.mxu1 %v1065_v15  ;;  %v415_v23 = vpop.permute.xlu1 %414  ;;  %1596 = vst.msk [vmem:[#allocation2 + $0x60] sm:$0xff] %vm1592_vm9, %v3434_v57 }
 0x1c6   : > { %v443_v6 = vsel %vm440_vm7, %v4007_v47, %v415_v23  ;;  %v993_v3 = vpop.permute.xlu0 %992  ;;  %v1059_v29 = vld [vmem:[#allocation3 + $0xa0] sm:$0xff]  ;;  %1381 = vmatmul.f32.gmra.mxu3 %v4112_v25  ;;  %v1056_v47 = vld [vmem:[#allocation3 + $0x88] sm:$0xff]  ;;  %1598 = vst.msk [vmem:[#allocation2 + $0x18] sm:$0xff] %vm1597_vm10, %v3434_v57 }
 0x1c7   : > { %467 = vst.msk [vmem:[#allocation3 + $0x70] sm:$0xff] %vm365_vm1, %v443_v6  ;;  %v1002_v0 = vsel %vm994_vm2, %v3735_v20, %v993_v3  ;;  %v1062_v24 = vld [vmem:[#allocation3 + $0xb8] sm:$0xff]  ;;  %1184 = vmatmul.f32.gmra.mxu0 %v4146_v13 }
 0x1c8   : > { %1026 = vst.msk [vmem:[#allocation3 + $0x358] sm:$0xff] %vm365_vm1, %v993_v3  ;;  %1341 = vmatpush.msrb.mxu1 %v1062_v24  ;;  %1316 = vmatpush.msrb.mxu0 %v1002_v0 }
 0x1c9   : > { %1599 = vst.msk [vmem:[#allocation2 + $0x38] sm:$0xff] %vm1597_vm10, %v3434_v57 }
 0x1ca   : > { %1342 = vmatpush.msrb.mxu1 %v1059_v29  ;;  %1317 = vmatpush.msrb.mxu0 %v1000_v54  ;;  %v1918_v12 = vld [vmem:[#allocation2 + $0x20] sm:$0xff]  ;;  %1600 = vst.msk [vmem:[#allocation2 + $0x58] sm:$0xff] %vm1597_vm10, %v3434_v57 }
 0x1cb   : > { %1601 = vst.msk [vmem:[#allocation2 + $0x78] sm:$0xff] %vm1597_vm10, %v3434_v57 }
 0x1cc   : > { %1343 = vmatpush.msrb.mxu1 %v1056_v47 }
 0x1cd   : > { %v981_v33 = vpop.permute.xlu1 %980 }
 0x1ce   : > { %v998_v20 = vsel %vm994_vm2, %v3799_v43, %v981_v33  ;;  %1020 = vst.msk [vmem:[#allocation3 + $0x328] sm:$0xff] %vm365_vm1, %v981_v33  ;;  %v337_v28 = vpop.permute.xlu0 %336  ;;  %v1053_v31 = vld [vmem:[#allocation3 + $0x70] sm:$0xff]  ;;  %1384 = vmatmul.f32.gmra.mxu3 %v4132_v44 }
 0x1cf   : > { %v350_v27 = vsel %vm338_vm0, %v4021_v50, %v337_v28  ;;  %v1146_v38 = vld [vmem:[#allocation3 + $0x358] sm:$0xff]  ;;  %1344 = vmatpush.msrb.mxu1 %v1053_v31  ;;  %1318 = vmatpush.msrb.mxu0 %v998_v20  ;;  %v1047_v50 = vld [vmem:[#allocation3 + $0x40] sm:$0xff] }
 0x1d0   : > { %375 = vst.msk [vmem:[#allocation3 + $0x58] sm:$0xff] %vm365_vm1, %v350_v27  ;;  %1403 = vmatpush.msra.mxu2 %v1146_v38 }
 0x1d2   : > { %1404 = vmatpush.msra.mxu2 %v1143_v37 }
 0x1d5   : > { %v1140_v25 = vld [vmem:[#allocation3 + $0x328] sm:$0xff] }
 0x1d6   : > { %v975_v22 = vpop.permute.xlu0 %974  ;;  %1405 = vmatpush.msra.mxu2 %v1140_v25  ;;  %1387 = vmatmul.f32.gmra.mxu3 %v4155_v26 }
 0x1d7   : > { %v996_v43 = vsel %vm994_vm2, %v3811_v46, %v975_v22  ;;  %1017 = vst.msk [vmem:[#allocation3 + $0x310] sm:$0xff] %vm365_vm1, %v975_v22  ;;  %v1050_v40 = vld [vmem:[#allocation3 + $0x58] sm:$0xff]  ;;  %v1234_v46 = vpop.f32.mrf.mxu2 }
 0x1d8   : > { %1345 = vmatpush.msrb.mxu1 %v1050_v40  ;;  %1319 = vmatpush.msrb.mxu0 %v996_v43 }
 0x1d9   : > { %3071 = vmatmul.msk.f32.vlgmr.msrb.gmra.mxu0 %vm365_vm1, %v4033_v59 }
 0x1da   : > { %1346 = vmatpush.msrb.mxu1 %v1047_v50 }
 0x1dc   : > { %1347 = vmatpush.msrb.mxu1 %v1044_v42 }
 0x1de   : > { %1348 = vmatpush.msrb.mxu1 %v1041_v53  ;;  %v1137_v19 = vld [vmem:[#allocation3 + $0x310] sm:$0xff] }
 0x1df   : > { %1406 = vmatpush.msra.mxu2 %v1137_v19  ;;  %1349 = vmatmul.f32.vlgmr.msrb.gmra.mxu1 %v4085_v32 }
 0x1e0   : > { %3075 = vmatmul.msk.f32.vlgmr.msra.gmra.mxu2 %vm365_vm1, %v4033_v59  ;;  %v1237_v59 = vpop.f32.mrf.mxu2 }
 0x1e1   : > { %3072 = vmatmul.msk.f32.gmra.mxu0 %vm365_vm1, %v4044_v16 }
 0x1e7   : > { %1352 = vmatmul.f32.gmra.mxu1 %v4105_v61 }
 0x1e8   : > { %3076 = vmatmul.msk.f32.gmra.mxu2 %vm365_vm1, %v4044_v16  ;;  %v4217_v32 = vpop.f32.mrf.mxu2 }
 0x1e9   : > { %3073 = vmatmul.msk.f32.gmra.mxu0 %vm365_vm1, %v4053_v34 }
 0x1ef   : > { %1355 = vmatmul.f32.gmra.mxu1 %v4123_v60 }
 0x1f0   : > { %3077 = vmatmul.msk.f32.gmra.mxu2 %vm365_vm1, %v4053_v34  ;;  %v1243_v16 = vpop.f32.mrf.mxu2 }
 0x1f1   : > { %3074 = vmatmul.msk.f32.gmra.mxu0 %vm365_vm1, %v4069_v48 }
 0x1f7   : > { %1358 = vmatmul.f32.gmra.mxu1 %v4146_v13 }
 0x1f8   : > { %3078 = vmatmul.msk.f32.gmra.mxu2 %vm365_vm1, %v4069_v48 }
 0x21c   : > { %v1292_v35 = vpop.f32.mrf.mxu2 }
 0x21f   : > { %v1263_v61 = vpop.f32.mrf.mxu3 }
 0x220   : > { %v1293_v52 = vadd.f32 %v1292_v35, %v1263_v61 }
 0x225   : > { %v1205_v44 = vpop.f32.mrf.mxu1  ;;  %v1295_v10 = vpop.f32.mrf.mxu2 }
 0x227   : > { %v1266_v60 = vpop.f32.mrf.mxu3 }
 0x228   : > { %v1296_v63 = vadd.f32 %v1295_v10, %v1266_v60 }
 0x22c   : > { %v1176_v8 = vpop.f32.mrf.mxu0 }
 0x22d   : > { %v1298_v14 = vpop.f32.mrf.mxu2  ;;  %v1206_v26 = vadd.f32 %v1205_v44, %v1176_v8 }
 0x22e   : > { %v1208_v34 = vpop.f32.mrf.mxu1 }
 0x22f   : > { %v1269_v55 = vpop.f32.mrf.mxu3  ;;  %v4227_v9 = vadd.f32 %v1234_v46, %v1206_v26 }
 0x230   : > { %v1299_v46 = vadd.f32 %v1298_v14, %v1269_v55 }
 0x231   : > { %v1420_v6 = vmul.f32 %v4227_v9, %v4229_v18 }
 0x233   : > { %v1452_v20 = vmul.f32 %v1420_v6, %v4227_v9 }
 0x234   : > { %v1179_v45 = vpop.f32.mrf.mxu0 }
 0x235   : > { %v1301_v39 = vpop.f32.mrf.mxu2  ;;  %v1209_v62 = vadd.f32 %v1208_v34, %v1179_v45 }
 0x236   : > { %v1211_v7 = vpop.f32.mrf.mxu1 }
 0x237   : > { %v1272_v56 = vpop.f32.mrf.mxu3  ;;  %v4248_v47 = vadd.f32 %v1237_v59, %v1209_v62 }
 0x238   : > { %v4219_v13 = vadd.f32 %v1301_v39, %v1272_v56 }
 0x239   : > { %v1423_v50 = vmul.f32 %v4248_v47, %v4229_v18 }
 0x23b   : > { %v1455_v10 = vmul.f32 %v1423_v50, %v4248_v47 }
 0x23c   : > { %v1182_v48 = vpop.f32.mrf.mxu0 }
 0x23d   : > { %v1212_v19 = vadd.f32 %v1211_v7, %v1182_v48 }
 0x23f   : > { %v1214_v1 = vpop.f32.mrf.mxu1  ;;  %v4269_v55 = vadd.f32 %v4217_v32, %v1212_v19 }
 0x241   : > { %v1379_v21 = vpop.f32.mrf.mxu3 }
 0x244   : > { %v1185_v17 = vpop.f32.mrf.mxu0 }
 0x245   : > { %v1215_v30 = vadd.f32 %v1214_v1, %v1185_v17 }
 0x247   : > { %v4221_v51 = vadd.f32 %v1243_v16, %v1215_v30  ;;  %v1426_v30 = vmul.f32 %v4269_v55, %v4229_v18 }
 0x249   : > { %v1382_v23 = vpop.f32.mrf.mxu3 }
 0x251   : > { %v1385_v61 = vpop.f32.mrf.mxu3 }
 0x256   : > { %v1321_v4 = vpop.f32.mrf.mxu0 }
 0x257   : > { %v4225_v11 = vadd.f32 %v1321_v4, %v1293_v52  ;;  %v4281_v52 = vld [vmem:[#allocation2 + $0x40] sm:$0xff] }
 0x259   : > { %v1421_v5 = vmul.f32 %v4225_v11, %v4223_v36 }
 0x25b   : > { %v1453_v24 = vmul.f32 %v1421_v5, %v4225_v11  ;;  %v1432_v33 = vadd.f32 %v1421_v5, %v1420_v6 }
 0x25c   : > { %v1350_v41 = vpop.f32.mrf.mxu1 }
 0x25d   : > { %v1380_v2 = vadd.f32 %v1379_v21, %v1350_v41  ;;  %v1464_v25 = vadd.f32 %v1453_v24, %v1452_v20  ;;  %v4286_v41 = vld [vmem:[#allocation2 + $0x60] sm:$0xff]  ;;  %v1429_v20 = vmul.f32 %v4221_v51, %v4229_v18 }
 0x25e   : > { %v1324_v58 = vpop.f32.mrf.mxu0 }
 0x25f   : > { %v4244_v54 = vadd.f32 %v1324_v58, %v1296_v63  ;;  %v1388_v58 = vpop.f32.mrf.mxu3 }
 0x261   : > { %v1424_v38 = vmul.f32 %v4244_v54, %v4223_v36 }
 0x263   : > { %v1408_v15 = vpop.f32.mrf.mxu2  ;;  %v1456_v59 = vmul.f32 %v1424_v38, %v4244_v54  ;;  %v1437_v60 = vadd.f32 %v1424_v38, %v1423_v50 }
 0x264   : > { %v4241_v3 = vadd.f32 %v1408_v15, %v1380_v2  ;;  %v1353_v0 = vpop.f32.mrf.mxu1  ;;  %v1614_v2 = vld [vmem:[#allocation2] sm:$0xff] }
 0x265   : > { %v1383_v28 = vadd.f32 %v1382_v23, %v1353_v0  ;;  %v1469_v7 = vadd.f32 %v1456_v59, %v1455_v10 }
 0x266   : > { %v1422_v29 = vmul.f32 %v4241_v3, %v4236_v49  ;;  %v1327_v53 = vpop.f32.mrf.mxu0 }
 0x267   : > { %v4263_v44 = vadd.f32 %v1327_v53, %v1299_v46 }
 0x268   : > { %v1433_v31 = vsel %vm365_vm1, %v1422_v29, 0.0  ;;  %v1454_v27 = vmul.f32 %v1422_v29, %v4241_v3 }
 0x269   : > { %v1434_v37 = vadd.f32 %v1433_v31, %v1432_v33  ;;  %v1427_v39 = vmul.f32 %v4263_v44, %v4223_v36 }
 0x26a   : > { %v1465_v22 = vsel %vm365_vm1, %v1454_v27, 0.0 }
 0x26b   : > { %v1411_v43 = vpop.f32.mrf.mxu2  ;;  %1435 = vadd.xlane.f32.xlu2 %v1434_v37  ;;  %v1466_v40 = vadd.f32 %v1465_v22, %v1464_v25  ;;  %v1442_v4 = vadd.f32 %v1427_v39, %v1426_v30  ;;  %v1459_v33 = vmul.f32 %v1427_v39, %v4263_v44  ;;  %v1461_v37 = vmul.f32 %v1429_v20, %v4221_v51 }
 0x26c   : > { %v4258_v42 = vadd.f32 %v1411_v43, %v1383_v28  ;;  %v1356_v16 = vpop.f32.mrf.mxu1  ;;  %v1458_v28 = vmul.f32 %v1426_v30, %v4269_v55 }
 0x26d   : > { %1467 = vadd.xlane.f32.xlu1 %v1466_v40  ;;  %v1386_v8 = vadd.f32 %v1385_v61, %v1356_v16 }
 0x26e   : > { %v1425_v35 = vmul.f32 %v4258_v42, %v4236_v49  ;;  %v1330_v15 = vpop.f32.mrf.mxu0  ;;  %v1474_v38 = vadd.f32 %v1459_v33, %v1458_v28 }
 0x26f   : > { %v4296_v6 = vadd.f32 %v1330_v15, %v4219_v13 }
 0x270   : > { %v1438_v34 = vsel %vm365_vm1, %v1425_v35, 0.0  ;;  %v1457_v45 = vmul.f32 %v1425_v35, %v4258_v42 }
 0x271   : > { %v1439_v14 = vadd.f32 %v1438_v34, %v1437_v60  ;;  %v1430_v24 = vmul.f32 %v4296_v6, %v4223_v36 }
 0x272   : > { %v1470_v56 = vsel %vm365_vm1, %v1457_v45, 0.0 }
 0x273   : > { %v1414_v48 = vpop.f32.mrf.mxu2  ;;  %1440 = vadd.xlane.f32.xlu2 %v1439_v14  ;;  %v1471_v1 = vadd.f32 %v1470_v56, %v1469_v7  ;;  %v1462_v31 = vmul.f32 %v1430_v24, %v4296_v6  ;;  %v1447_v53 = vadd.f32 %v1430_v24, %v1429_v20 }
 0x274   : > { %v4274_v17 = vadd.f32 %v1414_v48, %v1386_v8  ;;  %v1359_v5 = vpop.f32.mrf.mxu1 }
 0x275   : > { %1472 = vadd.xlane.f32.xlu0 %v1471_v1  ;;  %v1389_v62 = vadd.f32 %v1388_v58, %v1359_v5  ;;  %v1479_v43 = vadd.f32 %v1462_v31, %v1461_v37 }
 0x276   : > { %v1428_v32 = vmul.f32 %v4274_v17, %v4236_v49 }
 0x278   : > { %v1443_v21 = vsel %vm365_vm1, %v1428_v32, 0.0  ;;  %v1460_v29 = vmul.f32 %v1428_v32, %v4274_v17 }
 0x279   : > { %v1444_v26 = vadd.f32 %v1443_v21, %v1442_v4 }
 0x27a   : > { %v1475_v27 = vsel %vm365_vm1, %v1460_v29, 0.0 }
 0x27b   : > { %1445 = vadd.xlane.f32.xlu2 %v1444_v26  ;;  %v1417_v63 = vpop.f32.mrf.mxu2  ;;  %v1476_v25 = vadd.f32 %v1475_v27, %v1474_v38 }
 0x27c   : > { %v4293_v23 = vadd.f32 %v1417_v63, %v1389_v62 }
 0x27e   : > { %v1431_v0 = vmul.f32 %v4293_v23, %v4236_v49 }
 0x280   : > { %v1463_v13 = vmul.f32 %v1431_v0, %v4293_v23  ;;  %v1448_v50 = vsel %vm365_vm1, %v1431_v0, 0.0 }
 0x281   : > { %v1449_v19 = vadd.f32 %v1448_v50, %v1447_v53 }
 0x282   : > { %v1480_v22 = vsel %vm365_vm1, %v1463_v13, 0.0 }
 0x283   : > { %v1481_v40 = vadd.f32 %v1480_v22, %v1479_v43 }
 0x286   : > { %1962 = vrot.lane.b32.xlu1 %v4281_v52, %s3428_s9 }
 0x289   : > { %1954 = vrot.lane.b32.xlu0 %v1918_v12, %s3428_s9 }
 0x28e   : > { %1870 = vrot.lane.b32.xlu1 %v4286_v41, %s3430_s12 }
 0x291   : > { %1854 = vrot.lane.b32.xlu0 %v1918_v12, %s3430_s12 }
 0x293   : > { %1646 = vrot.lane.b32.xlu2 %v1614_v2, %s3426_s21 }
 0x29b   : > { %1654 = vrot.lane.b32.xlu2 %v1918_v12, %s3426_s21 }
 0x2a3   : > { %1970 = vrot.lane.b32.xlu2 %v4286_v41, %s3428_s9 }
 0x2ab   : > { %1946 = vrot.lane.b32.xlu2 %v1614_v2, %s3428_s9 }
 0x2b3   : > { %1862 = vrot.lane.b32.xlu2 %v4281_v52, %s3430_s12 }
 0x2b8   : > { %1477 = vadd.xlane.f32.xlu1 %v1476_v25 }
 0x2bb   : > { %1482 = vadd.xlane.f32.xlu0 %v1481_v40  ;;  %1770 = vrot.lane.b32.xlu2 %v4286_v41, %s3432_s24 }
 0x2c0   : > { %1450 = vadd.xlane.f32.xlu1 %v1449_v19 }
 0x2c3   : > { %1746 = vrot.lane.b32.xlu2 %v1614_v2, %s3432_s24 }
 0x2cf   : > { %1762 = vrot.lane.b32.xlu0 %v4281_v52, %s3432_s24 }
 0x2d9   : > { %1846 = vrot.lane.b32.xlu1 %v1614_v2, %s3430_s12 }
 0x2de   : > { %v1436_v46 = vpop.xlane.xlu2 %1435 }
 0x2df   : > { %v1484_v59 = vmul.f32 0.00390625, %v1436_v46 }
 0x2e0   : > { %v1468_v16 = vpop.xlane.xlu1 %1467 }
 0x2e1   : > { %v1488_v61 = vmul.f32 0.00390625, %v1468_v16  ;;  %1754 = vrot.lane.b32.xlu1 %v1918_v12, %s3432_s24  ;;  %v1492_v35 = vmul.f32 %v1484_v59, %v1484_v59  ;;  %v1544_v12 = vsub.f32 %v4227_v9, %v1484_v59  ;;  %v1545_v2 = vsub.f32 %v4225_v11, %v1484_v59 }
 0x2e2   : > { %v1546_v5 = vsub.f32 %v4241_v3, %v1484_v59 }
 0x2e3   : > { %v1496_v60 = vsub.f32 %v1488_v61, %v1492_v35 }
 0x2e5   : > { %v1500_v10 = vadd.f32 1e-05, %v1496_v60 }
 0x2e6   : > { %v1441_v57 = vpop.xlane.xlu2 %1440 }
 0x2e7   : > { %v1485_v8 = vmul.f32 0.00390625, %v1441_v57  ;;  %3205 = vrsqrt.f32 %v1500_v10  ;;  %vm1510_vm12 = vweird.f32 %v1500_v10 }
 0x2e8   : > { %v1473_v34 = vpop.xlane.xlu0 %1472 }
 0x2e9   : > { %v1489_v45 = vmul.f32 0.00390625, %v1473_v34  ;;  %v1493_v14 = vmul.f32 %v1485_v8, %v1485_v8  ;;  %v1547_v31 = vsub.f32 %v4248_v47, %v1485_v8  ;;  %v1548_v27 = vsub.f32 %v4244_v54, %v1485_v8 }
 0x2ea   : > { %v1549_v38 = vsub.f32 %v4258_v42, %v1485_v8 }
 0x2eb   : > { %v1497_v7 = vsub.f32 %v1489_v45, %v1493_v14 }
 0x2ed   : > { %v3206_v56 = vpop.eup %3205  ;;  %v1501_v39 = vadd.f32 1e-05, %v1497_v7 }
 0x2ee   : > { %v1505_v48 = vmul.f32 %v3206_v56, %v1500_v10  ;;  %vm1511_vm11 = vweird.f32 %v3206_v56  ;;  %v1446_v61 = vpop.xlane.xlu2 %1445 }
 0x2ef   : > { %3207 = vrsqrt.f32 %v1501_v39  ;;  %vm1512_vm13 = vmor %vm1510_vm12, %vm1511_vm11  ;;  %vm1520_vm15 = vweird.f32 %v1501_v39  ;;  %v1486_v14 = vmul.f32 0.00390625, %v1446_v61 }
 0x2f0   : > { %v1506_v1 = vmul.f32 %v3206_v56, %v1505_v48 }
 0x2f2   : > { %v1507_v30 = vmul.f32 0.5, %v1506_v1  ;;  %v1494_v1 = vmul.f32 %v1486_v14, %v1486_v14 }
 0x2f4   : > { %v1508_v32 = vsub.f32 1.5, %v1507_v30 }
 0x2f5   : > { %v3208_v4 = vpop.eup %3207 }
 0x2f6   : > { %v1509_v21 = vmul.f32 %v3206_v56, %v1508_v32  ;;  %v1515_v26 = vmul.f32 %v3208_v4, %v1501_v39  ;;  %vm1521_vm14 = vweird.f32 %v3208_v4  ;;  %v4381_v10 = vpop.permute.xlu2 %1646 }
 0x2f7   : > { %vm1522_vm9 = vmor %vm1520_vm15, %vm1521_vm14 }
 0x2f8   : > { %v1513_v58 = vsel %vm1512_vm13, %v3206_v56, %v1509_v21  ;;  %v1516_v62 = vmul.f32 %v3208_v4, %v1515_v26  ;;  %v4387_v57 = vpop.permute.xlu1 %1962 }
 0x2f9   : > { %v1556_v63 = vmul.f32 %v1544_v12, %v1513_v58  ;;  %v1557_v15 = vmul.f32 %v1545_v2, %v1513_v58  ;;  %v1558_v0 = vmul.f32 %v1546_v5, %v1513_v58 }
 0x2fa   : > { %v1517_v24 = vmul.f32 0.5, %v1516_v62 }
 0x2fb   : > { %v1568_v29 = vmax.f32 %v1556_v63, 0.0  ;;  %v1569_v33 = vmax.f32 %v1557_v15, 0.0  ;;  %v1570_v20 = vmax.f32 %v1558_v0, 0.0  ;;  %v4397_v34 = vpop.permute.xlu0 %1954 }
 0x2fc   : > { %v1518_v28 = vsub.f32 1.5, %v1517_v24 }
 0x2fd   : > { %v4333_v13 = vmul.f32 %v1568_v29, %v4229_v18  ;;  %v4336_v9 = vmul.f32 %v1569_v33, %v4223_v36  ;;  %v1582_v11 = vmul.f32 %v1570_v20, %v4236_v49 }
 0x2fe   : > { %v1519_v3 = vmul.f32 %v3208_v4, %v1518_v28  ;;  %v4391_v8 = vpop.permute.xlu2 %1654 }
 0x2ff   : > { %1602 = vst [vmem:[#allocation2 + $0x8] sm:$0xff] %v4333_v13  ;;  %2144 = vrot.lane.b32.xlu2 %v4336_v9, %s3431_s13  ;;  %1650 = vrot.lane.b32.xlu1 %v4336_v9, %s3426_s21 }
 0x300   : > { %1603 = vst [vmem:[#allocation2 + $0x10] sm:$0xff] %v4336_v9  ;;  %v1523_v37 = vsel %vm1522_vm9, %v3208_v4, %v1519_v3  ;;  %1648 = vrot.lane.b32.xlu0 %v4333_v13, %s3426_s21  ;;  %v4401_v45 = vpop.permute.xlu1 %1870  ;;  %v1551_v3 = vsub.f32 %v4263_v44, %v1486_v14 }
 0x301   : > { %1604 = vst.msk [vmem:[#allocation2 + $0x18] sm:$0xff] %vm365_vm1, %v1582_v11  ;;  %v1559_v47 = vmul.f32 %v1547_v31, %v1523_v37  ;;  %v1560_v25 = vmul.f32 %v1548_v27, %v1523_v37  ;;  %v1561_v54 = vmul.f32 %v1549_v38, %v1523_v37  ;;  %v1550_v11 = vsub.f32 %v4269_v55, %v1486_v14 }
 0x302   : > { %v1552_v31 = vsub.f32 %v4274_v17, %v1486_v14 }
 0x303   : > { %v1571_v22 = vmax.f32 %v1559_v47, 0.0  ;;  %v1572_v42 = vmax.f32 %v1560_v25, 0.0  ;;  %v1573_v43 = vmax.f32 %v1561_v54, 0.0  ;;  %v4411_v56 = vpop.permute.xlu0 %1854 }
 0x305   : > { %v4352_v40 = vmul.f32 %v1571_v22, %v4229_v18  ;;  %v4355_v50 = vmul.f32 %v1572_v42, %v4223_v36  ;;  %v1585_v53 = vmul.f32 %v1573_v43, %v4236_v49 }
 0x306   : > { %v4365_v46 = vld [vmem:[#allocation2 + $0x8] sm:$0xff]  ;;  %v4407_v7 = vpop.permute.xlu2 %1970 }
 0x307   : > { %1950 = vrot.lane.b32.xlu2 %v4336_v9, %s3428_s9  ;;  %2222 = vrot.lane.b32.xlu1 %v4333_v13, %s3429_s11  ;;  %1606 = vst [vmem:[#allocation2 + $0x30] sm:$0xff] %v4355_v50  ;;  %v2015_v16 = vld [vmem:[#allocation2 + $0x10] sm:$0xff] }
 0x308   : > { %v4363_v19 = vld [vmem:[#allocation2 + $0x18] sm:$0xff]  ;;  %1607 = vst.msk [vmem:[#allocation2 + $0x38] sm:$0xff] %vm365_vm1, %v1585_v53 }
 0x309   : > { %1652 = vrot.lane.b32.xlu0 %v4363_v19, %s3426_s21  ;;  %v2016_v59 = vld [vmem:[#allocation2 + $0x18] sm:$0xff]  ;;  %2027 = vst [vmem:[#allocation3 + $0x188] sm:$0xff] %v2015_v16 }
 0x30a   : > { %2028 = vst.msk [vmem:[#allocation3 + $0x190] sm:$0xff] %vm365_vm1, %v2016_v59 }
 0x30e   : > { %v2018_v35 = vld [vmem:[#allocation2 + $0x30] sm:$0xff]  ;;  %v4419_v4 = vpop.permute.xlu2 %1946 }
 0x30f   : > { %1948 = vrot.lane.b32.xlu1 %v4333_v13, %s3428_s9  ;;  %2228 = vrot.lane.b32.xlu2 %v4352_v40, %s3429_s11  ;;  %v4375_v60 = vld [vmem:[#allocation2 + $0x38] sm:$0xff]  ;;  %2030 = vst [vmem:[#allocation3 + $0x1a0] sm:$0xff] %v2018_v35 }
 0x310   : > { %2031 = vst.msk [vmem:[#allocation3 + $0x1a8] sm:$0xff] %vm365_vm1, %v4375_v60 }
 0x311   : > { %2224 = vrot.lane.b32.xlu0 %v4336_v9, %s3429_s11 }
 0x316   : > { %v4425_v24 = vpop.permute.xlu2 %1862 }
 0x317   : > { %2062 = vrot.lane.b32.xlu1 %v4333_v13, %s3433_s25  ;;  %1956 = vrot.lane.b32.xlu2 %v4352_v40, %s3428_s9 }
 0x319   : > { %2142 = vrot.lane.b32.xlu0 %v4333_v13, %s3431_s13 }
 0x31e   : > { %v4430_v53 = vpop.permute.xlu2 %1770 }
 0x31f   : > { %2230 = vrot.lane.b32.xlu1 %v4355_v50, %s3429_s11  ;;  %2148 = vrot.lane.b32.xlu2 %v4352_v40, %s3431_s13 }
 0x321   : > { %1848 = vrot.lane.b32.xlu0 %v4333_v13, %s3430_s12 }
 0x327   : > { %2150 = vrot.lane.b32.xlu1 %v4355_v50, %s3431_s13  ;;  %1856 = vrot.lane.b32.xlu2 %v4352_v40, %s3430_s12 }
 0x329   : > { %2064 = vrot.lane.b32.xlu0 %v4336_v9, %s3433_s25 }
 0x32b   : > { %v1478_v39 = vpop.xlane.xlu1 %1477 }
 0x32c   : > { %v1490_v48 = vmul.f32 0.00390625, %v1478_v39 }
 0x32e   : > { %v1498_v30 = vsub.f32 %v1490_v48, %v1494_v1  ;;  %v1483_v21 = vpop.xlane.xlu0 %1482 }
 0x32f   : > { %1958 = vrot.lane.b32.xlu1 %v4355_v50, %s3428_s9  ;;  %2070 = vrot.lane.b32.xlu2 %v4355_v50, %s3433_s25  ;;  %v1491_v2 = vmul.f32 0.00390625, %v1483_v21 }
 0x330   : > { %v1502_v32 = vadd.f32 1e-05, %v1498_v30 }
 0x331   : > { %2068 = vrot.lane.b32.xlu0 %v4352_v40, %s3433_s25 }
 0x332   : > { %3209 = vrsqrt.f32 %v1502_v32  ;;  %vm1530_vm11 = vweird.f32 %v1502_v32 }
 0x333   : > { %v1451_v26 = vpop.xlane.xlu1 %1450 }
 0x334   : > { %v1487_v12 = vmul.f32 0.00390625, %v1451_v26 }
 0x336   : > { %v1495_v5 = vmul.f32 %v1487_v12, %v1487_v12  ;;  %v1553_v35 = vsub.f32 %v4221_v51, %v1487_v12  ;;  %v1554_v14 = vsub.f32 %v4296_v6, %v1487_v12  ;;  %v1555_v39 = vsub.f32 %v4293_v23, %v1487_v12 }
 0x337   : > { %1858 = vrot.lane.b32.xlu2 %v4355_v50, %s3430_s12 }
 0x338   : > { %v3210_v58 = vpop.eup %3209  ;;  %v1499_v62 = vsub.f32 %v1491_v2, %v1495_v5  ;;  %v4450_v5 = vpop.permute.xlu2 %1746 }
 0x339   : > { %v1525_v63 = vmul.f32 %v3210_v58, %v1502_v32  ;;  %1756 = vrot.lane.b32.xlu0 %v4352_v40, %s3432_s24  ;;  %vm1531_vm10 = vweird.f32 %v3210_v58 }
 0x33a   : > { %v1503_v15 = vadd.f32 1e-05, %v1499_v62  ;;  %vm1532_vm12 = vmor %vm1530_vm11, %vm1531_vm10 }
 0x33b   : > { %v1526_v0 = vmul.f32 %v3210_v58, %v1525_v63 }
 0x33c   : > { %3211 = vrsqrt.f32 %v1503_v15  ;;  %vm1540_vm14 = vweird.f32 %v1503_v15 }
 0x33d   : > { %v1527_v29 = vmul.f32 0.5, %v1526_v0 }
 0x33f   : > { %v1528_v33 = vsub.f32 1.5, %v1527_v29 }
 0x341   : > { %v1529_v20 = vmul.f32 %v3210_v58, %v1528_v33 }
 0x342   : > { %v3212_v28 = vpop.eup %3211 }
 0x343   : > { %v1533_v27 = vsel %vm1532_vm12, %v3210_v58, %v1529_v20  ;;  %v1535_v38 = vmul.f32 %v3212_v28, %v1503_v15  ;;  %vm1541_vm13 = vweird.f32 %v3212_v28  ;;  %v4494_v20 = vpop.permute.xlu0 %1762 }
 0x344   : > { %v1562_v37 = vmul.f32 %v1550_v11, %v1533_v27  ;;  %v1563_v47 = vmul.f32 %v1551_v3, %v1533_v27  ;;  %v1564_v25 = vmul.f32 %v1552_v31, %v1533_v27  ;;  %vm1542_vm15 = vmor %vm1540_vm14, %vm1541_vm13 }
 0x345   : > { %v1536_v54 = vmul.f32 %v3212_v28, %v1535_v38 }
 0x346   : > { %v1574_v22 = vmax.f32 %v1562_v37, 0.0  ;;  %v1575_v42 = vmax.f32 %v1563_v47, 0.0  ;;  %v1576_v43 = vmax.f32 %v1564_v25, 0.0 }
 0x347   : > { %v1537_v59 = vmul.f32 0.5, %v1536_v54 }
 0x348   : > { %v4433_v16 = vmul.f32 %v1574_v22, %v4229_v18  ;;  %v4436_v44 = vmul.f32 %v1575_v42, %v4223_v36  ;;  %v1588_v55 = vmul.f32 %v1576_v43, %v4236_v49 }
 0x349   : > { %v1538_v17 = vsub.f32 1.5, %v1537_v59 }
 0x34a   : > { %2236 = vrot.lane.b32.xlu2 %v4436_v44, %s3429_s11  ;;  %2234 = vrot.lane.b32.xlu0 %v4433_v16, %s3429_s11  ;;  %1609 = vst [vmem:[#allocation2 + $0x50] sm:$0xff] %v4436_v44 }
 0x34b   : > { %v1539_v61 = vmul.f32 %v3212_v28, %v1538_v17  ;;  %2154 = vrot.lane.b32.xlu1 %v4433_v16, %s3431_s13  ;;  %1610 = vst.msk [vmem:[#allocation2 + $0x58] sm:$0xff] %vm365_vm1, %v1588_v55  ;;  %v1847_v0 = vpop.permute.xlu1 %1846 }
 0x34d   : > { %v1543_v48 = vsel %vm1542_vm15, %v3212_v28, %v1539_v61 }
 0x34e   : > { %v1565_v1 = vmul.f32 %v1553_v35, %v1543_v48  ;;  %v1566_v30 = vmul.f32 %v1554_v14, %v1543_v48  ;;  %v1567_v32 = vmul.f32 %v1555_v39, %v1543_v48 }
 0x350   : > { %v1577_v21 = vmax.f32 %v1565_v1, 0.0  ;;  %v1578_v26 = vmax.f32 %v1566_v30, 0.0  ;;  %v1579_v2 = vmax.f32 %v1567_v32, 0.0 }
 0x351   : > { %v4463_v23 = vld [vmem:[#allocation2 + $0x50] sm:$0xff] }
 0x352   : > { %v4453_v58 = vmul.f32 %v1577_v21, %v4229_v18  ;;  %v4456_v62 = vmul.f32 %v1578_v26, %v4223_v36  ;;  %v1591_v51 = vmul.f32 %v1579_v2, %v4236_v49  ;;  %2074 = vrot.lane.b32.xlu2 %v4433_v16, %s3433_s25  ;;  %1964 = vrot.lane.b32.xlu0 %v4433_v16, %s3428_s9  ;;  %v4468_v6 = vld [vmem:[#allocation2 + $0x58] sm:$0xff] }
 0x353   : > { %5248 = vst [vmem:[#allocation20_spill] sm:$0xff] %v4463_v23  ;;  %1864 = vrot.lane.b32.xlu1 %v4433_v16, %s3430_s12  ;;  %v4492_v33 = vpop.permute.xlu1 %1754 }
 0x354   : > { %1612 = vst [vmem:[#allocation2 + $0x70] sm:$0xff] %v4456_v62 }
 0x355   : > { %1613 = vst.msk [vmem:[#allocation2 + $0x78] sm:$0xff] %vm365_vm1, %v1591_v51 }
 0x356   : > { %2034 = vst.msk [vmem:[#allocation3 + $0x1c0] sm:$0xff] %vm365_vm1, %v4468_v6 }
 0x359   : > { %v4473_v12 = vpop.permute.xlu2 %2144 }
 0x35a   : > { %2156 = vrot.lane.b32.xlu0 %v4436_v44, %s3431_s13  ;;  %1764 = vrot.lane.b32.xlu2 %v4433_v16, %s3432_s24 }
 0x35b   : > { %2076 = vrot.lane.b32.xlu1 %v4436_v44, %s3433_s25  ;;  %v4481_v63 = vld [vmem:[#allocation2 + $0x70] sm:$0xff] }
 0x35c   : > { %5249 = vst [vmem:[#allocation21_spill] sm:$0xff] %v4481_v63  ;;  %v2025_v15 = vld [vmem:[#allocation2 + $0x78] sm:$0xff] }
 0x35d   : > { %2037 = vst.msk [vmem:[#allocation3 + $0x1d8] sm:$0xff] %vm365_vm1, %v2025_v15  ;;  %v4552_v55 = vld [vmem:[#allocation2 + $0x78] sm:$0xff] }
 0x361   : > { %v4484_v29 = vpop.permute.xlu2 %1950 }
 0x362   : > { %1966 = vrot.lane.b32.xlu0 %v4436_v44, %s3428_s9  ;;  %2162 = vrot.lane.b32.xlu2 %v4456_v62, %s3431_s13 }
 0x363   : > { %1866 = vrot.lane.b32.xlu1 %v4436_v44, %s3430_s12 }
 0x369   : > { %v2229_v28 = vpop.permute.xlu2 %2228 }
 0x36a   : > { %2242 = vrot.lane.b32.xlu0 %v4456_v62, %s3429_s11  ;;  %1974 = vrot.lane.b32.xlu2 %v4456_v62, %s3428_s9 }
 0x36b   : > { %2240 = vrot.lane.b32.xlu1 %v4453_v58, %s3429_s11 }
 0x371   : > { %v1651_v11 = vpop.permute.xlu1 %1650  ;;  %v1957_v3 = vpop.permute.xlu2 %1956 }
 0x372   : > { %2160 = vrot.lane.b32.xlu0 %v4453_v58, %s3431_s13  ;;  %1670 = vrot.lane.b32.xlu2 %v4286_v41, %s3426_s21  ;;  %v1649_v31 = vpop.permute.xlu0 %1648  ;;  %v4508_v27 = vsel %vm642_vm3, %v4397_v34, %v1957_v3 }
 0x373   : > { %1972 = vrot.lane.b32.xlu1 %v4453_v58, %s3428_s9  ;;  %v4514_v38 = vsel %vm338_vm0, %v4381_v10, %v1649_v31  ;;  %v4517_v37 = vsel %vm338_vm0, %v1649_v31, %v1651_v11 }
 0x374   : > { %1702 = vst [vmem:[#allocation3] sm:$0xff] %v4514_v38 }
 0x379   : > { %v2223_v47 = vpop.permute.xlu1 %2222  ;;  %v2149_v25 = vpop.permute.xlu2 %2148 }
 0x37a   : > { %1872 = vrot.lane.b32.xlu0 %v4453_v58, %s3430_s12  ;;  %1662 = vrot.lane.b32.xlu2 %v4281_v52, %s3426_s21 }
 0x37b   : > { %2080 = vrot.lane.b32.xlu1 %v4453_v58, %s3433_s25  ;;  %v1653_v41 = vpop.permute.xlu0 %1652 }
 0x37c   : > { %v1680_v10 = vsel %vm338_vm0, %v1651_v11, %v1653_v41 }
 0x37d   : > { %1704 = vst.msk [vmem:[#allocation3 + $0x10] sm:$0xff] %vm365_vm1, %v1680_v10 }
 0x381   : > { %v1949_v34 = vpop.permute.xlu1 %1948  ;;  %v1857_v54 = vpop.permute.xlu2 %1856 }
 0x382   : > { %2082 = vrot.lane.b32.xlu0 %v4456_v62, %s3433_s25  ;;  %1656 = vrot.lane.b32.xlu2 %v4352_v40, %s3426_s21  ;;  %v4534_v22 = vsel %vm642_vm3, %v4419_v4, %v1949_v34  ;;  %v4538_v52 = vsel %vm642_vm3, %v1949_v34, %v4484_v29  ;;  %v4546_v43 = vsel %vm541_vm5, %v4411_v56, %v1857_v54 }
 0x383   : > { %1772 = vrot.lane.b32.xlu1 %v4453_v58, %s3432_s24  ;;  %v4542_v42 = vpop.permute.xlu0 %2224 }
 0x384   : > { %v4550_v59 = vsel %vm913_vm4, %v2223_v47, %v4542_v42 }
 0x389   : > { %v2063_v4 = vpop.permute.xlu1 %2062  ;;  %v4554_v17 = vpop.permute.xlu2 %2070 }
 0x38a   : > { %1874 = vrot.lane.b32.xlu0 %v4456_v62, %s3430_s12  ;;  %2244 = vrot.lane.b32.xlu2 %v4552_v55, %s3429_s11 }
 0x38b   : > { %1748 = vrot.lane.b32.xlu1 %v4333_v13, %s3432_s24  ;;  %v2143_v56 = vpop.permute.xlu0 %2142 }
 0x38c   : > { %v4564_v61 = vsel %vm832_vm6, %v2143_v56, %v4473_v12 }
 0x391   : > { %v4566_v35 = vpop.permute.xlu1 %2230  ;;  %v4568_v14 = vpop.permute.xlu2 %1858 }
 0x392   : > { %5250 = vst [vmem:[#allocation22_spill] sm:$0xff] %v4568_v14  ;;  %1850 = vrot.lane.b32.xlu0 %v4336_v9, %s3430_s12  ;;  %2322 = vrot.lane.b32.xlu2 %v4456_v62, %s3427_s26  ;;  %v4576_v39 = vsel %vm913_vm4, %v2229_v28, %v4566_v35  ;;  %v4580_v48 = vsel %vm541_vm5, %v1857_v54, %v4568_v14 }
 0x393   : > { %1672 = vrot.lane.b32.xlu1 %v4453_v58, %s3426_s21  ;;  %v4584_v1 = vpop.permute.xlu0 %1848 }
 0x394   : > { %v4588_v30 = vsel %vm541_vm5, %v1847_v0, %v4584_v1 }
 0x399   : > { %v4590_v32 = vpop.permute.xlu1 %2150 }
 0x39a   : > { %1774 = vrot.lane.b32.xlu0 %v4456_v62, %s3432_s24  ;;  %2314 = vrot.lane.b32.xlu2 %v4433_v16, %s3427_s26  ;;  %v4598_v21 = vsel %vm832_vm6, %v2149_v25, %v4590_v32 }
 0x39b   : > { %1664 = vrot.lane.b32.xlu1 %v4433_v16, %s3426_s21  ;;  %v4602_v26 = vpop.permute.xlu0 %2064 }
 0x39c   : > { %5251 = vst [vmem:[#allocation23_spill] sm:$0xff] %v4602_v26  ;;  %v4606_v2 = vsel %vm751_vm8, %v2063_v4, %v4602_v26 }
 0x3a1   : > { %v4608_v51 = vpop.permute.xlu1 %1958 }
 0x3a2   : > { %1766 = vrot.lane.b32.xlu0 %v4436_v44, %s3432_s24  ;;  %1658 = vrot.lane.b32.xlu2 %v4355_v50, %s3426_s21  ;;  %v4616_v15 = vsel %vm642_vm3, %v1957_v3, %v4608_v51 }
 0x3a3   : > { %1758 = vrot.lane.b32.xlu1 %v4355_v50, %s3432_s24  ;;  %v2069_v0 = vpop.permute.xlu0 %2068 }
 0x3a4   : > { %v4620_v28 = vpop.permute.xlu2 %2236  ;;  %v4624_v11 = vsel %vm751_vm8, %v2069_v0, %v4554_v17 }
 0x3aa   : > { %1750 = vrot.lane.b32.xlu0 %v4336_v9, %s3432_s24  ;;  %2226 = vrot.lane.b32.xlu2 %v4363_v19, %s3429_s11 }
 0x3ab   : > { %1674 = vrot.lane.b32.xlu1 %v4456_v62, %s3426_s21  ;;  %v4632_v3 = vpop.permute.xlu0 %1756 }
 0x3ac   : > { %v2075_v31 = vpop.permute.xlu2 %2074  ;;  %v4637_v47 = vsel %vm440_vm7, %v4492_v33, %v4632_v3 }
 0x3b2   : > { %2320 = vrot.lane.b32.xlu0 %v4453_v58, %s3427_s26  ;;  %2164 = vrot.lane.b32.xlu2 %v4552_v55, %s3431_s13 }
 0x3b3   : > { %2238 = vrot.lane.b32.xlu1 %v4468_v6, %s3429_s11 }
 0x3b4   : > { %v4645_v25 = vpop.permute.xlu2 %1764 }
 0x3b5   : > { %v4650_v62 = vsel %vm440_vm7, %v4494_v20, %v4645_v25 }
 0x3ba   : > { %1666 = vrot.lane.b32.xlu0 %v4436_v44, %s3426_s21  ;;  %1968 = vrot.lane.b32.xlu2 %v4468_v6, %s3428_s9 }
 0x3bb   : > { %2316 = vrot.lane.b32.xlu1 %v4436_v44, %s3427_s26 }
 0x3bc   : > { %v2235_v33 = vpop.permute.xlu0 %2234  ;;  %v4658_v41 = vpop.permute.xlu2 %2162 }
 0x3bd   : > { %v2250_v10 = vsel %vm913_vm4, %v2235_v33, %v4620_v28  ;;  %v2155_v34 = vpop.permute.xlu1 %2154 }
 0x3c2   : > { %2232 = vrot.lane.b32.xlu0 %v4375_v60, %s3429_s11  ;;  %2146 = vrot.lane.b32.xlu2 %v4363_v19, %s3431_s13 }
 0x3c3   : > { %2308 = vrot.lane.b32.xlu1 %v4352_v40, %s3427_s26 }
 0x3c4   : > { %v1965_v20 = vpop.permute.xlu0 %1964  ;;  %v4668_v54 = vpop.permute.xlu2 %1974 }
 0x3c5   : > { %v1984_v44 = vsel %vm642_vm3, %v4387_v57, %v1965_v20  ;;  %v1865_v4 = vpop.permute.xlu1 %1864 }
 0x3c6   : > { %v4674_v56 = vsel %vm541_vm5, %v4425_v24, %v1865_v4 }
 0x3ca   : > { %2310 = vrot.lane.b32.xlu0 %v4355_v50, %s3427_s26  ;;  %1876 = vrot.lane.b32.xlu2 %v4552_v55, %s3430_s12 }
 0x3cb   : > { %2302 = vrot.lane.b32.xlu1 %v4333_v13, %s3427_s26 }
 0x3cc   : > { %v4682_v0 = vpop.permute.xlu0 %2156  ;;  %v4684_v33 = vpop.permute.xlu2 %1670 }
 0x3cd   : > { %v2170_v57 = vsel %vm832_vm6, %v2155_v34, %v4682_v0  ;;  %v4688_v49 = vpop.permute.xlu1 %2076 }
 0x3ce   : > { %v4692_v24 = vsel %vm751_vm8, %v2075_v31, %v4688_v49 }
 0x3d2   : > { %2304 = vrot.lane.b32.xlu0 %v4336_v9, %s3427_s26  ;;  %2072 = vrot.lane.b32.xlu2 %v4375_v60, %s3433_s25 }
 0x3d3   : > { %1976 = vrot.lane.b32.xlu1 %v4552_v55, %s3428_s9 }
 0x3d4   : > { %v4700_v13 = vpop.permute.xlu0 %1966  ;;  %v4702_v50 = vpop.permute.xlu2 %1662 }
 0x3d5   : > { %v1985_v34 = vsel %vm642_vm3, %v1965_v20, %v4700_v13  ;;  %v4706_v18 = vpop.permute.xlu1 %1866 }
 0x3d6   : > { %v4710_v31 = vsel %vm541_vm5, %v1865_v4, %v4706_v18 }
 0x3da   : > { %2158 = vrot.lane.b32.xlu0 %v4468_v6, %s3431_s13  ;;  %1852 = vrot.lane.b32.xlu2 %v4363_v19, %s3430_s12 }
 0x3db   : > { %2152 = vrot.lane.b32.xlu1 %v4375_v60, %s3431_s13 }
 0x3dc   : > { %v2243_v9 = vpop.permute.xlu0 %2242  ;;  %v4718_v36 = vpop.permute.xlu2 %1656 }
 0x3dd   : > { %v2241_v23 = vpop.permute.xlu1 %2240  ;;  %v4723_v20 = vsel %vm338_vm0, %v4391_v8, %v4718_v36 }
 0x3de   : > { %v2252_v4 = vsel %vm913_vm4, %v2241_v23, %v2243_v9  ;;  %1705 = vst [vmem:[#allocation3 + $0x18] sm:$0xff] %v4723_v20 }
 0x3df   : > { %2519 = vmatpush.msra.mxu1 %v2252_v4 }
 0x3e1   : > { %2520 = vmatpush.msra.mxu1 %v2250_v10 }
 0x3e2   : > { %1960 = vrot.lane.b32.xlu0 %v4375_v60, %s3428_s9  ;;  %1760 = vrot.lane.b32.xlu2 %v4375_v60, %s3432_s24 }
 0x3e3   : > { %1952 = vrot.lane.b32.xlu1 %v4363_v19, %s3428_s9  ;;  %2521 = vmatpush.msra.mxu1 %v4576_v39 }
 0x3e4   : > { %v2161_v63 = vpop.permute.xlu0 %2160  ;;  %v2245_v8 = vpop.permute.xlu2 %2244 }
 0x3e5   : > { %v2172_v23 = vsel %vm832_vm6, %v2161_v63, %v4658_v41  ;;  %v1973_v26 = vpop.permute.xlu1 %1972  ;;  %2277 = vst.msk [vmem:[#allocation3 + $0x2f8] sm:$0xff] %vm365_vm1, %v2245_v8  ;;  %2522 = vmatpush.msra.mxu1 %v4550_v59  ;;  %v4743_v14 = vsel %vm913_vm4, %v2243_v9, %v2245_v8 }
 0x3e6   : > { %v1987_v10 = vsel %vm642_vm3, %v4407_v7, %v1973_v26  ;;  %v1988_v4 = vsel %vm642_vm3, %v1973_v26, %v4668_v54 }
 0x3e7   : > { %2490 = vmatpush.msra.mxu0 %v1987_v10  ;;  %2523 = vmatpush.msra.mxu1 %v2172_v23 }
 0x3e8   : > { %2577 = vmatpush.msrb.mxu2 %v1988_v4 }
 0x3e9   : > { %2491 = vmatpush.msra.mxu0 %v1984_v44  ;;  %2524 = vmatpush.msra.mxu1 %v2170_v57 }
 0x3ea   : > { %2084 = vrot.lane.b32.xlu0 %v4552_v55, %s3433_s25  ;;  %1668 = vrot.lane.b32.xlu2 %v4468_v6, %s3426_s21 }
 0x3eb   : > { %2078 = vrot.lane.b32.xlu1 %v4468_v6, %s3433_s25  ;;  %2578 = vmatpush.msrb.mxu2 %v1985_v34 }
 0x3ec   : > { %v1873_v7 = vpop.permute.xlu0 %1872  ;;  %v4751_v63 = vpop.permute.xlu2 %2322  ;;  %2492 = vmatpush.msra.mxu0 %v4508_v27  ;;  %2525 = vmatpush.msra.mxu1 %v4598_v21  ;;  %v2465_v23 = vld [vmem:[#allocation3 + $0x2f8] sm:$0xff] }
 0x3ed   : > { %v1887_v59 = vsel %vm541_vm5, %v4401_v45, %v1873_v7  ;;  %v2081_v39 = vpop.permute.xlu1 %2080  ;;  %2579 = vmatpush.msrb.mxu2 %v4616_v15 }
 0x3ee   : > { %2493 = vmatpush.msra.mxu0 %v4534_v22  ;;  %2526 = vmatpush.msra.mxu1 %v4564_v61 }
 0x3ef   : > { %2580 = vmatpush.msrb.mxu2 %v4538_v52 }
 0x3f0   : > { %2494 = vmatpush.msra.mxu0 %v1887_v59 }
 0x3f2   : > { %1868 = vrot.lane.b32.xlu0 %v4468_v6, %s3430_s12  ;;  %2318 = vrot.lane.b32.xlu2 %v4468_v6, %s3427_s26 }
 0x3f3   : > { %1860 = vrot.lane.b32.xlu1 %v4375_v60, %s3430_s12  ;;  %2495 = vmatpush.msra.mxu0 %v4674_v56  ;;  %s3363_s12 = scalar_lea.hbm %s5228_s4, 192 }
 0x3f4   : > { %v4768_v45 = vpop.permute.xlu0 %2082  ;;  %v4770_v27 = vpop.permute.xlu2 %2314 }
 0x3f5   : > { %v2092_v22 = vsel %vm751_vm8, %v2081_v39, %v4768_v45  ;;  %v1773_v52 = vpop.permute.xlu1 %1772  ;;  %2496 = vmatpush.msra.mxu0 %v4546_v43 }
 0x3f6   : > { %v1787_v61 = vsel %vm440_vm7, %v4430_v53, %v1773_v52  ;;  %2527 = vmatpush.msra.mxu1 %v2092_v22 }
 0x3f7   : > { %2497 = vmatpush.msra.mxu0 %v4588_v30 }
 0x3f8   : > { %2528 = vmatpush.msra.mxu1 %v4692_v24 }
 0x3f9   : > { %2498 = vmatpush.msra.mxu0 %v1787_v61 }
 0x3fa   : > { %2066 = vrot.lane.b32.xlu0 %v4363_v19, %s3433_s25  ;;  %2529 = vmatpush.msra.mxu1 %v4624_v11 }
 0x3fb   : > { %1776 = vrot.lane.b32.xlu1 %v4552_v55, %s3432_s24  ;;  %2499 = vmatpush.msra.mxu0 %v4650_v62 }
 0x3fc   : > { %v4785_v43 = vpop.permute.xlu0 %1874  ;;  %v4787_v21 = vpop.permute.xlu2 %1658  ;;  %2530 = vmatpush.msra.mxu1 %v4606_v2 }
 0x3fd   : > { %v1888_v53 = vsel %vm541_vm5, %v1873_v7, %v4785_v43  ;;  %v1749_v30 = vpop.permute.xlu1 %1748  ;;  %v4795_v26 = vsel %vm338_vm0, %v4718_v36, %v4787_v21  ;;  %2500 = vmatpush.msra.mxu0 %v4637_v47 }
 0x3fe   : > { %v1778_v15 = vsel %vm440_vm7, %v4450_v5, %v1749_v30  ;;  %2531 = vmatpush.msra.mxu1 %v4453_v58  ;;  %2581 = vmatpush.msrb.mxu2 %v1888_v53 }
 0x3ff   : > { %2501 = vmatpush.msra.mxu0 %v1778_v15  ;;  %v4917_v15 = vld [vmem:[#allocation9 + $0x18] sm:$0xff] }
 0x400   : > { %2532 = vmatpush.msra.mxu1 %v4433_v16  ;;  %2582 = vmatpush.msrb.mxu2 %v4710_v31 }
 0x402   : > { %1768 = vrot.lane.b32.xlu0 %v4468_v6, %s3432_s24  ;;  %2533 = vmatpush.msra.mxu1 %v4352_v40 }
 0x403   : > { %1752 = vrot.lane.b32.xlu1 %v4363_v19, %s3432_s24  ;;  %2583 = vmatpush.msrb.mxu2 %v4580_v48 }
 0x404   : > { %v4809_v36 = vpop.permute.xlu0 %1850  ;;  %v2227_v5 = vpop.permute.xlu2 %2226  ;;  %2534 = vmatpush.msra.mxu1 %v4365_v46 }
 0x405   : > { %v1879_v16 = vsel %vm541_vm5, %v4584_v1, %v4809_v36  ;;  %v1673_v58 = vpop.permute.xlu1 %1672  ;;  %v4817_v6 = vsel %vm913_vm4, %v4542_v42, %v2227_v5  ;;  %2268 = vst.msk [vmem:[#allocation3 + $0x2b0] sm:$0xff] %vm365_vm1, %v2227_v5 }
 0x406   : > { %3095 = vmatpush.msrb.mxu1 %v4743_v14  ;;  %v1687_v40 = vsel %vm338_vm0, %v4684_v33, %v1673_v58  ;;  %2584 = vmatpush.msrb.mxu2 %v1879_v16  ;;  %v4923_v16 = vld [vmem:[#allocation9 + $0x10] sm:$0xff] }
 0x407   : > { %2502 = vmatpush.msra.mxu0 %v1687_v40 }
 0x40a   : > { %1676 = vrot.lane.b32.xlu0 %v4552_v55, %s3426_s21 }
 0x40b   : > { %1660 = vrot.lane.b32.xlu1 %v4375_v60, %s3426_s21  ;;  %s3357_s21 = sshra.s32 %s2951_s14, 4  ;;  %s3358_s21 = int_to_ptr.hbm [resolvable:$true] %s3357_s21 }
 0x40c   : > { %v4827_v46 = vpop.permute.xlu0 %1774  ;;  %v2165_v48 = vpop.permute.xlu2 %2164  ;;  %v2456_v53 = vld [vmem:[#allocation3 + $0x2b0] sm:$0xff]  ;;  %p3364_p11 = scmp.lt.s32.totalorder %s3358_s21, %s5228_s4 }
 0x40d   : > { %v1788_v42 = vsel %vm440_vm7, %v1773_v52, %v4827_v46  ;;  %v1665_v1 = vpop.permute.xlu1 %1664  ;;  %v4833_v2 = vsel %vm832_vm6, %v4658_v41, %v2165_v48  ;;  %2197 = vst.msk [vmem:[#allocation3 + $0x298] sm:$0xff] %vm365_vm1, %v2165_v48 }
 0x40e   : > { %v1684_v11 = vsel %vm338_vm0, %v4702_v50, %v1665_v1  ;;  %2585 = vmatpush.msrb.mxu2 %v1788_v42  ;;  %v4935_v42 = vld [vmem:[#allocation9 + $0x20] sm:$0xff] }
 0x40f   : > { %2503 = vmatpush.msra.mxu0 %v1684_v11 }
 0x411   : > { %2504 = vmatpush.msra.mxu0 %v4723_v20 }
 0x412   : > { %2324 = vrot.lane.b32.xlu0 %v4552_v55, %s3427_s26 }
 0x413   : > { %2312 = vrot.lane.b32.xlu1 %v4375_v60, %s3427_s26  ;;  %2505 = vmatpush.msra.mxu0 %v4514_v38 }
 0x414   : > { %v4844_v47 = vpop.permute.xlu0 %1766  ;;  %v1969_v62 = vpop.permute.xlu2 %1968 }
 0x415   : > { %2606 = vmatpush.msrb.mxu0 %v4743_v14  ;;  %v1785_v41 = vsel %vm440_vm7, %v4645_v25, %v4844_v47  ;;  %v4850_v44 = vpop.permute.xlu1 %1758  ;;  %v1986_v56 = vsel %vm642_vm3, %v4700_v13, %v1969_v62 }
 0x416   : > { %v1782_v60 = vsel %vm440_vm7, %v4632_v3, %v4850_v44  ;;  %2586 = vmatpush.msrb.mxu2 %v1785_v41  ;;  %2010 = vst.msk [vmem:[#allocation3 + $0x160] sm:$0xff] %vm365_vm1, %v1986_v56 }
 0x418   : > { %2587 = vmatpush.msrb.mxu2 %v1782_v60 }
 0x41a   : > { %2306 = vrot.lane.b32.xlu0 %v4363_v19, %s3427_s26  ;;  %s3359_s26 = scalar_lea.hbm %s3358_s21, 96 }
 0x41b   : > { %p3360_p1 = scmp.ne.s32.totalorder %s3358_s21, %s3359_s26  ;;  %p3365_p9 = scmp.lt.s32.totalorder %s3363_s12, %s3359_s26 }
 0x41c   : > { %v4860_v38 = vpop.permute.xlu0 %1750  ;;  %v2147_v55 = vpop.permute.xlu2 %2146 }
 0x41d   : > { %v1779_v14 = vsel %vm440_vm7, %v1749_v30, %v4860_v38  ;;  %v4864_v25 = vpop.permute.xlu1 %1674  ;;  %v4868_v33 = vsel %vm832_vm6, %v4473_v12, %v2147_v55  ;;  %2188 = vst.msk [vmem:[#allocation3 + $0x250] sm:$0xff] %vm365_vm1, %v2147_v55  ;;  %v2453_v30 = vld [vmem:[#allocation3 + $0x298] sm:$0xff]  ;;  %v2414_v60 = vld [vmem:[#allocation3 + $0x160] sm:$0xff]  ;;  %p3361_p4 = pnand %p3360_p1, %p3545_p7  ;;  %p3366_p2 = por %p3365_p9, %p3364_p11 }
 0x41e   : > { %v1688_v3 = vsel %vm338_vm0, %v1673_v58, %v4864_v25  ;;  %2588 = vmatpush.msrb.mxu2 %v1779_v14 }
 0x41f   : > { %p3362_p8 = pneg %p3361_p4 }
 0x420   : > { %2589 = vmatpush.msrb.mxu2 %v1688_v3  ;;  %v4962_v3 = vld [vmem:[#allocation9 + $0x48] sm:$0xff] }
 0x421   : > { %p3367_p10 = pnand %p3366_p2, %p3362_p8 }
 0x424   : > { %v2321_v19 = vpop.permute.xlu0 %2320  ;;  %v1877_v57 = vpop.permute.xlu2 %1876 }
 0x425   : > { %v2332_v24 = vsel %vm994_vm2, %v2321_v19, %v4751_v63  ;;  %v2239_v13 = vpop.permute.xlu1 %2238  ;;  %v1889_v12 = vsel %vm541_vm5, %v4785_v43, %v1877_v57 }
 0x426   : > { %v2251_v50 = vsel %vm913_vm4, %v4620_v28, %v2239_v13  ;;  %2560 = vmatpush.msra.mxu3 %v2332_v24  ;;  %2274 = vst.msk [vmem:[#allocation3 + $0x2e0] sm:$0xff] %vm365_vm1, %v2239_v13  ;;  %v4972_v13 = vld [vmem:[#allocation9 + $0x40] sm:$0xff] }
 0x427   : > { %2607 = vmatpush.msrb.mxu0 %v2251_v50  ;;  %3096 = vmatpush.msrb.mxu1 %v2251_v50  ;;  %1913 = vst.msk [vmem:[#allocation3 + $0x118] sm:$0xff] %vm365_vm1, %v1889_v12  ;;  %v2444_v50 = vld [vmem:[#allocation3 + $0x250] sm:$0xff] }
 0x42c   : > { %v1667_v34 = vpop.permute.xlu0 %1666  ;;  %v2073_v31 = vpop.permute.xlu2 %2072 }
 0x42d   : > { %v1685_v9 = vsel %vm338_vm0, %v1665_v1, %v1667_v34  ;;  %v4882_v20 = vpop.permute.xlu1 %2316  ;;  %v4886_v8 = vsel %vm751_vm8, %v4554_v17, %v2073_v31  ;;  %2111 = vst.msk [vmem:[#allocation3 + $0x208] sm:$0xff] %vm365_vm1, %v2073_v31  ;;  %v2462_v7 = vld [vmem:[#allocation3 + $0x2e0] sm:$0xff]  ;;  %v4937_v1 = vld [vmem:[#allocation9 + $0x30] sm:$0xff] }
 0x42e   : > { %v2330_v28 = vsel %vm994_vm2, %v4770_v27, %v4882_v20  ;;  %2590 = vmatpush.msrb.mxu2 %v1685_v9 }
 0x42f   : > { %2561 = vmatpush.msra.mxu3 %v2330_v28  ;;  %v2405_v28 = vld [vmem:[#allocation3 + $0x118] sm:$0xff] }
 0x430   : > { %2591 = vmatpush.msrb.mxu2 %v4795_v26  ;;  %v4915_v26 = vld [vmem:[#allocation9 + $0x8] sm:$0xff] }
 0x431   : > { %2535 = vmatmul.f32.vlgmr.msra.gmra.mxu1 %v4915_v26 }
 0x432   : > { %2592 = vmatpush.msrb.mxu2 %v4517_v37  ;;  %v4904_v37 = vld [vmem:[#allocation9] sm:$0xff] }
 0x433   : > { %2506 = vmatmul.f32.vlgmr.msra.gmra.mxu0 %v4904_v37  ;;  %2593 = vmatmul.f32.vlgmr.msrb.gmra.mxu2 %v4904_v37 }
 0x434   : > { %2693 = vmatpush.msra.mxu2 %v2465_v23  ;;  %v2233_v10 = vpop.permute.xlu0 %2232  ;;  %v1853_v4 = vpop.permute.xlu2 %1852 }
 0x435   : > { %v2249_v17 = vsel %vm913_vm4, %v4566_v35, %v2233_v10  ;;  %2271 = vst.msk [vmem:[#allocation3 + $0x2c8] sm:$0xff] %vm365_vm1, %v2233_v10  ;;  %v2309_v59 = vpop.permute.xlu1 %2308  ;;  %v1880_v39 = vsel %vm541_vm5, %v4809_v36, %v1853_v4 }
 0x436   : > { %2694 = vmatpush.msra.mxu2 %v2462_v7  ;;  %2608 = vmatpush.msrb.mxu0 %v2249_v17  ;;  %1904 = vst.msk [vmem:[#allocation3 + $0xd0] sm:$0xff] %vm365_vm1, %v1880_v39  ;;  %v5252_v7 = vld [vmem:[#allocation22_spill] sm:$0xff] }
 0x437   : > { %3097 = vmatpush.msrb.mxu1 %v2249_v17 }
 0x438   : > { %2609 = vmatpush.msrb.mxu0 %v4817_v6 }
 0x439   : > { %3098 = vmatpush.msrb.mxu1 %v4817_v6 }
 0x43a   : > { %2610 = vmatpush.msrb.mxu0 %v4833_v2  ;;  %2538 = vmatmul.f32.gmra.mxu1 %v4935_v42 }
 0x43b   : > { %3099 = vmatpush.msrb.mxu1 %v4833_v2  ;;  %2509 = vmatmul.f32.gmra.mxu0 %v4917_v15 }
 0x43c   : > { %v4906_v35 = vpop.permute.xlu0 %2310  ;;  %v1761_v27 = vpop.permute.xlu2 %1760  ;;  %v2459_v22 = vld [vmem:[#allocation3 + $0x2c8] sm:$0xff]  ;;  %2596 = vmatmul.f32.gmra.mxu2 %v4917_v15 }
 0x43d   : > { %v2328_v52 = vsel %vm994_vm2, %v2309_v59, %v4906_v35  ;;  %v2303_v61 = vpop.permute.xlu1 %2302  ;;  %v1783_v43 = vsel %vm440_vm7, %v4850_v44, %v1761_v27  ;;  %2695 = vmatpush.msra.mxu2 %v2459_v22  ;;  %v2435_v59 = vld [vmem:[#allocation3 + $0x208] sm:$0xff]  ;;  %v5253_v27 = vld [vmem:[#allocation23_spill] sm:$0xff] }
 0x43e   : > { %2562 = vmatpush.msra.mxu3 %v2328_v52  ;;  %1807 = vst.msk [vmem:[#allocation3 + $0x88] sm:$0xff] %vm365_vm1, %v1783_v43 }
 0x43f   : > { %2696 = vmatpush.msra.mxu2 %v2456_v53  ;;  %v5254_v53 = vld [vmem:[#allocation21_spill] sm:$0xff] }
 0x441   : > { %2697 = vmatpush.msra.mxu2 %v2453_v30  ;;  %v2396_v30 = vld [vmem:[#allocation3 + $0xd0] sm:$0xff] }
 0x443   : > { %2512 = vmatmul.f32.gmra.mxu0 %v4937_v1 }
 0x444   : > { %v4919_v36 = vpop.permute.xlu0 %2304  ;;  %v1669_v5 = vpop.permute.xlu2 %1668  ;;  %2599 = vmatmul.f32.gmra.mxu2 %v4937_v1 }
 0x445   : > { %v2326_v58 = vsel %vm994_vm2, %v2303_v61, %v4919_v36  ;;  %v1977_v6 = vpop.permute.xlu1 %1976  ;;  %v1686_v40 = vsel %vm338_vm0, %v1667_v34, %v1669_v5  ;;  %v5255_v5 = vld [vmem:[#allocation20_spill] sm:$0xff] }
 0x446   : > { %v1989_v48 = vsel %vm642_vm3, %v4668_v54, %v1977_v6  ;;  %2563 = vmatpush.msra.mxu3 %v2326_v58  ;;  %1710 = vst.msk [vmem:[#allocation3 + $0x40] sm:$0xff] %vm365_vm1, %v1686_v40 }
 0x447   : > { %2013 = vst.msk [vmem:[#allocation3 + $0x178] sm:$0xff] %vm365_vm1, %v1989_v48  ;;  %3079 = vmatmul.msk.f32.vlgmr.msra.gmra.mxu3 %vm365_vm1, %v4923_v16 }
 0x44b   : > { %2515 = vmatmul.f32.gmra.mxu0 %v4962_v3 }
 0x44c   : > { %v2159_v2 = vpop.permute.xlu0 %2158  ;;  %v2319_v11 = vpop.permute.xlu2 %2318  ;;  %2602 = vmatmul.f32.gmra.mxu2 %v4962_v3 }
 0x44d   : > { %v2171_v54 = vsel %vm832_vm6, %v4682_v0, %v2159_v2  ;;  %2194 = vst.msk [vmem:[#allocation3 + $0x280] sm:$0xff] %vm365_vm1, %v2159_v2  ;;  %v2153_v62 = vpop.permute.xlu1 %2152  ;;  %v4949_v44 = vsel %vm994_vm2, %v4882_v20, %v2319_v11  ;;  %v4952_v0 = vld [vmem:[#allocation9 + $0x28] sm:$0xff]  ;;  %v4982_v20 = vld [vmem:[#allocation9 + $0x58] sm:$0xff] }
 0x44e   : > { %v2169_v41 = vsel %vm832_vm6, %v4590_v32, %v2153_v62  ;;  %v2417_v56 = vld [vmem:[#allocation3 + $0x178] sm:$0xff]  ;;  %2611 = vmatpush.msrb.mxu0 %v2171_v54  ;;  %3100 = vmatpush.msrb.mxu1 %v2171_v54  ;;  %2191 = vst.msk [vmem:[#allocation3 + $0x268] sm:$0xff] %vm365_vm1, %v2153_v62  ;;  %v3222_v62 = vld [vmem:[#allocation3 + $0x188] sm:$0xff] }
 0x44f   : > { %2664 = vmatpush.msrb.mxu3 %v2417_v56  ;;  %2354 = vst.msk [vmem:[#allocation3 + $0x340] sm:$0xff] %vm365_vm1, %v2319_v11  ;;  %v4957_v32 = vld [vmem:[#allocation9 + $0x38] sm:$0xff] }
 0x450   : > { %2612 = vmatpush.msrb.mxu0 %v2169_v41  ;;  %3101 = vmatpush.msrb.mxu1 %v2169_v41  ;;  %v2429_v54 = vld [vmem:[#allocation3 + $0x1d8] sm:$0xff]  ;;  %v2426_v41 = vld [vmem:[#allocation3 + $0x1c0] sm:$0xff] }
 0x451   : > { %2665 = vmatpush.msrb.mxu3 %v2414_v60  ;;  %2541 = vmatmul.f32.gmra.mxu1 %v4957_v32  ;;  %v2420_v60 = vld [vmem:[#allocation3 + $0x190] sm:$0xff] }
 0x452   : > { %2613 = vmatpush.msrb.mxu0 %v4868_v33  ;;  %3102 = vmatpush.msrb.mxu1 %v4868_v33 }
 0x453   : > { %3080 = vmatmul.msk.f32.gmra.mxu3 %vm365_vm1, %v4952_v0 }
 0x454   : > { %v1961_v55 = vpop.permute.xlu0 %1960  ;;  %v2450_v14 = vld [vmem:[#allocation3 + $0x280] sm:$0xff] }
 0x455   : > { %v1983_v19 = vsel %vm642_vm3, %v4608_v51, %v1961_v55  ;;  %v1953_v57 = vpop.permute.xlu1 %1952  ;;  %2698 = vmatpush.msra.mxu2 %v2450_v14  ;;  %v2447_v24 = vld [vmem:[#allocation3 + $0x268] sm:$0xff] }
 0x456   : > { %2007 = vst.msk [vmem:[#allocation3 + $0x148] sm:$0xff] %vm365_vm1, %v1983_v19  ;;  %v1980_v33 = vsel %vm642_vm3, %v4484_v29, %v1953_v57  ;;  %v2387_v57 = vld [vmem:[#allocation3 + $0x88] sm:$0xff] }
 0x457   : > { %2004 = vst.msk [vmem:[#allocation3 + $0x130] sm:$0xff] %vm365_vm1, %v1980_v33  ;;  %2699 = vmatpush.msra.mxu2 %v2447_v24 }
 0x459   : > { %2700 = vmatpush.msra.mxu2 %v2444_v50 }
 0x45b   : > { %3081 = vmatmul.msk.f32.gmra.mxu3 %vm365_vm1, %v4972_v13 }
 0x45c   : > { %v2085_v51 = vpop.permute.xlu0 %2084 }
 0x45d   : > { %v2093_v12 = vsel %vm751_vm8, %v4768_v45, %v2085_v51  ;;  %2117 = vst.msk [vmem:[#allocation3 + $0x238] sm:$0xff] %vm365_vm1, %v2085_v51  ;;  %v2079_v29 = vpop.permute.xlu1 %2078  ;;  %v2411_v34 = vld [vmem:[#allocation3 + $0x148] sm:$0xff]  ;;  %v4984_v45 = vld [vmem:[#allocation9 + $0x50] sm:$0xff]  ;;  %v2378_v51 = vld [vmem:[#allocation3 + $0x40] sm:$0xff] }
 0x45e   : > { %v2091_v31 = vsel %vm751_vm8, %v4688_v49, %v2079_v29  ;;  %2666 = vmatpush.msrb.mxu3 %v2411_v34  ;;  %2614 = vmatpush.msrb.mxu0 %v2093_v12  ;;  %v2408_v9 = vld [vmem:[#allocation3 + $0x130] sm:$0xff]  ;;  %2114 = vst.msk [vmem:[#allocation3 + $0x220] sm:$0xff] %vm365_vm1, %v2079_v29 }
 0x45f   : > { %3103 = vmatpush.msrb.mxu1 %v2093_v12 }
 0x460   : > { %2667 = vmatpush.msrb.mxu3 %v2408_v9  ;;  %2615 = vmatpush.msrb.mxu0 %v2091_v31 }
 0x461   : > { %3104 = vmatpush.msrb.mxu1 %v2091_v31 }
 0x462   : > { %2668 = vmatpush.msrb.mxu3 %v2405_v28  ;;  %2616 = vmatpush.msrb.mxu0 %v4886_v8 }
 0x463   : > { %3105 = vmatpush.msrb.mxu1 %v4886_v8  ;;  %3082 = vmatmul.msk.f32.gmra.mxu3 %vm365_vm1, %v4982_v20 }
 0x464   : > { %v1869_v49 = vpop.permute.xlu0 %1868  ;;  %v2441_v23 = vld [vmem:[#allocation3 + $0x238] sm:$0xff]  ;;  %2544 = vmatmul.f32.gmra.mxu1 %v4984_v45 }
 0x465   : > { %v1886_v10 = vsel %vm541_vm5, %v4706_v18, %v1869_v49  ;;  %v1861_v4 = vpop.permute.xlu1 %1860  ;;  %2701 = vmatpush.msra.mxu2 %v2441_v23  ;;  %v2438_v8 = vld [vmem:[#allocation3 + $0x220] sm:$0xff] }
 0x466   : > { %1910 = vst.msk [vmem:[#allocation3 + $0x100] sm:$0xff] %vm365_vm1, %v1886_v10  ;;  %v1883_v17 = vsel %vm541_vm5, %v5252_v7, %v1861_v4 }
 0x467   : > { %1907 = vst.msk [vmem:[#allocation3 + $0xe8] sm:$0xff] %vm365_vm1, %v1883_v17  ;;  %2702 = vmatpush.msra.mxu2 %v2438_v8 }
 0x469   : > { %2703 = vmatpush.msra.mxu2 %v2435_v59 }
 0x46c   : > { %v2067_v39 = vpop.permute.xlu0 %2066 }
 0x46d   : > { %v2087_v22 = vsel %vm751_vm8, %v5253_v27, %v2067_v39  ;;  %2108 = vst.msk [vmem:[#allocation3 + $0x1f0] sm:$0xff] %vm365_vm1, %v2067_v39  ;;  %v1777_v18 = vpop.permute.xlu1 %1776  ;;  %v2402_v52 = vld [vmem:[#allocation3 + $0x100] sm:$0xff] }
 0x46e   : > { %v1789_v61 = vsel %vm440_vm7, %v4827_v46, %v1777_v18  ;;  %2669 = vmatpush.msrb.mxu3 %v2402_v52  ;;  %2617 = vmatpush.msrb.mxu0 %v2087_v22  ;;  %v2399_v43 = vld [vmem:[#allocation3 + $0xe8] sm:$0xff]  ;;  %v3221_v46 = vld [vmem:[#allocation3 + $0x1a0] sm:$0xff] }
 0x46f   : > { %1813 = vst.msk [vmem:[#allocation3 + $0xb8] sm:$0xff] %vm365_vm1, %v1789_v61  ;;  %3106 = vmatpush.msrb.mxu1 %v2087_v22 }
 0x470   : > { %2670 = vmatpush.msrb.mxu3 %v2399_v43  ;;  %2618 = vmatpush.msrb.mxu0 %v5254_v53 }
 0x471   : > { %3107 = vmatpush.msrb.mxu1 %v5254_v53  ;;  %v5256_v53 = vld [vmem:[#allocation17_spill] sm:$0xff] }
 0x472   : > { %2671 = vmatpush.msrb.mxu3 %v2396_v30  ;;  %2619 = vmatpush.msrb.mxu0 %v5255_v5 }
 0x473   : > { %3108 = vmatpush.msrb.mxu1 %v5255_v5 }
 0x474   : > { %v1769_v58 = vpop.permute.xlu0 %1768  ;;  %v2432_v6 = vld [vmem:[#allocation3 + $0x1f0] sm:$0xff]  ;;  %2620 = vmatpush.msrb.mxu0 %v3221_v46 }
 0x475   : > { %v1786_v40 = vsel %vm440_vm7, %v4844_v47, %v1769_v58  ;;  %v1753_v48 = vpop.permute.xlu1 %1752  ;;  %2704 = vmatpush.msra.mxu2 %v2432_v6  ;;  %3109 = vmatpush.msrb.mxu1 %v3221_v46  ;;  %v2423_v47 = vld [vmem:[#allocation3 + $0x1a8] sm:$0xff] }
 0x476   : > { %1810 = vst.msk [vmem:[#allocation3 + $0xa0] sm:$0xff] %vm365_vm1, %v1786_v40  ;;  %v1780_v2 = vsel %vm440_vm7, %v4860_v38, %v1753_v48  ;;  %v2393_v11 = vld [vmem:[#allocation3 + $0xb8] sm:$0xff]  ;;  %2621 = vmatpush.msrb.mxu0 %v3222_v62  ;;  %v5257_v58 = vld [vmem:[#allocation18_spill] sm:$0xff] }
 0x477   : > { %1804 = vst.msk [vmem:[#allocation3 + $0x70] sm:$0xff] %vm365_vm1, %v1780_v2  ;;  %2672 = vmatpush.msrb.mxu3 %v2393_v11  ;;  %2705 = vmatpush.msra.mxu2 %v2429_v54  ;;  %v5258_v11 = vld [vmem:[#allocation19_spill] sm:$0xff] }
 0x478   : > { %3110 = vmatpush.msrb.mxu1 %v3222_v62  ;;  %2622 = vmatmul.f32.vlgmr.msrb.gmra.mxu0 %v4915_v26 }
 0x479   : > { %2706 = vmatpush.msra.mxu2 %v2426_v41  ;;  %2628 = vmatmul.f32.vlgmr.msrb.gmra.mxu1 %v4957_v32 }
 0x47b   : > { %2707 = vmatpush.msra.mxu2 %v2423_v47 }
 0x47c   : > { %v1677_v56 = vpop.permute.xlu0 %1676 }
 0x47d   : > { %v1689_v38 = vsel %vm338_vm0, %v4864_v25, %v1677_v56  ;;  %v1661_v55 = vpop.permute.xlu1 %1660  ;;  %2708 = vmatpush.msra.mxu2 %v2420_v60  ;;  %v2390_v14 = vld [vmem:[#allocation3 + $0xa0] sm:$0xff] }
 0x47e   : > { %1713 = vst.msk [vmem:[#allocation3 + $0x58] sm:$0xff] %vm365_vm1, %v1689_v38  ;;  %v1683_v19 = vsel %vm338_vm0, %v4787_v21, %v1661_v55  ;;  %2673 = vmatpush.msrb.mxu3 %v2390_v14  ;;  %2709 = vmatmul.f32.vlgmr.msra.gmra.mxu2 %v4915_v26  ;;  %v2384_v33 = vld [vmem:[#allocation3 + $0x70] sm:$0xff] }
 0x47f   : > { %1707 = vst.msk [vmem:[#allocation3 + $0x28] sm:$0xff] %vm365_vm1, %v1683_v19 }
 0x480   : > { %2674 = vmatpush.msrb.mxu3 %v2387_v57  ;;  %2625 = vmatmul.f32.gmra.mxu0 %v4935_v42 }
 0x481   : > { %2631 = vmatmul.f32.gmra.mxu1 %v4984_v45 }
 0x482   : > { %2675 = vmatpush.msrb.mxu3 %v2384_v33 }
 0x484   : > { %v2325_v25 = vpop.permute.xlu0 %2324 }
 0x485   : > { %v2333_v24 = vsel %vm994_vm2, %v4751_v63, %v2325_v25  ;;  %2357 = vst.msk [vmem:[#allocation3 + $0x358] sm:$0xff] %vm365_vm1, %v2325_v25  ;;  %v2313_v21 = vpop.permute.xlu1 %2312  ;;  %v2381_v50 = vld [vmem:[#allocation3 + $0x58] sm:$0xff]  ;;  %v2372_v63 = vld [vmem:[#allocation3 + $0x10] sm:$0xff] }
 0x486   : > { %v2329_v26 = vsel %vm994_vm2, %v4906_v35, %v2313_v21  ;;  %2676 = vmatpush.msrb.mxu3 %v2381_v50  ;;  %2647 = vmatpush.msra.mxu1 %v2333_v24  ;;  %2351 = vst.msk [vmem:[#allocation3 + $0x328] sm:$0xff] %vm365_vm1, %v2313_v21  ;;  %v2375_v12 = vld [vmem:[#allocation3 + $0x28] sm:$0xff] }
 0x487   : > { %2712 = vmatmul.f32.gmra.mxu2 %v4935_v42  ;;  %v2474_v42 = vld [vmem:[#allocation3 + $0x340] sm:$0xff] }
 0x488   : > { %2677 = vmatpush.msrb.mxu3 %v2378_v51  ;;  %2648 = vmatpush.msra.mxu1 %v4949_v44 }
 0x48a   : > { %2678 = vmatpush.msrb.mxu3 %v2375_v12  ;;  %2649 = vmatpush.msra.mxu1 %v2329_v26 }
 0x48c   : > { %v2307_v29 = vpop.permute.xlu0 %2306  ;;  %2679 = vmatpush.msrb.mxu3 %v2372_v63  ;;  %v2477_v34 = vld [vmem:[#allocation3 + $0x358] sm:$0xff] }
 0x48d   : > { %v2327_v35 = vsel %vm994_vm2, %v4919_v36, %v2307_v29  ;;  %2348 = vst.msk [vmem:[#allocation3 + $0x310] sm:$0xff] %vm365_vm1, %v2307_v29  ;;  %2734 = vmatpush.msra.mxu0 %v2477_v34  ;;  %2680 = vmatmul.f32.vlgmr.msrb.gmra.mxu3 %v4904_v37  ;;  %v2471_v44 = vld [vmem:[#allocation3 + $0x328] sm:$0xff] }
 0x48e   : > { %2650 = vmatpush.msra.mxu1 %v2327_v35 }
 0x48f   : > { %2735 = vmatpush.msra.mxu0 %v2474_v42  ;;  %3083 = vmatmul.msk.f32.vlgmr.msra.gmra.mxu1 %vm365_vm1, %v4923_v16 }
 0x490   : > { %2715 = vmatmul.f32.gmra.mxu2 %v4957_v32 }
 0x491   : > { %2736 = vmatpush.msra.mxu0 %v2471_v44 }
 0x494   : > { %v2468_v31 = vld [vmem:[#allocation3 + $0x310] sm:$0xff] }
 0x495   : > { %2737 = vmatpush.msra.mxu0 %v2468_v31  ;;  %2683 = vmatmul.f32.gmra.mxu3 %v4917_v15 }
 0x496   : > { %3087 = vmatmul.msk.f32.vlgmr.msra.gmra.mxu0 %vm365_vm1, %v4923_v16 }
 0x497   : > { %3084 = vmatmul.msk.f32.gmra.mxu1 %vm365_vm1, %v4952_v0 }
 0x498   : > { %2718 = vmatmul.f32.gmra.mxu2 %v4984_v45 }
 0x49d   : > { %2686 = vmatmul.f32.gmra.mxu3 %v4937_v1 }
 0x49e   : > { %3088 = vmatmul.msk.f32.gmra.mxu0 %vm365_vm1, %v4952_v0 }
 0x49f   : > { %3085 = vmatmul.msk.f32.gmra.mxu1 %vm365_vm1, %v4972_v13 }
 0x4a5   : > { %2689 = vmatmul.f32.gmra.mxu3 %v4962_v3 }
 0x4a6   : > { %3089 = vmatmul.msk.f32.gmra.mxu0 %vm365_vm1, %v4972_v13 }
 0x4a7   : > { %3086 = vmatmul.msk.f32.gmra.mxu1 %vm365_vm1, %v4982_v20 }
 0x4ae   : > { %3090 = vmatmul.msk.f32.gmra.mxu0 %vm365_vm1, %v4982_v20  ;;  %v2536_v37 = vpop.f32.mrf.mxu1 }
 0x4b0   : > { %v2507_v15 = vpop.f32.mrf.mxu0 }
 0x4b1   : > { %v2537_v59 = vadd.f32 %v2536_v37, %v2507_v15 }
 0x4b6   : > { %v2594_v16 = vpop.f32.mrf.mxu2 }
 0x4b7   : > { %v2539_v36 = vpop.f32.mrf.mxu1 }
 0x4b8   : > { %v2510_v1 = vpop.f32.mrf.mxu0 }
 0x4b9   : > { %v2540_v62 = vadd.f32 %v2539_v36, %v2510_v1 }
 0x4bf   : > { %v2597_v9 = vpop.f32.mrf.mxu2 }
 0x4c0   : > { %v2513_v28 = vpop.f32.mrf.mxu0 }
 0x4c7   : > { %v2600_v49 = vpop.f32.mrf.mxu2 }
 0x4c8   : > { %v2516_v23 = vpop.f32.mrf.mxu0 }
 0x4ca   : > { %v2565_v32 = vpop.f32.mrf.mxu3 }
 0x4cb   : > { %v5059_v52 = vadd.f32 %v2565_v32, %v2537_v59 }
 0x4cd   : > { %v2751_v6 = vmul.f32 %v5059_v52, %v5257_v58 }
 0x4ce   : > { %v2542_v0 = vpop.f32.mrf.mxu1 }
 0x4cf   : > { %v2603_v4 = vpop.f32.mrf.mxu2  ;;  %v2783_v41 = vmul.f32 %v2751_v6, %v5059_v52  ;;  %v2543_v63 = vadd.f32 %v2542_v0, %v2513_v28 }
 0x4d6   : > { %v2568_v3 = vpop.f32.mrf.mxu3 }
 0x4d7   : > { %v5076_v24 = vadd.f32 %v2568_v3, %v2540_v62 }
 0x4d9   : > { %v2754_v42 = vmul.f32 %v5076_v24, %v5257_v58 }
 0x4de   : > { %v2571_v10 = vpop.f32.mrf.mxu3 }
 0x4df   : > { %v5089_v15 = vadd.f32 %v2571_v10, %v2543_v63 }
 0x4e1   : > { %v2545_v45 = vpop.f32.mrf.mxu1 }
 0x4e2   : > { %v2546_v1 = vadd.f32 %v2545_v45, %v2516_v23 }
 0x4e6   : > { %v2574_v8 = vpop.f32.mrf.mxu3 }
 0x4e7   : > { %v5101_v45 = vadd.f32 %v2574_v8, %v2546_v1 }
 0x4f5   : > { %v2623_v7 = vpop.f32.mrf.mxu0 }
 0x4f6   : > { %v2629_v13 = vpop.f32.mrf.mxu1  ;;  %v2624_v39 = vadd.f32 %v2623_v7, %v2594_v16 }
 0x4f7   : > { %v2630_v29 = vadd.f32 %v2629_v13, %v2600_v49  ;;  %v2757_v13 = vmul.f32 %v5089_v15, %v5257_v58 }
 0x4fd   : > { %v2626_v27 = vpop.f32.mrf.mxu0 }
 0x4fe   : > { %v2632_v17 = vpop.f32.mrf.mxu1  ;;  %v2627_v47 = vadd.f32 %v2626_v27, %v2597_v9 }
 0x4ff   : > { %v2633_v0 = vadd.f32 %v2632_v17, %v2603_v4 }
 0x501   : > { %v2710_v20 = vpop.f32.mrf.mxu2 }
 0x50a   : > { %v2713_v5 = vpop.f32.mrf.mxu2 }
 0x50c   : > { %v2652_v22 = vpop.f32.mrf.mxu1 }
 0x50d   : > { %v5057_v18 = vadd.f32 %v2652_v22, %v2624_v39 }
 0x50f   : > { %v2752_v30 = vmul.f32 %v5057_v18, %v5256_v53 }
 0x510   : > { %v2681_v61 = vpop.f32.mrf.mxu3 }
 0x511   : > { %v2711_v43 = vadd.f32 %v2710_v20, %v2681_v61  ;;  %v2784_v2 = vmul.f32 %v2752_v30, %v5057_v18  ;;  %v2763_v56 = vadd.f32 %v2752_v30, %v2751_v6  ;;  %v2760_v61 = vmul.f32 %v5101_v45, %v5257_v58 }
 0x513   : > { %v2739_v46 = vpop.f32.mrf.mxu0  ;;  %v2795_v33 = vadd.f32 %v2784_v2, %v2783_v41  ;;  %v2716_v51 = vpop.f32.mrf.mxu2 }
 0x514   : > { %v5065_v40 = vadd.f32 %v2739_v46, %v2711_v43  ;;  %v2655_v48 = vpop.f32.mrf.mxu1 }
 0x515   : > { %v5073_v19 = vadd.f32 %v2655_v48, %v2627_v47  ;;  %v2792_v48 = vmul.f32 %v2760_v61, %v5101_v45 }
 0x516   : > { %v2753_v54 = vmul.f32 %v5065_v40, %v5258_v11 }
 0x517   : > { %v2755_v34 = vmul.f32 %v5073_v19, %v5256_v53 }
 0x518   : > { %v2785_v60 = vmul.f32 %v2753_v54, %v5065_v40  ;;  %v2684_v38 = vpop.f32.mrf.mxu3  ;;  %v2764_v55 = vsel %vm365_vm1, %v2753_v54, 0.0 }
 0x519   : > { %v2714_v14 = vadd.f32 %v2713_v5, %v2684_v38  ;;  %v2765_v57 = vadd.f32 %v2764_v55, %v2763_v56  ;;  %v2768_v16 = vadd.f32 %v2755_v34, %v2754_v42  ;;  %v2787_v43 = vmul.f32 %v2755_v34, %v5073_v19 }
 0x51a   : > { %v2796_v25 = vsel %vm365_vm1, %v2785_v60, 0.0  ;;  %v2786_v5 = vmul.f32 %v2754_v42, %v5076_v24 }
 0x51b   : > { %v2742_v21 = vpop.f32.mrf.mxu0  ;;  %2766 = vadd.xlane.f32.xlu2 %v2765_v57  ;;  %v2797_v50 = vadd.f32 %v2796_v25, %v2795_v33  ;;  %v2719_v20 = vpop.f32.mrf.mxu2 }
 0x51c   : > { %v5078_v26 = vadd.f32 %v2742_v21, %v2714_v14  ;;  %v2658_v12 = vpop.f32.mrf.mxu1  ;;  %v2800_v2 = vadd.f32 %v2787_v43, %v2786_v5  ;;  %v2789_v14 = vmul.f32 %v2757_v13, %v5089_v15 }
 0x51d   : > { %2798 = vadd.xlane.f32.xlu1 %v2797_v50  ;;  %v5086_v44 = vadd.f32 %v2658_v12, %v2630_v29 }
 0x51e   : > { %v2756_v35 = vmul.f32 %v5078_v26, %v5258_v11 }
 0x51f   : > { %v2758_v32 = vmul.f32 %v5086_v44, %v5256_v53 }
 0x520   : > { %v2687_v31 = vpop.f32.mrf.mxu3  ;;  %v2769_v37 = vsel %vm365_vm1, %v2756_v35, 0.0  ;;  %v2788_v22 = vmul.f32 %v2756_v35, %v5078_v26 }
 0x521   : > { %v2717_v36 = vadd.f32 %v2716_v51, %v2687_v31  ;;  %v2770_v28 = vadd.f32 %v2769_v37, %v2768_v16  ;;  %v2773_v23 = vadd.f32 %v2758_v32, %v2757_v13  ;;  %v2790_v55 = vmul.f32 %v2758_v32, %v5086_v44 }
 0x523   : > { %v2745_v9 = vpop.f32.mrf.mxu0  ;;  %v2805_v33 = vadd.f32 %v2790_v55, %v2789_v14 }
 0x524   : > { %v5093_v3 = vadd.f32 %v2745_v9, %v2717_v36  ;;  %v2661_v49 = vpop.f32.mrf.mxu1 }
 0x525   : > { %2771 = vadd.xlane.f32.xlu1 %v2770_v28  ;;  %v5097_v7 = vadd.f32 %v2661_v49, %v2633_v0 }
 0x526   : > { %v2759_v10 = vmul.f32 %v5093_v3, %v5258_v11 }
 0x527   : > { %v2761_v39 = vmul.f32 %v5097_v7, %v5256_v53  ;;  %v2801_v53 = vsel %vm365_vm1, %v2788_v22, 0.0 }
 0x528   : > { %v2690_v4 = vpop.f32.mrf.mxu3  ;;  %v2774_v17 = vsel %vm365_vm1, %v2759_v10, 0.0  ;;  %v2802_v41 = vadd.f32 %v2801_v53, %v2800_v2  ;;  %v2791_v60 = vmul.f32 %v2759_v10, %v5093_v3 }
 0x529   : > { %v2720_v59 = vadd.f32 %v2719_v20, %v2690_v4  ;;  %v2775_v27 = vadd.f32 %v2774_v17, %v2773_v23  ;;  %v2793_v6 = vmul.f32 %v2761_v39, %v5097_v7  ;;  %v2778_v54 = vadd.f32 %v2761_v39, %v2760_v61  ;;  %v2900_v39 = vld [vmem:[%s3577_s20 + $0x10] sm:$0xff] }
 0x52a   : > { %v2806_v57 = vsel %vm365_vm1, %v2791_v60, 0.0 }
 0x52b   : > { %v2748_v30 = vpop.f32.mrf.mxu0  ;;  %2776 = vadd.xlane.f32.xlu0 %v2775_v27  ;;  %v2810_v56 = vadd.f32 %v2793_v6, %v2792_v48  ;;  %v2807_v25 = vadd.f32 %v2806_v57, %v2805_v33  ;;  %v2901_v27 = vld [vmem:[%s3577_s20 + $0x18] sm:$0xff] }
 0x52c   : > { %v5110_v8 = vadd.f32 %v2748_v30, %v2720_v59  ;;  %v2899_v59 = vld [vmem:[%s3577_s20 + $0x8] sm:$0xff] }
 0x52e   : > { %v2762_v46 = vmul.f32 %v5110_v8, %v5258_v11 }
 0x530   : > { %v2794_v58 = vmul.f32 %v2762_v46, %v5110_v8  ;;  %v2779_v62 = vsel %vm365_vm1, %v2762_v46, 0.0 }
 0x531   : > { %v2780_v47 = vadd.f32 %v2779_v62, %v2778_v54 }
 0x532   : > { %v2811_v38 = vsel %vm365_vm1, %v2794_v58, 0.0 }
 0x533   : > { %2803 = vadd.xlane.f32.xlu0 %v2802_v41  ;;  %2781 = vadd.xlane.f32.xlu2 %v2780_v47  ;;  %v2812_v11 = vadd.f32 %v2811_v38, %v2810_v56 }
 0x535   : > { %2813 = vadd.xlane.f32.xlu1 %v2812_v11 }
 0x53b   : > { %2808 = vadd.xlane.f32.xlu2 %v2807_v25 }
 0x58e   : > { %v2767_v21 = vpop.xlane.xlu2 %2766 }
 0x58f   : > { %v2815_v50 = vmul.f32 0.00390625, %v2767_v21 }
 0x590   : > { %v2799_v51 = vpop.xlane.xlu1 %2798 }
 0x591   : > { %v2819_v12 = vmul.f32 0.00390625, %v2799_v51  ;;  %v2823_v63 = vmul.f32 %v2815_v50, %v2815_v50  ;;  %v2875_v20 = vsub.f32 %v5059_v52, %v2815_v50  ;;  %v2876_v23 = vsub.f32 %v5057_v18, %v2815_v50 }
 0x592   : > { %v2877_v4 = vsub.f32 %v5065_v40, %v2815_v50 }
 0x593   : > { %v2827_v29 = vsub.f32 %v2819_v12, %v2823_v63 }
 0x595   : > { %v2831_v34 = vadd.f32 1e-05, %v2827_v29 }
 0x597   : > { %3213 = vrsqrt.f32 %v2831_v34  ;;  %vm2841_vm2 = vweird.f32 %v2831_v34 }
 0x598   : > { %v2772_v37 = vpop.xlane.xlu1 %2771 }
 0x599   : > { %v5125_v1 = vmul.f32 0.00390625, %v2772_v37 }
 0x59b   : > { %v2824_v13 = vmul.f32 %v5125_v1, %v5125_v1  ;;  %v2878_v63 = vsub.f32 %v5076_v24, %v5125_v1  ;;  %v2879_v29 = vsub.f32 %v5073_v19, %v5125_v1 }
 0x59d   : > { %v3214_v35 = vpop.eup %3213 }
 0x59e   : > { %v2777_v42 = vpop.xlane.xlu0 %2776  ;;  %v2836_v31 = vmul.f32 %v3214_v35, %v2831_v34  ;;  %vm2842_vm0 = vweird.f32 %v3214_v35  ;;  %v2880_v34 = vsub.f32 %v5078_v26, %v5125_v1 }
 0x59f   : > { %vm2843_vm3 = vmor %vm2841_vm2, %vm2842_vm0  ;;  %v5138_v6 = vmul.f32 0.00390625, %v2777_v42  ;;  %v2903_v42 = vld [vmem:[%s3577_s20 + $0x30] sm:$0xff] }
 0x5a0   : > { %v2837_v36 = vmul.f32 %v3214_v35, %v2836_v31  ;;  %v2904_v31 = vld [vmem:[%s3577_s20 + $0x38] sm:$0xff] }
 0x5a1   : > { %v2825_v62 = vmul.f32 %v5138_v6, %v5138_v6 }
 0x5a2   : > { %v2838_v16 = vmul.f32 0.5, %v2837_v36 }
 0x5a4   : > { %v2839_v0 = vsub.f32 1.5, %v2838_v16 }
 0x5a6   : > { %v2804_v32 = vpop.xlane.xlu0 %2803  ;;  %v2782_v9 = vpop.xlane.xlu2 %2781  ;;  %v2840_v28 = vmul.f32 %v3214_v35, %v2839_v0 }
 0x5a7   : > { %v2820_v49 = vmul.f32 0.00390625, %v2804_v32  ;;  %v5130_v10 = vmul.f32 0.00390625, %v2782_v9 }
 0x5a8   : > { %v2814_v17 = vpop.xlane.xlu1 %2813  ;;  %v2844_v22 = vsel %vm2843_vm3, %v3214_v35, %v2840_v28  ;;  %v2902_v35 = vld [vmem:[%s3577_s20 + $0x28] sm:$0xff] }
 0x5a9   : > { %v2828_v61 = vsub.f32 %v2820_v49, %v2824_v13  ;;  %v2887_v43 = vmul.f32 %v2875_v20, %v2844_v22  ;;  %v2888_v30 = vmul.f32 %v2876_v23, %v2844_v22  ;;  %v2889_v5 = vmul.f32 %v2877_v4, %v2844_v22  ;;  %v2908_v23 = vld [vmem:[%s3577_s20 + $0x68] sm:$0xff]  ;;  %v2909_v4 = vld [vmem:[%s3577_s20 + $0x70] sm:$0xff] }
 0x5aa   : > { %v2822_v53 = vmul.f32 0.00390625, %v2814_v17  ;;  %v2826_v52 = vmul.f32 %v5130_v10, %v5130_v10  ;;  %v2884_v19 = vsub.f32 %v5101_v45, %v5130_v10  ;;  %v2885_v26 = vsub.f32 %v5097_v7, %v5130_v10  ;;  %v2910_v45 = vld [vmem:[%s3577_s20 + $0x78] sm:$0xff] }
 0x5ab   : > { %v2832_v46 = vadd.f32 1e-05, %v2828_v61  ;;  %v2911_v18 = vadd.f32 %v2899_v59, %v2887_v43  ;;  %v2912_v48 = vadd.f32 %v2900_v39, %v2888_v30  ;;  %v2913_v40 = vadd.f32 %v2901_v27, %v2889_v5 }
 0x5ac   : > { %v2830_v2 = vsub.f32 %v2822_v53, %v2826_v52  ;;  %v2886_v20 = vsub.f32 %v5110_v8, %v5130_v10  ;;  %v2881_v22 = vsub.f32 %v5089_v15, %v5138_v6  ;;  %v2882_v8 = vsub.f32 %v5086_v44, %v5138_v6  ;;  %v2905_v44 = vld [vmem:[%s3577_s20 + $0x48] sm:$0xff]  ;;  %v2906_v15 = vld [vmem:[%s3577_s20 + $0x50] sm:$0xff] }
 0x5ad   : > { %3215 = vrsqrt.f32 %v2832_v46  ;;  %2923 = vst [vmem:[%s5142_s29] sm:$0xff] %v2911_v18  ;;  %vm2851_vm5 = vweird.f32 %v2832_v46  ;;  %v2883_v61 = vsub.f32 %v5093_v3, %v5138_v6 }
 0x5ae   : > { %v2809_v54 = vpop.xlane.xlu2 %2808  ;;  %2924 = vst [vmem:[%s5142_s29 + $0x8] sm:$0xff] %v2912_v48  ;;  %v2834_v58 = vadd.f32 1e-05, %v2830_v2 }
 0x5af   : > { %v2821_v41 = vmul.f32 0.00390625, %v2809_v54  ;;  %2925 = vst.msk [vmem:[%s5142_s29 + $0x10] sm:$0xff] %vm365_vm1, %v2913_v40 }
 0x5b0   : > { %3217 = vrsqrt.f32 %v2834_v58  ;;  %vm2871_vm8 = vweird.f32 %v2834_v58 }
 0x5b1   : > { %v2829_v47 = vsub.f32 %v2821_v41, %v2825_v62 }
 0x5b3   : > { %v3216_v56 = vpop.eup %3215  ;;  %v2833_v60 = vadd.f32 1e-05, %v2829_v47 }
 0x5b4   : > { %v2846_v38 = vmul.f32 %v3216_v56, %v2832_v46  ;;  %vm2852_vm4 = vweird.f32 %v3216_v56  ;;  %v2907_v46 = vld [vmem:[%s3577_s20 + $0x58] sm:$0xff]  ;;  %s2936_s20 = scalar_lea.sflag [#allocation6], %s3573_s8 }
 0x5b5   : > { %3219 = vrsqrt.f32 %v2833_v60  ;;  %vm2853_vm6 = vmor %vm2851_vm5, %vm2852_vm4  ;;  %vm2861_vm11 = vweird.f32 %v2833_v60 }
 0x5b6   : > { %v2847_v55 = vmul.f32 %v3216_v56, %v2846_v38  ;;  %v3218_v11 = vpop.eup %3217 }
 0x5b7   : > { %v2866_v57 = vmul.f32 %v3218_v11, %v2834_v58  ;;  %vm2872_vm7 = vweird.f32 %v3218_v11 }
 0x5b8   : > { %v2848_v14 = vmul.f32 0.5, %v2847_v55  ;;  %vm2873_vm9 = vmor %vm2871_vm8, %vm2872_vm7 }
 0x5b9   : > { %v2867_v25 = vmul.f32 %v3218_v11, %v2866_v57 }
 0x5ba   : > { %v2849_v33 = vsub.f32 1.5, %v2848_v14 }
 0x5bb   : > { %v3220_v21 = vpop.eup %3219  ;;  %v2868_v51 = vmul.f32 0.5, %v2867_v25 }
 0x5bc   : > { %v2850_v50 = vmul.f32 %v3216_v56, %v2849_v33  ;;  %v2856_v12 = vmul.f32 %v3220_v21, %v2833_v60  ;;  %vm2862_vm10 = vweird.f32 %v3220_v21 }
 0x5bd   : > { %v2869_v36 = vsub.f32 1.5, %v2868_v51  ;;  %vm2863_vm12 = vmor %vm2861_vm11, %vm2862_vm10 }
 0x5be   : > { %v2854_v37 = vsel %vm2853_vm6, %v3216_v56, %v2850_v50  ;;  %v2857_v16 = vmul.f32 %v3220_v21, %v2856_v12 }
 0x5bf   : > { %v2890_v0 = vmul.f32 %v2878_v63, %v2854_v37  ;;  %v2891_v24 = vmul.f32 %v2879_v29, %v2854_v37  ;;  %v2892_v32 = vmul.f32 %v2880_v34, %v2854_v37  ;;  %v2870_v1 = vmul.f32 %v3218_v11, %v2869_v36 }
 0x5c0   : > { %v2858_v9 = vmul.f32 0.5, %v2857_v16 }
 0x5c1   : > { %v2914_v28 = vadd.f32 %v2902_v35, %v2890_v0  ;;  %v2915_v49 = vadd.f32 %v2903_v42, %v2891_v24  ;;  %v2916_v13 = vadd.f32 %v2904_v31, %v2892_v32  ;;  %v2874_v17 = vsel %vm2873_vm9, %v3218_v11, %v2870_v1 }
 0x5c2   : > { %v2859_v59 = vsub.f32 1.5, %v2858_v9  ;;  %v2896_v7 = vmul.f32 %v2884_v19, %v2874_v17  ;;  %v2897_v39 = vmul.f32 %v2885_v26, %v2874_v17  ;;  %v2898_v27 = vmul.f32 %v2886_v20, %v2874_v17 }
 0x5c3   : > { %2926 = vst [vmem:[%s5142_s29 + $0x18] sm:$0xff] %v2914_v28 }
 0x5c4   : > { %2927 = vst [vmem:[%s5142_s29 + $0x20] sm:$0xff] %v2915_v49  ;;  %v2860_v10 = vmul.f32 %v3220_v21, %v2859_v59  ;;  %v2920_v43 = vadd.f32 %v2908_v23, %v2896_v7  ;;  %v2921_v30 = vadd.f32 %v2909_v4, %v2897_v39  ;;  %v2922_v5 = vadd.f32 %v2910_v45, %v2898_v27 }
 0x5c5   : > { %2928 = vst.msk [vmem:[%s5142_s29 + $0x28] sm:$0xff] %vm365_vm1, %v2916_v13 }
 0x5c6   : > { %v2864_v53 = vsel %vm2863_vm12, %v3220_v21, %v2860_v10  ;;  %2932 = vst [vmem:[%s5142_s29 + $0x48] sm:$0xff] %v2920_v43 }
 0x5c7   : > { %v2893_v3 = vmul.f32 %v2881_v22, %v2864_v53  ;;  %v2894_v6 = vmul.f32 %v2882_v8, %v2864_v53  ;;  %v2895_v52 = vmul.f32 %v2883_v61, %v2864_v53  ;;  %2933 = vst [vmem:[%s5142_s29 + $0x50] sm:$0xff] %v2921_v30 }
 0x5c8   : > { %2934 = vst.msk [vmem:[%s5142_s29 + $0x58] sm:$0xff] %vm365_vm1, %v2922_v5 }
 0x5c9   : > { %v2917_v18 = vadd.f32 %v2905_v44, %v2893_v3  ;;  %v2918_v48 = vadd.f32 %v2906_v15, %v2894_v6  ;;  %v2919_v40 = vadd.f32 %v2907_v46, %v2895_v52 }
 0x5cb   : > { %2929 = vst [vmem:[%s5142_s29 + $0x30] sm:$0xff] %v2917_v18 }
 0x5cc   : > { %2930 = vst [vmem:[%s5142_s29 + $0x38] sm:$0xff] %v2918_v48 }
 0x5cd   : > { %2931 = vst.msk [vmem:[%s5142_s29 + $0x40] sm:$0xff] %vm365_vm1, %v2919_v40 }
 0x5ce   : > { %3370 = shalt.err (!%p3367_p10)
}
 0x5cf   : > { %s3435_s8 = smov 384   ;;  %s3436_s25 = smov 24  }
 0x5d0   : > { %3127 = dma.vmem_to_hbm [thread:$0]  (%p3545_p7), %s2949_s10, 1536, %s2951_s14, %s2936_s20, %s3435_s8, %s3435_s8, %s3436_s25  }
 0x5d1 PF: > { %s2965_s5 = sand.u32 1, %s3405_s15   ;;  %p5259_p12 = scmp.ge.s32.totalorder %s3417_s18, 2 }
 0x5d2   : > { %s2966_s29 = scalar_lea.sflag [#allocation6], %s2965_s5 }
 0x5d3   : > { %p3144_p13 = pnand %p5259_p12, %p3497_p6 }
 0x5d5   : > { %p3145_p0 = pneg %p3144_p13 }
 0x5d7   : > { %3400 = dma.done.wait (%p3145_p0), %s2966_s29, 1536  }
 0x5d8   : > { %3402 = vsyncadd (%p3145_p0), %s2966_s29, 4294965760  ;;  %p19_p3 = scmp.ge.s32.totalorder %s3529_s23, 4   ;;  %s5260_s15 = smov %s3409_s16 }
 0x5d9   : > { %s5261_s16 = smov %s3413_s17  ;;  %s5262_s17 = smov %s3541_s27 }
 0x5da   : > { %s5263_s18 = smov %s3529_s23  ;;  %21 = sbr.rel (!%p19_p3) target bundleno = 7 (0x7), region = 93 }
 0x5df   :  { %2972 = vsyncpa [#allocation5], 1 }
 0x5e0   :  { %2974 = vsyncpa [#allocation5 + $0x1], 1 }
 0x5e1   :  { %2975 = vsyncpa [#allocation8], 1 }
 0x5e2   :  { %2976 = vsyncpa [#allocation11], 1 }
 0x5e3   :  { %2977 = vsyncpa [#allocation6], 1 }
 0x5e4   :  { %2979 = vsyncpa [#allocation6 + $0x1], 1 }

</bundles_post_ra>
